<compile_context>
chip_gen: v7x
topology: tpu7x:2x2x1
jax: 0.10.0
libtpu: 0.0.40
codegen_flags: <defaults>
</compile_context>

<pallas_src>
import math

import jax
import jax.numpy as jnp
import numpy as np
from jax import lax
from jax.experimental import pallas as pl
from jax.experimental.pallas import tpu as pltpu

EPS = 1e-5
PATCH_TILE_BUDGET = 2 * 1024 * 1024      # target bytes for one streamed (K, TM) tile
TM_CAP = 8192                            # lane cap per grid step
RESIDENT_FUSE_LIMIT = 16 * 1024 * 1024   # max resident out+residual bytes for fusion


# ------------------------------ small helpers -------------------------------

def _elu(v):
    # exp(min(v, 0)) keeps the discarded positive branch finite.
    return jnp.where(v > 0, v, jnp.exp(jnp.minimum(v, 0.0)) - 1.0)


def _shift_lanes(x, s):
    """out[:, j] = x[:, j + s], shifting zeros in at the tile edge (lane shift, XLU).

    Explicit concatenate (== jnp.roll with the wrap masked) keeps the shift
    direction unambiguous; it is applied to the small (Cout, TM) matmul result,
    not the (K, TM) patch tile."""
    if s == 0:
        return x
    z = jnp.zeros((x.shape[0], abs(s)), x.dtype)
    if s > 0:
        return jnp.concatenate([x[:, s:], z], axis=1)
    return jnp.concatenate([z, x[:, :s]], axis=1)


def _choose_tm(m, k, itemsize, lane_mult=128,
               budget=PATCH_TILE_BUDGET, cap=TM_CAP):
    """K-aware tile: largest TM dividing M, multiple of lane_mult, with the streamed
    (K, TM) tile staying within `budget` bytes (review item: avoid grid-overhead-bound
    small-K layers and tiny strided DMA rows)."""
    tm = min(budget // max(k * itemsize, 1), cap, m)
    tm = (tm // lane_mult) * lane_mult
    while tm >= lane_mult and m % tm != 0:
        tm -= lane_mult
    if tm < lane_mult:
        tm = m   # single full-width block: block dim == array dim is always legal
    return tm


# ----------------------------- main fused kernel ----------------------------

def _make_layer_kernel(cout, tm, nt, total_m, ntaps, w_dim, with_residual):
    """Fused conv-as-matmul -> BatchNorm(train) -> ELU [-> +residual -> ELU].

    Grid axis 0 tiles M (sequential / "arbitrary").  The (Cout, M) output block is
    resident across the grid; each step writes its lane-dense conv tile and adds
    lane-parallel per-channel sum / sum-of-squares partials; the last step reduces
    the stats and normalizes + activates the whole resident block in place.

    ntaps > 1  =>  the kw axis of the 5x5x5 conv is folded in-kernel: `ntaps`
    matmuls on the same (K, TM) patch tile, whose (Cout, TM) results are lane-
    shifted and w-boundary masked before accumulation (requires tm % w_dim == 0).
    """
    lane_stats = (tm % 128 == 0)

    def kernel(*refs):
        if with_residual:
            p_ref, w_ref, gb_ref, r_ref, o_ref, stat_ref = refs
        else:
            p_ref, w_ref, gb_ref, o_ref, stat_ref = refs
            r_ref = None

        i = pl.program_id(0)

        @pl.when(i == 0)
        def _():
            stat_ref[...] = jnp.zeros_like(stat_ref)

        # ----- conv tile: (Cout, K) @ (K, TM) on the MXU, f32 accumulation -----
        if ntaps == 1:
            y = jnp.dot(w_ref[0], p_ref[...], preferred_element_type=jnp.float32)
        else:
            p = p_ref[...]                                    # (K, TM) bf16
            half = ntaps // 2
            # TM % w_dim == 0  =>  lane j within the tile has w-coordinate j % w_dim,
            # and no valid output lane ever needs patch columns from another tile.
            w_idx = lax.broadcasted_iota(jnp.int32, (cout, tm), 1) % w_dim
            y = jnp.zeros((cout, tm), jnp.float32)
            for kw in range(ntaps):
                s = kw - half
                c_kw = jnp.dot(w_ref[kw], p, preferred_element_type=jnp.float32)
                c_kw = _shift_lanes(c_kw, s)                  # out[:, j] = c_kw[:, j+s]
                if s != 0:
                    valid = (w_idx + s >= 0) & (w_idx + s < w_dim)
                    c_kw = jnp.where(valid, c_kw, 0.0)
                y = y + c_kw

        col = pl.multiple_of(i * tm, tm)          # lane-aligned -> unmasked full vst
        o_ref[:, pl.ds(col, tm)] = y

        # ----- lane-parallel BN statistics (VPU adds; XLU reduce deferred) -----
        y2 = y * y
        if lane_stats:
            ps = y[:, 0:128]
            qs = y2[:, 0:128]
            for c in range(1, tm // 128):
                sl = slice(c * 128, (c + 1) * 128)
                ps = ps + y[:, sl]
                qs = qs + y2[:, sl]
            stat_ref[:, 0:128] += ps
            stat_ref[:, 128:256] += qs
        else:  # tiny-M fallback (TM == M < 128)
            stat_ref[:, 0:1] += jnp.sum(y, axis=1, keepdims=True)
            stat_ref[:, 1:2] += jnp.sum(y2, axis=1, keepdims=True)

        # ----- last step: BN (training stats) + ELU [+ residual + ELU] in place -----
        @pl.when(i == nt - 1)
        def _():
            if lane_stats:
                s1 = jnp.sum(stat_ref[:, 0:128], axis=1, keepdims=True)
                s2 = jnp.sum(stat_ref[:, 128:256], axis=1, keepdims=True)
            else:
                s1 = stat_ref[:, 0:1]
                s2 = stat_ref[:, 1:2]
            inv_m = 1.0 / float(total_m)
            mean = s1 * inv_m
            var = s2 * inv_m - mean * mean       # one-pass var; fine in f32 here
            scale = gb_ref[:, 0:1] * lax.rsqrt(var + EPS)
            shift = gb_ref[:, 1:2] - mean * scale
            # Hoisted lane-broadcasts (JAX does not CSE broadcast_in_dim per-iter).
            scale_b = jnp.broadcast_to(scale, (cout, tm))
            shift_b = jnp.broadcast_to(shift, (cout, tm))

            def body(t, carry):
                c0 = pl.multiple_of(t * tm, tm)
                v = o_ref[:, pl.ds(c0, tm)] * scale_b + shift_b
                a = _elu(v)
                if with_residual:
                    a = _elu(a + r_ref[:, pl.ds(c0, tm)])
                o_ref[:, pl.ds(c0, tm)] = a
                return carry

            lax.fori_loop(0, nt, body, 0, unroll=nt <= 8)

    return kernel


def fused_conv_bn_elu(patches, w_taps, gb, residual=None, *,
                      fold_w=None, mxu_dtype=jnp.bfloat16):
    """patches: (K, M); w_taps: (T, Cout, K); gb: (Cout, 2) [gamma | beta];
    residual: optional (Cout, M) f32.  fold_w: W (fastest spatial axis) when the
    T taps are kw-shifts to be folded in-kernel.  Returns (Cout, M) f32."""
    K, M = patches.shape
    T, Cout, K2 = w_taps.shape
    assert K2 == K
    itemsize = jnp.dtype(mxu_dtype).itemsize

    lane_mult = 128
    if fold_w is not None:
        lane_mult = 128 * fold_w // math.gcd(128, fold_w)     # TM % W == 0 required
    TM = _choose_tm(M, K, itemsize, lane_mult)
    NT = M // TM
    assert M % TM == 0
    if fold_w is not None:
        assert TM % fold_w == 0, "kw folding needs w-period-aligned tiles"

    patches = patches.astype(mxu_dtype)
    w_taps = w_taps.astype(mxu_dtype)
    gb = gb.astype(jnp.float32)

    kernel = _make_layer_kernel(Cout, TM, NT, M, T, fold_w, residual is not None)

    in_specs = [
        pl.BlockSpec((K, TM), lambda i: (0, i)),            # streamed, double-buffered
        pl.BlockSpec((T, Cout, K), lambda i: (0, 0, 0)),    # resident weights
        pl.BlockSpec((Cout, 2), lambda i: (0, 0)),          # resident gamma/beta
    ]
    args = [patches, w_taps, gb]
    if residual is not None:
        in_specs.append(pl.BlockSpec((Cout, M), lambda i: (0, 0)))   # resident
        args.append(residual.astype(jnp.float32))

    # Explicit VMEM budget (review item: v5e default scoped VMEM is 16 MiB; v7x has
    # only 64 MiB physical).  Resident blocks + double-buffered patch tiles.
    resident = Cout * M * 4 + (Cout * M * 4 if residual is not None else 0) \
        + T * Cout * K * itemsize
    streaming = 2 * K * TM * itemsize
    vmem_need = resident + streaming + (2 << 20)
    vmem_limit = int(min(max(2 * vmem_need, 32 << 20), 96 << 20))

    return pl.pallas_call(
        kernel,
        out_shape=jax.ShapeDtypeStruct((Cout, M), jnp.float32),
        grid=(NT,),
        in_specs=in_specs,
        out_specs=pl.BlockSpec((Cout, M), lambda i: (0, 0)),   # resident accumulator
        scratch_shapes=[pltpu.VMEM((Cout, 256), jnp.float32)],
        compiler_params=pltpu.CompilerParams(
            # Sequential: stats accumulate into scratch across the M axis.
            # TODO(synk): v7x 2-TC split needs per-core partial stats first.
            dimension_semantics=("arbitrary",),
            vmem_limit_bytes=vmem_limit,
        ),
    )(*args)


# ---- streamed residual epilogue (fallback when out+residual can't stay resident) ---

def _add_elu_kernel(a_ref, b_ref, o_ref):
    o_ref[...] = _elu(a_ref[...] + b_ref[...])


def fused_add_elu(a, b):
    Cout, M = a.shape
    TM = _choose_tm(M, Cout, 4, 128, budget=4 * 1024 * 1024)
    return pl.pallas_call(
        _add_elu_kernel,
        out_shape=jax.ShapeDtypeStruct((Cout, M), jnp.float32),
        grid=(M // TM,),
        in_specs=[pl.BlockSpec((Cout, TM), lambda i: (0, i)),
                  pl.BlockSpec((Cout, TM), lambda i: (0, i))],
        out_specs=pl.BlockSpec((Cout, TM), lambda i: (0, i)),
        compiler_params=pltpu.CompilerParams(
            dimension_semantics=("parallel",),
            vmem_limit_bytes=32 << 20),
    )(a, b)


# ------------------------------ JAX glue ops --------------------------------
# Pure data movement in channels-major flat layout, so the kernels' (K, M)/(Cout, M)
# layouts need no large transposes.

def space_to_depth_2_cm(x):
    """(N,C,D,H,W) -> (C*8, N*D2*H2*W2).  K index = c*8 + kd*4 + kh*2 + kw."""
    N, C, D, H, W = x.shape
    x = x.reshape(N, C, D // 2, 2, H // 2, 2, W // 2, 2)
    x = jnp.transpose(x, (1, 3, 5, 7, 0, 2, 4, 6))   # C, kd, kh, kw, N, D2, H2, W2
    return x.reshape(C * 8, N * (D // 2) * (H // 2) * (W // 2))


def im2col_dh_cm(a_cm, N, D, H, W):
    """(C, N*D*H*W) -> (C*25, N*D*H*W): taps over (kd, kh) only (kernel 5, pad 2);
    the kw taps are folded inside the Pallas kernel.  Row index = c*25 + kd*5 + kh."""
    C = a_cm.shape[0]
    a = a_cm.reshape(C, N, D, H, W)
    ap = jnp.pad(a, ((0, 0), (0, 0), (2, 2), (2, 2), (0, 0)))
    cols = [ap[:, :, kd:kd + D, kh:kh + H, :]
            for kd in range(5) for kh in range(5)]
    p = jnp.stack(cols, axis=1)                      # (C, 25, N, D, H, W)
    return p.reshape(C * 25, N * D * H * W)


# ------------------------- parameters & forward -----------------------------

def init_params(key, in_chans, n_convs):
    out_chans = 2 * in_chans
    params = {}
    key, k1, k2, k3, k4 = jax.random.split(key, 5)
    params['down_w5d'] = 0.1 * jax.random.normal(k1, (out_chans, in_chans, 2, 2, 2), jnp.float32)
    params['down_b'] = 0.05 * jax.random.normal(k2, (out_chans,), jnp.float32)
    params['down_g'] = 1.0 + 0.1 * jax.random.normal(k3, (out_chans,), jnp.float32)
    params['down_beta'] = 0.05 * jax.random.normal(k4, (out_chans,), jnp.float32)
    params['luconv'] = []
    for _ in range(n_convs):
        key, k1, k2, k3, k4 = jax.random.split(key, 5)
        params['luconv'].append(dict(
            w5d=0.05 * jax.random.normal(k1, (out_chans, out_chans, 5, 5, 5), jnp.float32),
            b=0.05 * jax.random.normal(k2, (out_chans,), jnp.float32),
            g=1.0 + 0.1 * jax.random.normal(k3, (out_chans,), jnp.float32),
            beta=0.05 * jax.random.normal(k4, (out_chans,), jnp.float32),
        ))
    return params


def down_transition_pallas(x, params):
    """DownTransition.forward: ELU(BN(down_conv(x))) -> nConvs*LUConv -> ELU(out+down)."""
    N, C, D, H, W = x.shape
    Cout = 2 * C
    D2, H2, W2 = D // 2, H // 2, W // 2
    M = N * D2 * H2 * W2

    # down_conv: 2x2x2 stride-2 conv == space-to-depth + lane-dense matmul (1x traffic,
    # kept f32).  Conv bias omitted: training-mode BN mean subtraction cancels it.
    p0 = space_to_depth_2_cm(x)                                   # (C*8, M)
    w0 = params['down_w5d'].reshape(1, Cout, C * 8)               # (1, Cout, K)
    gb0 = jnp.stack([params['down_g'], params['down_beta']], axis=1)
    down = fused_conv_bn_elu(p0, w0, gb0, fold_w=None, mxu_dtype=jnp.float32)

    # do1 = passthrough (dropout=False)
    out = down
    luconvs = params['luconv']
    # Residual fusion only while the resident (Cout, M) out + residual stay small
    # enough for VMEM (v7x: 64 MiB physical); otherwise stream a tiny epilogue pass.
    fuse_residual = (2 * Cout * M * 4) <= RESIDENT_FUSE_LIMIT

    for idx, lp in enumerate(luconvs):
        # Cast before im2col so the 25x patch tensor is materialized directly in bf16.
        p = im2col_dh_cm(out.astype(jnp.bfloat16), N, D2, H2, W2)  # (Cout*25, M)
        w = jnp.moveaxis(lp['w5d'], 4, 0).reshape(5, Cout, Cout * 25)   # (5, Cout, K)
        gb = jnp.stack([lp['g'], lp['beta']], axis=1)
        last = idx == len(luconvs) - 1
        residual = down if (last and fuse_residual) else None
        out = fused_conv_bn_elu(p, w, gb, residual=residual,
                                fold_w=W2, mxu_dtype=jnp.bfloat16)

    if not luconvs:
        out = fused_add_elu(down, down)
    elif not fuse_residual:
        out = fused_add_elu(out, down)

    # Single layout conversion at the very end: (Cout, M) -> NCDHW.
    return jnp.transpose(out.reshape(Cout, N, D2, H2, W2), (1, 0, 2, 3, 4))


# --------------------------- pure-JAX reference ------------------------------

def ref_forward(x, params):
    def elu(v):
        return jnp.where(v > 0, v, jnp.exp(v) - 1.0)

    def bn(v, g, b):
        m = jnp.mean(v, axis=(0, 2, 3, 4), keepdims=True)
        var = jnp.mean((v - m) ** 2, axis=(0, 2, 3, 4), keepdims=True)
        return (v - m) * lax.rsqrt(var + EPS) * g.reshape(1, -1, 1, 1, 1) + b.reshape(1, -1, 1, 1, 1)

    dn = ('NCDHW', 'OIDHW', 'NCDHW')
    down = lax.conv_general_dilated(x, params['down_w5d'], (2, 2, 2), 'VALID',
                                    dimension_numbers=dn, precision=lax.Precision.HIGHEST)
    down = elu(bn(down + params['down_b'].reshape(1, -1, 1, 1, 1),
                  params['down_g'], params['down_beta']))
    out = down
    for lp in params['luconv']:
        c = lax.conv_general_dilated(out, lp['w5d'], (1, 1, 1), [(2, 2)] * 3,
                                     dimension_numbers=dn, precision=lax.Precision.HIGHEST)
        out = elu(bn(c + lp['b'].reshape(1, -1, 1, 1, 1), lp['g'], lp['beta']))
    return elu(out + down)


# ---------------------------------- main -------------------------------------

if __name__ == "__main__":
    in_chans, n_convs = 4, 2
    key = jax.random.PRNGKey(0)
    kx, kp = jax.random.split(key)
    # NCDHW input; 16^3 spatial -> M = 2*8*8*8 = 1024 after downsampling.
    x = jax.random.normal(kx, (2, in_chans, 16, 16, 16), jnp.float32)
    params = init_params(kp, in_chans, n_convs)

    fwd = jax.jit(down_transition_pallas)
    out = jax.block_until_ready(fwd(x, params))

    ref = jax.block_until_ready(jax.jit(ref_forward)(x, params))
    # LUConv matmuls run with bf16 MXU inputs (f32 accumulation); tolerance sized for
    # two compounded bf16 conv layers vs. the f32 HIGHEST-precision reference.
    np.testing.assert_allclose(np.asarray(out), np.asarray(ref), rtol=3e-2, atol=3e-2)

    print("KERNEL_OK")
</pallas_src>

<mosaic_0001>
module attributes {stable_mosaic.version = 11 : i64} {
  func.func @kernel(%arg0: i32, %arg1: memref<32x1024xf32, #tpu.memory_space<vmem>>, %arg2: memref<1x8x32xf32, #tpu.memory_space<vmem>>, %arg3: memref<8x2xf32, #tpu.memory_space<vmem>>, %arg4: memref<8x1024xf32, #tpu.memory_space<vmem>>, %arg5: memref<8x256xf32, #tpu.memory_space<vmem>>) attributes {dimension_semantics = [#tpu.dimension_semantics<arbitrary>], iteration_bounds = array<i64: 1>, scalar_prefetch = 0 : i64, scratch_operands = 1 : i64, tpu.core_type = #tpu.core_type<tc>, window_params = [{transform_indices = @transform_0, window_bounds = array<i64: 32, 1024>}, {pipeline_mode = #tpu.pipeline_mode<synchronous>, transform_indices = @transform_1, window_bounds = array<i64: 1, 8, 32>}, {pipeline_mode = #tpu.pipeline_mode<synchronous>, transform_indices = @transform_2, window_bounds = array<i64: 8, 2>}, {pipeline_mode = #tpu.pipeline_mode<synchronous>, transform_indices = @transform_3, window_bounds = array<i64: 8, 1024>}]} {
    %c0_i32 = arith.constant 0 : i32
    %0 = arith.cmpi eq, %arg0, %c0_i32 : i32
    %1 = arith.extui %0 : i1 to i32
    %c0_i32_0 = arith.constant 0 : i32
    %2 = arith.cmpi ne, %1, %c0_i32_0 : i32
    scf.if %2 {
      %cst_15 = arith.constant 0.000000e+00 : f32
      %51 = vector.broadcast %cst_15 : f32 to vector<8x256xf32>
      %c0_16 = arith.constant 0 : index
      %c0_17 = arith.constant 0 : index
      %52 = vector.load %arg5[%c0_16, %c0_17] : memref<8x256xf32, #tpu.memory_space<vmem>>, vector<8x256xf32>
      tpu.vector_store %arg5[%c0_16, %c0_17], %51 {strides = array<i32>} : memref<8x256xf32, #tpu.memory_space<vmem>>, vector<8x256xf32>,
    } else {
    }
    %c0 = arith.constant 0 : index
    %c0_1 = arith.constant 0 : index
    %c0_2 = arith.constant 0 : index
    %3 = vector.load %arg2[%c0, %c0_1, %c0_2] : memref<1x8x32xf32, #tpu.memory_space<vmem>>, vector<1x8x32xf32>
    %4 = vector.shape_cast %3 : vector<1x8x32xf32> to vector<8x32xf32>
    %c0_3 = arith.constant 0 : index
    %c0_4 = arith.constant 0 : index
    %5 = vector.load %arg1[%c0_3, %c0_4] : memref<32x1024xf32, #tpu.memory_space<vmem>>, vector<32x1024xf32>
    %cst = arith.constant dense<0.000000e+00> : vector<8x1024xf32>
    %6 = tpu.matmul %4, %5, %cst {dimension_numbers = #tpu.dot_dimension_numbers<[1], [0], [0], [1], [0, 0, 1, 1], [], []>} : vector<8x32xf32>, vector<32x1024xf32>, vector<8x1024xf32> -> vector<8x1024xf32>
    %c1024_i32 = arith.constant 1024 : i32
    %7 = arith.muli %arg0, %c1024_i32 : i32
    %8 = tpu.assume_multiple %7, 1024 : i32
    %c0_5 = arith.constant 0 : index
    %9 = arith.index_cast %8 : i32 to index
    %10 = vector.load %arg4[%c0_5, %9] : memref<8x1024xf32, #tpu.memory_space<vmem>>, vector<8x1024xf32>
    tpu.vector_store %arg4[%c0_5, %9], %6 {strides = array<i32>} : memref<8x1024xf32, #tpu.memory_space<vmem>>, vector<8x1024xf32>,
    %11 = arith.mulf %6, %6 : vector<8x1024xf32>
    %12 = vector.extract_strided_slice %6 {offsets = [0, 0], sizes = [8, 128], strides = [1, 1]} : vector<8x1024xf32> to vector<8x128xf32>
    %13 = vector.extract_strided_slice %11 {offsets = [0, 0], sizes = [8, 128], strides = [1, 1]} : vector<8x1024xf32> to vector<8x128xf32>
    %14 = vector.extract_strided_slice %6 {offsets = [0, 128], sizes = [8, 128], strides = [1, 1]} : vector<8x1024xf32> to vector<8x128xf32>
    %15 = arith.addf %12, %14 : vector<8x128xf32>
    %16 = vector.extract_strided_slice %11 {offsets = [0, 128], sizes = [8, 128], strides = [1, 1]} : vector<8x1024xf32> to vector<8x128xf32>
    %17 = arith.addf %13, %16 : vector<8x128xf32>
    %18 = vector.extract_strided_slice %6 {offsets = [0, 256], sizes = [8, 128], strides = [1, 1]} : vector<8x1024xf32> to vector<8x128xf32>
    %19 = arith.addf %15, %18 : vector<8x128xf32>
    %20 = vector.extract_strided_slice %11 {offsets = [0, 256], sizes = [8, 128], strides = [1, 1]} : vector<8x1024xf32> to vector<8x128xf32>
    %21 = arith.addf %17, %20 : vector<8x128xf32>
    %22 = vector.extract_strided_slice %6 {offsets = [0, 384], sizes = [8, 128], strides = [1, 1]} : vector<8x1024xf32> to vector<8x128xf32>
    %23 = arith.addf %19, %22 : vector<8x128xf32>
    %24 = vector.extract_strided_slice %11 {offsets = [0, 384], sizes = [8, 128], strides = [1, 1]} : vector<8x1024xf32> to vector<8x128xf32>
    %25 = arith.addf %21, %24 : vector<8x128xf32>
    %26 = vector.extract_strided_slice %6 {offsets = [0, 512], sizes = [8, 128], strides = [1, 1]} : vector<8x1024xf32> to vector<8x128xf32>
    %27 = arith.addf %23, %26 : vector<8x128xf32>
    %28 = vector.extract_strided_slice %11 {offsets = [0, 512], sizes = [8, 128], strides = [1, 1]} : vector<8x1024xf32> to vector<8x128xf32>
    %29 = arith.addf %25, %28 : vector<8x128xf32>
    %30 = vector.extract_strided_slice %6 {offsets = [0, 640], sizes = [8, 128], strides = [1, 1]} : vector<8x1024xf32> to vector<8x128xf32>
    %31 = arith.addf %27, %30 : vector<8x128xf32>
    %32 = vector.extract_strided_slice %11 {offsets = [0, 640], sizes = [8, 128], strides = [1, 1]} : vector<8x1024xf32> to vector<8x128xf32>
    %33 = arith.addf %29, %32 : vector<8x128xf32>
    %34 = vector.extract_strided_slice %6 {offsets = [0, 768], sizes = [8, 128], strides = [1, 1]} : vector<8x1024xf32> to vector<8x128xf32>
    %35 = arith.addf %31, %34 : vector<8x128xf32>
    %36 = vector.extract_strided_slice %11 {offsets = [0, 768], sizes = [8, 128], strides = [1, 1]} : vector<8x1024xf32> to vector<8x128xf32>
    %37 = arith.addf %33, %36 : vector<8x128xf32>
    %38 = vector.extract_strided_slice %6 {offsets = [0, 896], sizes = [8, 128], strides = [1, 1]} : vector<8x1024xf32> to vector<8x128xf32>
    %39 = arith.addf %35, %38 : vector<8x128xf32>
    %40 = vector.extract_strided_slice %11 {offsets = [0, 896], sizes = [8, 128], strides = [1, 1]} : vector<8x1024xf32> to vector<8x128xf32>
    %41 = arith.addf %37, %40 : vector<8x128xf32>
    %c0_6 = arith.constant 0 : index
    %c0_7 = arith.constant 0 : index
    %42 = vector.load %arg5[%c0_6, %c0_7] : memref<8x256xf32, #tpu.memory_space<vmem>>, vector<8x128xf32>
    %43 = arith.addf %42, %39 : vector<8x128xf32>
    %c0_8 = arith.constant 0 : index
    %c0_9 = arith.constant 0 : index
    %44 = vector.load %arg5[%c0_8, %c0_9] : memref<8x256xf32, #tpu.memory_space<vmem>>, vector<8x128xf32>
    tpu.vector_store %arg5[%c0_8, %c0_9], %43 {strides = array<i32>} : memref<8x256xf32, #tpu.memory_space<vmem>>, vector<8x128xf32>,
    %c0_10 = arith.constant 0 : index
    %c128 = arith.constant 128 : index
    %45 = vector.load %arg5[%c0_10, %c128] : memref<8x256xf32, #tpu.memory_space<vmem>>, vector<8x128xf32>
    %46 = arith.addf %45, %41 : vector<8x128xf32>
    %c0_11 = arith.constant 0 : index
    %c128_12 = arith.constant 128 : index
    %47 = vector.load %arg5[%c0_11, %c128_12] : memref<8x256xf32, #tpu.memory_space<vmem>>, vector<8x128xf32>
    tpu.vector_store %arg5[%c0_11, %c128_12], %46 {strides = array<i32>} : memref<8x256xf32, #tpu.memory_space<vmem>>, vector<8x128xf32>,
    %c0_i32_13 = arith.constant 0 : i32
    %48 = arith.cmpi eq, %arg0, %c0_i32_13 : i32
    %49 = arith.extui %48 : i1 to i32
    %c0_i32_14 = arith.constant 0 : i32
    %50 = arith.cmpi ne, %49, %c0_i32_14 : i32
    scf.if %50 {
      %c0_15 = arith.constant 0 : index
      %c0_16 = arith.constant 0 : index
      %51 = vector.load %arg5[%c0_15, %c0_16] : memref<8x256xf32, #tpu.memory_space<vmem>>, vector<8x128xf32>
      %cst_17 = arith.constant dense<0.000000e+00> : vector<8xf32>
      %52 = vector.multi_reduction <add>, %51, %cst_17 [1] : vector<8x128xf32> to vector<8xf32>
      %53 = vector.shape_cast %52 : vector<8xf32> to vector<8x1xf32>
      %c0_18 = arith.constant 0 : index
      %c128_19 = arith.constant 128 : index
      %54 = vector.load %arg5[%c0_18, %c128_19] : memref<8x256xf32, #tpu.memory_space<vmem>>, vector<8x128xf32>
      %cst_20 = arith.constant dense<0.000000e+00> : vector<8xf32>
      %55 = vector.multi_reduction <add>, %54, %cst_20 [1] : vector<8x128xf32> to vector<8xf32>
      %56 = vector.shape_cast %55 : vector<8xf32> to vector<8x1xf32>
      %cst_21 = arith.constant 9.765625E-4 : f32
      %57 = vector.broadcast %cst_21 : f32 to vector<8x1xf32>
      %58 = arith.mulf %53, %57 : vector<8x1xf32>
      %cst_22 = arith.constant 9.765625E-4 : f32
      %59 = vector.broadcast %cst_22 : f32 to vector<8x1xf32>
      %60 = arith.mulf %56, %59 : vector<8x1xf32>
      %61 = arith.mulf %58, %58 : vector<8x1xf32>
      %62 = arith.subf %60, %61 : vector<8x1xf32>
      %c0_23 = arith.constant 0 : index
      %c0_24 = arith.constant 0 : index
      %63 = vector.load %arg3[%c0_23, %c0_24] : memref<8x2xf32, #tpu.memory_space<vmem>>, vector<8x1xf32>
      %cst_25 = arith.constant 9.99999974E-6 : f32
      %64 = vector.broadcast %cst_25 : f32 to vector<8x1xf32>
      %65 = arith.addf %62, %64 : vector<8x1xf32>
      %66 = math.rsqrt %65 : vector<8x1xf32>
      %67 = arith.mulf %63, %66 : vector<8x1xf32>
      %c0_26 = arith.constant 0 : index
      %c1 = arith.constant 1 : index
      %68 = vector.load %arg3[%c0_26, %c1] : memref<8x2xf32, #tpu.memory_space<vmem>>, vector<8x1xf32>
      %69 = arith.mulf %58, %67 : vector<8x1xf32>
      %70 = arith.subf %68, %69 : vector<8x1xf32>
      %71 = vector.shape_cast %67 : vector<8x1xf32> to vector<8x1xf32>
      %72 = vector.broadcast %71 : vector<8x1xf32> to vector<8x1024xf32>
      %73 = vector.shape_cast %70 : vector<8x1xf32> to vector<8x1xf32>
      %74 = vector.broadcast %73 : vector<8x1xf32> to vector<8x1024xf32>
      %c0_i32_27 = arith.constant 0 : i32
      %c1024_i32_28 = arith.constant 1024 : i32
      %75 = arith.muli %c0_i32_27, %c1024_i32_28 : i32
      %76 = tpu.assume_multiple %75, 1024 : i32
      %c0_29 = arith.constant 0 : index
      %77 = arith.index_cast %76 : i32 to index
      %78 = vector.load %arg4[%c0_29, %77] : memref<8x1024xf32, #tpu.memory_space<vmem>>, vector<8x1024xf32>
      %79 = arith.mulf %78, %72 : vector<8x1024xf32>
      %80 = arith.addf %79, %74 : vector<8x1024xf32>
      %cst_30 = arith.constant 0.000000e+00 : f32
      %81 = vector.broadcast %cst_30 : f32 to vector<8x1024xf32>
      %82 = arith.cmpf ogt, %80, %81 : vector<8x1024xf32>
      %cst_31 = arith.constant 0.000000e+00 : f32
      %83 = vector.broadcast %cst_31 : f32 to vector<8x1024xf32>
      %84 = arith.minimumf %80, %83 : vector<8x1024xf32>
      %85 = math.exp %84 : vector<8x1024xf32>
      %cst_32 = arith.constant 1.000000e+00 : f32
      %86 = vector.broadcast %cst_32 : f32 to vector<8x1024xf32>
      %87 = arith.subf %85, %86 : vector<8x1024xf32>
      %88 = arith.select %82, %80, %87 : vector<8x1024xi1>, vector<8x1024xf32>
      %c0_33 = arith.constant 0 : index
      %89 = arith.index_cast %76 : i32 to index
      %90 = vector.load %arg4[%c0_33, %89] : memref<8x1024xf32, #tpu.memory_space<vmem>>, vector<8x1024xf32>
      tpu.vector_store %arg4[%c0_33, %89], %88 {strides = array<i32>} : memref<8x1024xf32, #tpu.memory_space<vmem>>, vector<8x1024xf32>,
      %c1_i32 = arith.constant 1 : i32
    } else {
    }
    return
  }
  func.func @transform_0(%arg0: i32) -> (i32, i32) {
    %c0_i32 = arith.constant 0 : i32
    %c0_i32_0 = arith.constant 0 : i32
    return %c0_i32, %arg0 : i32, i32
  }
  func.func @transform_1(%arg0: i32) -> (i32, i32, i32) {
    %c0_i32 = arith.constant 0 : i32
    %c0_i32_0 = arith.constant 0 : i32
    %c0_i32_1 = arith.constant 0 : i32
    %c0_i32_2 = arith.constant 0 : i32
    return %c0_i32, %c0_i32_0, %c0_i32_1 : i32, i32, i32
  }
  func.func @transform_2(%arg0: i32) -> (i32, i32) {
    %c0_i32 = arith.constant 0 : i32
    %c0_i32_0 = arith.constant 0 : i32
    %c0_i32_1 = arith.constant 0 : i32
    return %c0_i32, %c0_i32_0 : i32, i32
  }
  func.func @transform_3(%arg0: i32) -> (i32, i32) {
    %c0_i32 = arith.constant 0 : i32
    %c0_i32_0 = arith.constant 0 : i32
    %c0_i32_1 = arith.constant 0 : i32
    return %c0_i32, %c0_i32_0 : i32, i32
  }
}

module attributes {stable_mosaic.version = 11 : i64} {
  func.func @kernel(%arg0: i32, %arg1: memref<200x1024xbf16, #tpu.memory_space<vmem>>, %arg2: memref<5x8x200xbf16, #tpu.memory_space<vmem>>, %arg3: memref<8x2xf32, #tpu.memory_space<vmem>>, %arg4: memref<8x1024xf32, #tpu.memory_space<vmem>>, %arg5: memref<8x256xf32, #tpu.memory_space<vmem>>) attributes {dimension_semantics = [#tpu.dimension_semantics<arbitrary>], iteration_bounds = array<i64: 1>, scalar_prefetch = 0 : i64, scratch_operands = 1 : i64, tpu.core_type = #tpu.core_type<tc>, window_params = [{transform_indices = @transform_0, window_bounds = array<i64: 200, 1024>}, {pipeline_mode = #tpu.pipeline_mode<synchronous>, transform_indices = @transform_1, window_bounds = array<i64: 5, 8, 200>}, {pipeline_mode = #tpu.pipeline_mode<synchronous>, transform_indices = @transform_2, window_bounds = array<i64: 8, 2>}, {pipeline_mode = #tpu.pipeline_mode<synchronous>, transform_indices = @transform_3, window_bounds = array<i64: 8, 1024>}]} {
    %c0_i32 = arith.constant 0 : i32
    %0 = arith.cmpi eq, %arg0, %c0_i32 : i32
    %1 = arith.extui %0 : i1 to i32
    %c0_i32_0 = arith.constant 0 : i32
    %2 = arith.cmpi ne, %1, %c0_i32_0 : i32
    scf.if %2 {
      %cst_53 = arith.constant 0.000000e+00 : f32
      %142 = vector.broadcast %cst_53 : f32 to vector<8x256xf32>
      %c0_54 = arith.constant 0 : index
      %c0_55 = arith.constant 0 : index
      %143 = vector.load %arg5[%c0_54, %c0_55] : memref<8x256xf32, #tpu.memory_space<vmem>>, vector<8x256xf32>
      tpu.vector_store %arg5[%c0_54, %c0_55], %142 {strides = array<i32>} : memref<8x256xf32, #tpu.memory_space<vmem>>, vector<8x256xf32>,
    } else {
    }
    %c0 = arith.constant 0 : index
    %c0_1 = arith.constant 0 : index
    %3 = vector.load %arg1[%c0, %c0_1] : memref<200x1024xbf16, #tpu.memory_space<vmem>>, vector<200x1024xbf16>
    %4 = tpu.iota {dimensions = array<i32: 1>} : vector<8x1024xi32>
    %c8_i32 = arith.constant 8 : i32
    %c0_i32_2 = arith.constant 0 : i32
    %5 = arith.cmpi eq, %c8_i32, %c0_i32_2 : i32
    %c1_i32 = arith.constant 1 : i32
    %6 = arith.select %5, %c1_i32, %c8_i32 : i32
    %7 = vector.broadcast %6 : i32 to vector<8x1024xi32>
    %8 = arith.remsi %4, %7 : vector<8x1024xi32>
    %c0_i32_3 = arith.constant 0 : i32
    %9 = vector.broadcast %c0_i32_3 : i32 to vector<8x1024xi32>
    %10 = arith.cmpi ne, %8, %9 : vector<8x1024xi32>
    %c0_i32_4 = arith.constant 0 : i32
    %11 = vector.broadcast %c0_i32_4 : i32 to vector<8x1024xi32>
    %12 = arith.cmpi slt, %8, %11 : vector<8x1024xi32>
    %c0_i32_5 = arith.constant 0 : i32
    %13 = arith.cmpi slt, %6, %c0_i32_5 : i32
    %14 = vector.broadcast %13 : i1 to vector<8x1024xi1>
    %15 = vector.broadcast %14 : vector<8x1024xi1> to vector<8x1024xi1>
    %16 = arith.xori %12, %15 : vector<8x1024xi1>
    %17 = arith.andi %16, %10 : vector<8x1024xi1>
    %18 = vector.broadcast %6 : i32 to vector<8x1024xi32>
    %19 = arith.addi %8, %18 : vector<8x1024xi32>
    %20 = arith.select %17, %19, %8 : vector<8x1024xi1>, vector<8x1024xi32>
    %cst = arith.constant 0.000000e+00 : f32
    %21 = vector.broadcast %cst : f32 to vector<8x1024xf32>
    %c0_6 = arith.constant 0 : index
    %c0_7 = arith.constant 0 : index
    %c0_8 = arith.constant 0 : index
    %22 = vector.load %arg2[%c0_6, %c0_7, %c0_8] : memref<5x8x200xbf16, #tpu.memory_space<vmem>>, vector<1x8x200xbf16>
    %23 = vector.shape_cast %22 : vector<1x8x200xbf16> to vector<8x200xbf16>
    %cst_9 = arith.constant dense<0.000000e+00> : vector<8x1024xf32>
    %24 = tpu.matmul %23, %3, %cst_9 {dimension_numbers = #tpu.dot_dimension_numbers<[1], [0], [0], [1], [0, 0, 1, 1], [], []>} : vector<8x200xbf16>, vector<200x1024xbf16>, vector<8x1024xf32> -> vector<8x1024xf32>
    %cst_10 = arith.constant 0.000000e+00 : f32
    %25 = vector.broadcast %cst_10 : f32 to vector<8x2xf32>
    %26 = vector.extract_strided_slice %24 {offsets = [0, 0], sizes = [8, 1022], strides = [1, 1]} : vector<8x1024xf32> to vector<8x1022xf32>
    %27 = tpu.concatenate %25, %26 in 1 : vector<8x2xf32>, vector<8x1022xf32> -> vector<8x1024xf32>
    %c-2_i32 = arith.constant -2 : i32
    %28 = vector.broadcast %c-2_i32 : i32 to vector<8x1024xi32>
    %29 = arith.addi %20, %28 : vector<8x1024xi32>
    %c0_i32_11 = arith.constant 0 : i32
    %30 = vector.broadcast %c0_i32_11 : i32 to vector<8x1024xi32>
    %31 = arith.cmpi sge, %29, %30 : vector<8x1024xi32>
    %c-2_i32_12 = arith.constant -2 : i32
    %32 = vector.broadcast %c-2_i32_12 : i32 to vector<8x1024xi32>
    %33 = arith.addi %20, %32 : vector<8x1024xi32>
    %c8_i32_13 = arith.constant 8 : i32
    %34 = vector.broadcast %c8_i32_13 : i32 to vector<8x1024xi32>
    %35 = arith.cmpi slt, %33, %34 : vector<8x1024xi32>
    %36 = arith.andi %31, %35 : vector<8x1024xi1>
    %cst_14 = arith.constant 0.000000e+00 : f32
    %37 = vector.broadcast %cst_14 : f32 to vector<8x1024xf32>
    %38 = arith.select %36, %27, %37 : vector<8x1024xi1>, vector<8x1024xf32>
    %39 = arith.addf %21, %38 : vector<8x1024xf32>
    %c1 = arith.constant 1 : index
    %c0_15 = arith.constant 0 : index
    %c0_16 = arith.constant 0 : index
    %40 = vector.load %arg2[%c1, %c0_15, %c0_16] : memref<5x8x200xbf16, #tpu.memory_space<vmem>>, vector<1x8x200xbf16>
    %41 = vector.shape_cast %40 : vector<1x8x200xbf16> to vector<8x200xbf16>
    %cst_17 = arith.constant dense<0.000000e+00> : vector<8x1024xf32>
    %42 = tpu.matmul %41, %3, %cst_17 {dimension_numbers = #tpu.dot_dimension_numbers<[1], [0], [0], [1], [0, 0, 1, 1], [], []>} : vector<8x200xbf16>, vector<200x1024xbf16>, vector<8x1024xf32> -> vector<8x1024xf32>
    %cst_18 = arith.constant 0.000000e+00 : f32
    %43 = vector.broadcast %cst_18 : f32 to vector<8x1xf32>
    %44 = vector.extract_strided_slice %42 {offsets = [0, 0], sizes = [8, 1023], strides = [1, 1]} : vector<8x1024xf32> to vector<8x1023xf32>
    %45 = tpu.concatenate %43, %44 in 1 : vector<8x1xf32>, vector<8x1023xf32> -> vector<8x1024xf32>
    %c-1_i32 = arith.constant -1 : i32
    %46 = vector.broadcast %c-1_i32 : i32 to vector<8x1024xi32>
    %47 = arith.addi %20, %46 : vector<8x1024xi32>
    %c0_i32_19 = arith.constant 0 : i32
    %48 = vector.broadcast %c0_i32_19 : i32 to vector<8x1024xi32>
    %49 = arith.cmpi sge, %47, %48 : vector<8x1024xi32>
    %c-1_i32_20 = arith.constant -1 : i32
    %50 = vector.broadcast %c-1_i32_20 : i32 to vector<8x1024xi32>
    %51 = arith.addi %20, %50 : vector<8x1024xi32>
    %c8_i32_21 = arith.constant 8 : i32
    %52 = vector.broadcast %c8_i32_21 : i32 to vector<8x1024xi32>
    %53 = arith.cmpi slt, %51, %52 : vector<8x1024xi32>
    %54 = arith.andi %49, %53 : vector<8x1024xi1>
    %cst_22 = arith.constant 0.000000e+00 : f32
    %55 = vector.broadcast %cst_22 : f32 to vector<8x1024xf32>
    %56 = arith.select %54, %45, %55 : vector<8x1024xi1>, vector<8x1024xf32>
    %57 = arith.addf %39, %56 : vector<8x1024xf32>
    %c2 = arith.constant 2 : index
    %c0_23 = arith.constant 0 : index
    %c0_24 = arith.constant 0 : index
    %58 = vector.load %arg2[%c2, %c0_23, %c0_24] : memref<5x8x200xbf16, #tpu.memory_space<vmem>>, vector<1x8x200xbf16>
    %59 = vector.shape_cast %58 : vector<1x8x200xbf16> to vector<8x200xbf16>
    %cst_25 = arith.constant dense<0.000000e+00> : vector<8x1024xf32>
    %60 = tpu.matmul %59, %3, %cst_25 {dimension_numbers = #tpu.dot_dimension_numbers<[1], [0], [0], [1], [0, 0, 1, 1], [], []>} : vector<8x200xbf16>, vector<200x1024xbf16>, vector<8x1024xf32> -> vector<8x1024xf32>
    %61 = arith.addf %57, %60 : vector<8x1024xf32>
    %c3 = arith.constant 3 : index
    %c0_26 = arith.constant 0 : index
    %c0_27 = arith.constant 0 : index
    %62 = vector.load %arg2[%c3, %c0_26, %c0_27] : memref<5x8x200xbf16, #tpu.memory_space<vmem>>, vector<1x8x200xbf16>
    %63 = vector.shape_cast %62 : vector<1x8x200xbf16> to vector<8x200xbf16>
    %cst_28 = arith.constant dense<0.000000e+00> : vector<8x1024xf32>
    %64 = tpu.matmul %63, %3, %cst_28 {dimension_numbers = #tpu.dot_dimension_numbers<[1], [0], [0], [1], [0, 0, 1, 1], [], []>} : vector<8x200xbf16>, vector<200x1024xbf16>, vector<8x1024xf32> -> vector<8x1024xf32>
    %cst_29 = arith.constant 0.000000e+00 : f32
    %65 = vector.broadcast %cst_29 : f32 to vector<8x1xf32>
    %66 = vector.extract_strided_slice %64 {offsets = [0, 1], sizes = [8, 1023], strides = [1, 1]} : vector<8x1024xf32> to vector<8x1023xf32>
    %67 = tpu.concatenate %66, %65 in 1 : vector<8x1023xf32>, vector<8x1xf32> -> vector<8x1024xf32>
    %c1_i32_30 = arith.constant 1 : i32
    %68 = vector.broadcast %c1_i32_30 : i32 to vector<8x1024xi32>
    %69 = arith.addi %20, %68 : vector<8x1024xi32>
    %c0_i32_31 = arith.constant 0 : i32
    %70 = vector.broadcast %c0_i32_31 : i32 to vector<8x1024xi32>
    %71 = arith.cmpi sge, %69, %70 : vector<8x1024xi32>
    %c1_i32_32 = arith.constant 1 : i32
    %72 = vector.broadcast %c1_i32_32 : i32 to vector<8x1024xi32>
    %73 = arith.addi %20, %72 : vector<8x1024xi32>
    %c8_i32_33 = arith.constant 8 : i32
    %74 = vector.broadcast %c8_i32_33 : i32 to vector<8x1024xi32>
    %75 = arith.cmpi slt, %73, %74 : vector<8x1024xi32>
    %76 = arith.andi %71, %75 : vector<8x1024xi1>
    %cst_34 = arith.constant 0.000000e+00 : f32
    %77 = vector.broadcast %cst_34 : f32 to vector<8x1024xf32>
    %78 = arith.select %76, %67, %77 : vector<8x1024xi1>, vector<8x1024xf32>
    %79 = arith.addf %61, %78 : vector<8x1024xf32>
    %c4 = arith.constant 4 : index
    %c0_35 = arith.constant 0 : index
    %c0_36 = arith.constant 0 : index
    %80 = vector.load %arg2[%c4, %c0_35, %c0_36] : memref<5x8x200xbf16, #tpu.memory_space<vmem>>, vector<1x8x200xbf16>
    %81 = vector.shape_cast %80 : vector<1x8x200xbf16> to vector<8x200xbf16>
    %cst_37 = arith.constant dense<0.000000e+00> : vector<8x1024xf32>
    %82 = tpu.matmul %81, %3, %cst_37 {dimension_numbers = #tpu.dot_dimension_numbers<[1], [0], [0], [1], [0, 0, 1, 1], [], []>} : vector<8x200xbf16>, vector<200x1024xbf16>, vector<8x1024xf32> -> vector<8x1024xf32>
    %cst_38 = arith.constant 0.000000e+00 : f32
    %83 = vector.broadcast %cst_38 : f32 to vector<8x2xf32>
    %84 = vector.extract_strided_slice %82 {offsets = [0, 2], sizes = [8, 1022], strides = [1, 1]} : vector<8x1024xf32> to vector<8x1022xf32>
    %85 = tpu.concatenate %84, %83 in 1 : vector<8x1022xf32>, vector<8x2xf32> -> vector<8x1024xf32>
    %c2_i32 = arith.constant 2 : i32
    %86 = vector.broadcast %c2_i32 : i32 to vector<8x1024xi32>
    %87 = arith.addi %20, %86 : vector<8x1024xi32>
    %c0_i32_39 = arith.constant 0 : i32
    %88 = vector.broadcast %c0_i32_39 : i32 to vector<8x1024xi32>
    %89 = arith.cmpi sge, %87, %88 : vector<8x1024xi32>
    %c2_i32_40 = arith.constant 2 : i32
    %90 = vector.broadcast %c2_i32_40 : i32 to vector<8x1024xi32>
    %91 = arith.addi %20, %90 : vector<8x1024xi32>
    %c8_i32_41 = arith.constant 8 : i32
    %92 = vector.broadcast %c8_i32_41 : i32 to vector<8x1024xi32>
    %93 = arith.cmpi slt, %91, %92 : vector<8x1024xi32>
    %94 = arith.andi %89, %93 : vector<8x1024xi1>
    %cst_42 = arith.constant 0.000000e+00 : f32
    %95 = vector.broadcast %cst_42 : f32 to vector<8x1024xf32>
    %96 = arith.select %94, %85, %95 : vector<8x1024xi1>, vector<8x1024xf32>
    %97 = arith.addf %79, %96 : vector<8x1024xf32>
    %c1024_i32 = arith.constant 1024 : i32
    %98 = arith.muli %arg0, %c1024_i32 : i32
    %99 = tpu.assume_multiple %98, 1024 : i32
    %c0_43 = arith.constant 0 : index
    %100 = arith.index_cast %99 : i32 to index
    %101 = vector.load %arg4[%c0_43, %100] : memref<8x1024xf32, #tpu.memory_space<vmem>>, vector<8x1024xf32>
    tpu.vector_store %arg4[%c0_43, %100], %97 {strides = array<i32>} : memref<8x1024xf32, #tpu.memory_space<vmem>>, vector<8x1024xf32>,
    %102 = arith.mulf %97, %97 : vector<8x1024xf32>
    %103 = vector.extract_strided_slice %97 {offsets = [0, 0], sizes = [8, 128], strides = [1, 1]} : vector<8x1024xf32> to vector<8x128xf32>
    %104 = vector.extract_strided_slice %102 {offsets = [0, 0], sizes = [8, 128], strides = [1, 1]} : vector<8x1024xf32> to vector<8x128xf32>
    %105 = vector.extract_strided_slice %97 {offsets = [0, 128], sizes = [8, 128], strides = [1, 1]} : vector<8x1024xf32> to vector<8x128xf32>
    %106 = arith.addf %103, %105 : vector<8x128xf32>
    %107 = vector.extract_strided_slice %102 {offsets = [0, 128], sizes = [8, 128], strides = [1, 1]} : vector<8x1024xf32> to vector<8x128xf32>
    %108 = arith.addf %104, %107 : vector<8x128xf32>
    %109 = vector.extract_strided_slice %97 {offsets = [0, 256], sizes = [8, 128], strides = [1, 1]} : vector<8x1024xf32> to vector<8x128xf32>
    %110 = arith.addf %106, %109 : vector<8x128xf32>
    %111 = vector.extract_strided_slice %102 {offsets = [0, 256], sizes = [8, 128], strides = [1, 1]} : vector<8x1024xf32> to vector<8x128xf32>
    %112 = arith.addf %108, %111 : vector<8x128xf32>
    %113 = vector.extract_strided_slice %97 {offsets = [0, 384], sizes = [8, 128], strides = [1, 1]} : vector<8x1024xf32> to vector<8x128xf32>
    %114 = arith.addf %110, %113 : vector<8x128xf32>
    %115 = vector.extract_strided_slice %102 {offsets = [0, 384], sizes = [8, 128], strides = [1, 1]} : vector<8x1024xf32> to vector<8x128xf32>
    %116 = arith.addf %112, %115 : vector<8x128xf32>
    %117 = vector.extract_strided_slice %97 {offsets = [0, 512], sizes = [8, 128], strides = [1, 1]} : vector<8x1024xf32> to vector<8x128xf32>
    %118 = arith.addf %114, %117 : vector<8x128xf32>
    %119 = vector.extract_strided_slice %102 {offsets = [0, 512], sizes = [8, 128], strides = [1, 1]} : vector<8x1024xf32> to vector<8x128xf32>
    %120 = arith.addf %116, %119 : vector<8x128xf32>
    %121 = vector.extract_strided_slice %97 {offsets = [0, 640], sizes = [8, 128], strides = [1, 1]} : vector<8x1024xf32> to vector<8x128xf32>
    %122 = arith.addf %118, %121 : vector<8x128xf32>
    %123 = vector.extract_strided_slice %102 {offsets = [0, 640], sizes = [8, 128], strides = [1, 1]} : vector<8x1024xf32> to vector<8x128xf32>
    %124 = arith.addf %120, %123 : vector<8x128xf32>
    %125 = vector.extract_strided_slice %97 {offsets = [0, 768], sizes = [8, 128], strides = [1, 1]} : vector<8x1024xf32> to vector<8x128xf32>
    %126 = arith.addf %122, %125 : vector<8x128xf32>
    %127 = vector.extract_strided_slice %102 {offsets = [0, 768], sizes = [8, 128], strides = [1, 1]} : vector<8x1024xf32> to vector<8x128xf32>
    %128 = arith.addf %124, %127 : vector<8x128xf32>
    %129 = vector.extract_strided_slice %97 {offsets = [0, 896], sizes = [8, 128], strides = [1, 1]} : vector<8x1024xf32> to vector<8x128xf32>
    %130 = arith.addf %126, %129 : vector<8x128xf32>
    %131 = vector.extract_strided_slice %102 {offsets = [0, 896], sizes = [8, 128], strides = [1, 1]} : vector<8x1024xf32> to vector<8x128xf32>
    %132 = arith.addf %128, %131 : vector<8x128xf32>
    %c0_44 = arith.constant 0 : index
    %c0_45 = arith.constant 0 : index
    %133 = vector.load %arg5[%c0_44, %c0_45] : memref<8x256xf32, #tpu.memory_space<vmem>>, vector<8x128xf32>
    %134 = arith.addf %133, %130 : vector<8x128xf32>
    %c0_46 = arith.constant 0 : index
    %c0_47 = arith.constant 0 : index
    %135 = vector.load %arg5[%c0_46, %c0_47] : memref<8x256xf32, #tpu.memory_space<vmem>>, vector<8x128xf32>
    tpu.vector_store %arg5[%c0_46, %c0_47], %134 {strides = array<i32>} : memref<8x256xf32, #tpu.memory_space<vmem>>, vector<8x128xf32>,
    %c0_48 = arith.constant 0 : index
    %c128 = arith.constant 128 : index
    %136 = vector.load %arg5[%c0_48, %c128] : memref<8x256xf32, #tpu.memory_space<vmem>>, vector<8x128xf32>
    %137 = arith.addf %136, %132 : vector<8x128xf32>
    %c0_49 = arith.constant 0 : index
    %c128_50 = arith.constant 128 : index
    %138 = vector.load %arg5[%c0_49, %c128_50] : memref<8x256xf32, #tpu.memory_space<vmem>>, vector<8x128xf32>
    tpu.vector_store %arg5[%c0_49, %c128_50], %137 {strides = array<i32>} : memref<8x256xf32, #tpu.memory_space<vmem>>, vector<8x128xf32>,
    %c0_i32_51 = arith.constant 0 : i32
    %139 = arith.cmpi eq, %arg0, %c0_i32_51 : i32
    %140 = arith.extui %139 : i1 to i32
    %c0_i32_52 = arith.constant 0 : i32
    %141 = arith.cmpi ne, %140, %c0_i32_52 : i32
    scf.if %141 {
      %c0_53 = arith.constant 0 : index
      %c0_54 = arith.constant 0 : index
      %142 = vector.load %arg5[%c0_53, %c0_54] : memref<8x256xf32, #tpu.memory_space<vmem>>, vector<8x128xf32>
      %cst_55 = arith.constant dense<0.000000e+00> : vector<8xf32>
      %143 = vector.multi_reduction <add>, %142, %cst_55 [1] : vector<8x128xf32> to vector<8xf32>
      %144 = vector.shape_cast %143 : vector<8xf32> to vector<8x1xf32>
      %c0_56 = arith.constant 0 : index
      %c128_57 = arith.constant 128 : index
      %145 = vector.load %arg5[%c0_56, %c128_57] : memref<8x256xf32, #tpu.memory_space<vmem>>, vector<8x128xf32>
      %cst_58 = arith.constant dense<0.000000e+00> : vector<8xf32>
      %146 = vector.multi_reduction <add>, %145, %cst_58 [1] : vector<8x128xf32> to vector<8xf32>
      %147 = vector.shape_cast %146 : vector<8xf32> to vector<8x1xf32>
      %cst_59 = arith.constant 9.765625E-4 : f32
      %148 = vector.broadcast %cst_59 : f32 to vector<8x1xf32>
      %149 = arith.mulf %144, %148 : vector<8x1xf32>
      %cst_60 = arith.constant 9.765625E-4 : f32
      %150 = vector.broadcast %cst_60 : f32 to vector<8x1xf32>
      %151 = arith.mulf %147, %150 : vector<8x1xf32>
      %152 = arith.mulf %149, %149 : vector<8x1xf32>
      %153 = arith.subf %151, %152 : vector<8x1xf32>
      %c0_61 = arith.constant 0 : index
      %c0_62 = arith.constant 0 : index
      %154 = vector.load %arg3[%c0_61, %c0_62] : memref<8x2xf32, #tpu.memory_space<vmem>>, vector<8x1xf32>
      %cst_63 = arith.constant 9.99999974E-6 : f32
      %155 = vector.broadcast %cst_63 : f32 to vector<8x1xf32>
      %156 = arith.addf %153, %155 : vector<8x1xf32>
      %157 = math.rsqrt %156 : vector<8x1xf32>
      %158 = arith.mulf %154, %157 : vector<8x1xf32>
      %c0_64 = arith.constant 0 : index
      %c1_65 = arith.constant 1 : index
      %159 = vector.load %arg3[%c0_64, %c1_65] : memref<8x2xf32, #tpu.memory_space<vmem>>, vector<8x1xf32>
      %160 = arith.mulf %149, %158 : vector<8x1xf32>
      %161 = arith.subf %159, %160 : vector<8x1xf32>
      %162 = vector.shape_cast %158 : vector<8x1xf32> to vector<8x1xf32>
      %163 = vector.broadcast %162 : vector<8x1xf32> to vector<8x1024xf32>
      %164 = vector.shape_cast %161 : vector<8x1xf32> to vector<8x1xf32>
      %165 = vector.broadcast %164 : vector<8x1xf32> to vector<8x1024xf32>
      %c0_i32_66 = arith.constant 0 : i32
      %c1024_i32_67 = arith.constant 1024 : i32
      %166 = arith.muli %c0_i32_66, %c1024_i32_67 : i32
      %167 = tpu.assume_multiple %166, 1024 : i32
      %c0_68 = arith.constant 0 : index
      %168 = arith.index_cast %167 : i32 to index
      %169 = vector.load %arg4[%c0_68, %168] : memref<8x1024xf32, #tpu.memory_space<vmem>>, vector<8x1024xf32>
      %170 = arith.mulf %169, %163 : vector<8x1024xf32>
      %171 = arith.addf %170, %165 : vector<8x1024xf32>
      %cst_69 = arith.constant 0.000000e+00 : f32
      %172 = vector.broadcast %cst_69 : f32 to vector<8x1024xf32>
      %173 = arith.cmpf ogt, %171, %172 : vector<8x1024xf32>
      %cst_70 = arith.constant 0.000000e+00 : f32
      %174 = vector.broadcast %cst_70 : f32 to vector<8x1024xf32>
      %175 = arith.minimumf %171, %174 : vector<8x1024xf32>
      %176 = math.exp %175 : vector<8x1024xf32>
      %cst_71 = arith.constant 1.000000e+00 : f32
      %177 = vector.broadcast %cst_71 : f32 to vector<8x1024xf32>
      %178 = arith.subf %176, %177 : vector<8x1024xf32>
      %179 = arith.select %173, %171, %178 : vector<8x1024xi1>, vector<8x1024xf32>
      %c0_72 = arith.constant 0 : index
      %180 = arith.index_cast %167 : i32 to index
      %181 = vector.load %arg4[%c0_72, %180] : memref<8x1024xf32, #tpu.memory_space<vmem>>, vector<8x1024xf32>
      tpu.vector_store %arg4[%c0_72, %180], %179 {strides = array<i32>} : memref<8x1024xf32, #tpu.memory_space<vmem>>, vector<8x1024xf32>,
      %c1_i32_73 = arith.constant 1 : i32
    } else {
    }
    return
  }
  func.func @transform_0(%arg0: i32) -> (i32, i32) {
    %c0_i32 = arith.constant 0 : i32
    %c0_i32_0 = arith.constant 0 : i32
    return %c0_i32, %arg0 : i32, i32
  }
  func.func @transform_1(%arg0: i32) -> (i32, i32, i32) {
    %c0_i32 = arith.constant 0 : i32
    %c0_i32_0 = arith.constant 0 : i32
    %c0_i32_1 = arith.constant 0 : i32
    %c0_i32_2 = arith.constant 0 : i32
    return %c0_i32, %c0_i32_0, %c0_i32_1 : i32, i32, i32
  }
  func.func @transform_2(%arg0: i32) -> (i32, i32) {
    %c0_i32 = arith.constant 0 : i32
    %c0_i32_0 = arith.constant 0 : i32
    %c0_i32_1 = arith.constant 0 : i32
    return %c0_i32, %c0_i32_0 : i32, i32
  }
  func.func @transform_3(%arg0: i32) -> (i32, i32) {
    %c0_i32 = arith.constant 0 : i32
    %c0_i32_0 = arith.constant 0 : i32
    %c0_i32_1 = arith.constant 0 : i32
    return %c0_i32, %c0_i32_0 : i32, i32
  }
}

module attributes {stable_mosaic.version = 11 : i64} {
  func.func @kernel(%arg0: i32, %arg1: memref<200x1024xbf16, #tpu.memory_space<vmem>>, %arg2: memref<5x8x200xbf16, #tpu.memory_space<vmem>>, %arg3: memref<8x2xf32, #tpu.memory_space<vmem>>, %arg4: memref<8x1024xf32, #tpu.memory_space<vmem>>, %arg5: memref<8x1024xf32, #tpu.memory_space<vmem>>, %arg6: memref<8x256xf32, #tpu.memory_space<vmem>>) attributes {dimension_semantics = [#tpu.dimension_semantics<arbitrary>], iteration_bounds = array<i64: 1>, scalar_prefetch = 0 : i64, scratch_operands = 1 : i64, tpu.core_type = #tpu.core_type<tc>, window_params = [{transform_indices = @transform_0, window_bounds = array<i64: 200, 1024>}, {pipeline_mode = #tpu.pipeline_mode<synchronous>, transform_indices = @transform_1, window_bounds = array<i64: 5, 8, 200>}, {pipeline_mode = #tpu.pipeline_mode<synchronous>, transform_indices = @transform_2, window_bounds = array<i64: 8, 2>}, {pipeline_mode = #tpu.pipeline_mode<synchronous>, transform_indices = @transform_3, window_bounds = array<i64: 8, 1024>}, {pipeline_mode = #tpu.pipeline_mode<synchronous>, transform_indices = @transform_4, window_bounds = array<i64: 8, 1024>}]} {
    %c0_i32 = arith.constant 0 : i32
    %0 = arith.cmpi eq, %arg0, %c0_i32 : i32
    %1 = arith.extui %0 : i1 to i32
    %c0_i32_0 = arith.constant 0 : i32
    %2 = arith.cmpi ne, %1, %c0_i32_0 : i32
    scf.if %2 {
      %cst_53 = arith.constant 0.000000e+00 : f32
      %142 = vector.broadcast %cst_53 : f32 to vector<8x256xf32>
      %c0_54 = arith.constant 0 : index
      %c0_55 = arith.constant 0 : index
      %143 = vector.load %arg6[%c0_54, %c0_55] : memref<8x256xf32, #tpu.memory_space<vmem>>, vector<8x256xf32>
      tpu.vector_store %arg6[%c0_54, %c0_55], %142 {strides = array<i32>} : memref<8x256xf32, #tpu.memory_space<vmem>>, vector<8x256xf32>,
    } else {
    }
    %c0 = arith.constant 0 : index
    %c0_1 = arith.constant 0 : index
    %3 = vector.load %arg1[%c0, %c0_1] : memref<200x1024xbf16, #tpu.memory_space<vmem>>, vector<200x1024xbf16>
    %4 = tpu.iota {dimensions = array<i32: 1>} : vector<8x1024xi32>
    %c8_i32 = arith.constant 8 : i32
    %c0_i32_2 = arith.constant 0 : i32
    %5 = arith.cmpi eq, %c8_i32, %c0_i32_2 : i32
    %c1_i32 = arith.constant 1 : i32
    %6 = arith.select %5, %c1_i32, %c8_i32 : i32
    %7 = vector.broadcast %6 : i32 to vector<8x1024xi32>
    %8 = arith.remsi %4, %7 : vector<8x1024xi32>
    %c0_i32_3 = arith.constant 0 : i32
    %9 = vector.broadcast %c0_i32_3 : i32 to vector<8x1024xi32>
    %10 = arith.cmpi ne, %8, %9 : vector<8x1024xi32>
    %c0_i32_4 = arith.constant 0 : i32
    %11 = vector.broadcast %c0_i32_4 : i32 to vector<8x1024xi32>
    %12 = arith.cmpi slt, %8, %11 : vector<8x1024xi32>
    %c0_i32_5 = arith.constant 0 : i32
    %13 = arith.cmpi slt, %6, %c0_i32_5 : i32
    %14 = vector.broadcast %13 : i1 to vector<8x1024xi1>
    %15 = vector.broadcast %14 : vector<8x1024xi1> to vector<8x1024xi1>
    %16 = arith.xori %12, %15 : vector<8x1024xi1>
    %17 = arith.andi %16, %10 : vector<8x1024xi1>
    %18 = vector.broadcast %6 : i32 to vector<8x1024xi32>
    %19 = arith.addi %8, %18 : vector<8x1024xi32>
    %20 = arith.select %17, %19, %8 : vector<8x1024xi1>, vector<8x1024xi32>
    %cst = arith.constant 0.000000e+00 : f32
    %21 = vector.broadcast %cst : f32 to vector<8x1024xf32>
    %c0_6 = arith.constant 0 : index
    %c0_7 = arith.constant 0 : index
    %c0_8 = arith.constant 0 : index
    %22 = vector.load %arg2[%c0_6, %c0_7, %c0_8] : memref<5x8x200xbf16, #tpu.memory_space<vmem>>, vector<1x8x200xbf16>
    %23 = vector.shape_cast %22 : vector<1x8x200xbf16> to vector<8x200xbf16>
    %cst_9 = arith.constant dense<0.000000e+00> : vector<8x1024xf32>
    %24 = tpu.matmul %23, %3, %cst_9 {dimension_numbers = #tpu.dot_dimension_numbers<[1], [0], [0], [1], [0, 0, 1, 1], [], []>} : vector<8x200xbf16>, vector<200x1024xbf16>, vector<8x1024xf32> -> vector<8x1024xf32>
    %cst_10 = arith.constant 0.000000e+00 : f32
    %25 = vector.broadcast %cst_10 : f32 to vector<8x2xf32>
    %26 = vector.extract_strided_slice %24 {offsets = [0, 0], sizes = [8, 1022], strides = [1, 1]} : vector<8x1024xf32> to vector<8x1022xf32>
    %27 = tpu.concatenate %25, %26 in 1 : vector<8x2xf32>, vector<8x1022xf32> -> vector<8x1024xf32>
    %c-2_i32 = arith.constant -2 : i32
    %28 = vector.broadcast %c-2_i32 : i32 to vector<8x1024xi32>
    %29 = arith.addi %20, %28 : vector<8x1024xi32>
    %c0_i32_11 = arith.constant 0 : i32
    %30 = vector.broadcast %c0_i32_11 : i32 to vector<8x1024xi32>
    %31 = arith.cmpi sge, %29, %30 : vector<8x1024xi32>
    %c-2_i32_12 = arith.constant -2 : i32
    %32 = vector.broadcast %c-2_i32_12 : i32 to vector<8x1024xi32>
    %33 = arith.addi %20, %32 : vector<8x1024xi32>
    %c8_i32_13 = arith.constant 8 : i32
    %34 = vector.broadcast %c8_i32_13 : i32 to vector<8x1024xi32>
    %35 = arith.cmpi slt, %33, %34 : vector<8x1024xi32>
    %36 = arith.andi %31, %35 : vector<8x1024xi1>
    %cst_14 = arith.constant 0.000000e+00 : f32
    %37 = vector.broadcast %cst_14 : f32 to vector<8x1024xf32>
    %38 = arith.select %36, %27, %37 : vector<8x1024xi1>, vector<8x1024xf32>
    %39 = arith.addf %21, %38 : vector<8x1024xf32>
    %c1 = arith.constant 1 : index
    %c0_15 = arith.constant 0 : index
    %c0_16 = arith.constant 0 : index
    %40 = vector.load %arg2[%c1, %c0_15, %c0_16] : memref<5x8x200xbf16, #tpu.memory_space<vmem>>, vector<1x8x200xbf16>
    %41 = vector.shape_cast %40 : vector<1x8x200xbf16> to vector<8x200xbf16>
    %cst_17 = arith.constant dense<0.000000e+00> : vector<8x1024xf32>
    %42 = tpu.matmul %41, %3, %cst_17 {dimension_numbers = #tpu.dot_dimension_numbers<[1], [0], [0], [1], [0, 0, 1, 1], [], []>} : vector<8x200xbf16>, vector<200x1024xbf16>, vector<8x1024xf32> -> vector<8x1024xf32>
    %cst_18 = arith.constant 0.000000e+00 : f32
    %43 = vector.broadcast %cst_18 : f32 to vector<8x1xf32>
    %44 = vector.extract_strided_slice %42 {offsets = [0, 0], sizes = [8, 1023], strides = [1, 1]} : vector<8x1024xf32> to vector<8x1023xf32>
    %45 = tpu.concatenate %43, %44 in 1 : vector<8x1xf32>, vector<8x1023xf32> -> vector<8x1024xf32>
    %c-1_i32 = arith.constant -1 : i32
    %46 = vector.broadcast %c-1_i32 : i32 to vector<8x1024xi32>
    %47 = arith.addi %20, %46 : vector<8x1024xi32>
    %c0_i32_19 = arith.constant 0 : i32
    %48 = vector.broadcast %c0_i32_19 : i32 to vector<8x1024xi32>
    %49 = arith.cmpi sge, %47, %48 : vector<8x1024xi32>
    %c-1_i32_20 = arith.constant -1 : i32
    %50 = vector.broadcast %c-1_i32_20 : i32 to vector<8x1024xi32>
    %51 = arith.addi %20, %50 : vector<8x1024xi32>
    %c8_i32_21 = arith.constant 8 : i32
    %52 = vector.broadcast %c8_i32_21 : i32 to vector<8x1024xi32>
    %53 = arith.cmpi slt, %51, %52 : vector<8x1024xi32>
    %54 = arith.andi %49, %53 : vector<8x1024xi1>
    %cst_22 = arith.constant 0.000000e+00 : f32
    %55 = vector.broadcast %cst_22 : f32 to vector<8x1024xf32>
    %56 = arith.select %54, %45, %55 : vector<8x1024xi1>, vector<8x1024xf32>
    %57 = arith.addf %39, %56 : vector<8x1024xf32>
    %c2 = arith.constant 2 : index
    %c0_23 = arith.constant 0 : index
    %c0_24 = arith.constant 0 : index
    %58 = vector.load %arg2[%c2, %c0_23, %c0_24] : memref<5x8x200xbf16, #tpu.memory_space<vmem>>, vector<1x8x200xbf16>
    %59 = vector.shape_cast %58 : vector<1x8x200xbf16> to vector<8x200xbf16>
    %cst_25 = arith.constant dense<0.000000e+00> : vector<8x1024xf32>
    %60 = tpu.matmul %59, %3, %cst_25 {dimension_numbers = #tpu.dot_dimension_numbers<[1], [0], [0], [1], [0, 0, 1, 1], [], []>} : vector<8x200xbf16>, vector<200x1024xbf16>, vector<8x1024xf32> -> vector<8x1024xf32>
    %61 = arith.addf %57, %60 : vector<8x1024xf32>
    %c3 = arith.constant 3 : index
    %c0_26 = arith.constant 0 : index
    %c0_27 = arith.constant 0 : index
    %62 = vector.load %arg2[%c3, %c0_26, %c0_27] : memref<5x8x200xbf16, #tpu.memory_space<vmem>>, vector<1x8x200xbf16>
    %63 = vector.shape_cast %62 : vector<1x8x200xbf16> to vector<8x200xbf16>
    %cst_28 = arith.constant dense<0.000000e+00> : vector<8x1024xf32>
    %64 = tpu.matmul %63, %3, %cst_28 {dimension_numbers = #tpu.dot_dimension_numbers<[1], [0], [0], [1], [0, 0, 1, 1], [], []>} : vector<8x200xbf16>, vector<200x1024xbf16>, vector<8x1024xf32> -> vector<8x1024xf32>
    %cst_29 = arith.constant 0.000000e+00 : f32
    %65 = vector.broadcast %cst_29 : f32 to vector<8x1xf32>
    %66 = vector.extract_strided_slice %64 {offsets = [0, 1], sizes = [8, 1023], strides = [1, 1]} : vector<8x1024xf32> to vector<8x1023xf32>
    %67 = tpu.concatenate %66, %65 in 1 : vector<8x1023xf32>, vector<8x1xf32> -> vector<8x1024xf32>
    %c1_i32_30 = arith.constant 1 : i32
    %68 = vector.broadcast %c1_i32_30 : i32 to vector<8x1024xi32>
    %69 = arith.addi %20, %68 : vector<8x1024xi32>
    %c0_i32_31 = arith.constant 0 : i32
    %70 = vector.broadcast %c0_i32_31 : i32 to vector<8x1024xi32>
    %71 = arith.cmpi sge, %69, %70 : vector<8x1024xi32>
    %c1_i32_32 = arith.constant 1 : i32
    %72 = vector.broadcast %c1_i32_32 : i32 to vector<8x1024xi32>
    %73 = arith.addi %20, %72 : vector<8x1024xi32>
    %c8_i32_33 = arith.constant 8 : i32
    %74 = vector.broadcast %c8_i32_33 : i32 to vector<8x1024xi32>
    %75 = arith.cmpi slt, %73, %74 : vector<8x1024xi32>
    %76 = arith.andi %71, %75 : vector<8x1024xi1>
    %cst_34 = arith.constant 0.000000e+00 : f32
    %77 = vector.broadcast %cst_34 : f32 to vector<8x1024xf32>
    %78 = arith.select %76, %67, %77 : vector<8x1024xi1>, vector<8x1024xf32>
    %79 = arith.addf %61, %78 : vector<8x1024xf32>
    %c4 = arith.constant 4 : index
    %c0_35 = arith.constant 0 : index
    %c0_36 = arith.constant 0 : index
    %80 = vector.load %arg2[%c4, %c0_35, %c0_36] : memref<5x8x200xbf16, #tpu.memory_space<vmem>>, vector<1x8x200xbf16>
    %81 = vector.shape_cast %80 : vector<1x8x200xbf16> to vector<8x200xbf16>
    %cst_37 = arith.constant dense<0.000000e+00> : vector<8x1024xf32>
    %82 = tpu.matmul %81, %3, %cst_37 {dimension_numbers = #tpu.dot_dimension_numbers<[1], [0], [0], [1], [0, 0, 1, 1], [], []>} : vector<8x200xbf16>, vector<200x1024xbf16>, vector<8x1024xf32> -> vector<8x1024xf32>
    %cst_38 = arith.constant 0.000000e+00 : f32
    %83 = vector.broadcast %cst_38 : f32 to vector<8x2xf32>
    %84 = vector.extract_strided_slice %82 {offsets = [0, 2], sizes = [8, 1022], strides = [1, 1]} : vector<8x1024xf32> to vector<8x1022xf32>
    %85 = tpu.concatenate %84, %83 in 1 : vector<8x1022xf32>, vector<8x2xf32> -> vector<8x1024xf32>
    %c2_i32 = arith.constant 2 : i32
    %86 = vector.broadcast %c2_i32 : i32 to vector<8x1024xi32>
    %87 = arith.addi %20, %86 : vector<8x1024xi32>
    %c0_i32_39 = arith.constant 0 : i32
    %88 = vector.broadcast %c0_i32_39 : i32 to vector<8x1024xi32>
    %89 = arith.cmpi sge, %87, %88 : vector<8x1024xi32>
    %c2_i32_40 = arith.constant 2 : i32
    %90 = vector.broadcast %c2_i32_40 : i32 to vector<8x1024xi32>
    %91 = arith.addi %20, %90 : vector<8x1024xi32>
    %c8_i32_41 = arith.constant 8 : i32
    %92 = vector.broadcast %c8_i32_41 : i32 to vector<8x1024xi32>
    %93 = arith.cmpi slt, %91, %92 : vector<8x1024xi32>
    %94 = arith.andi %89, %93 : vector<8x1024xi1>
    %cst_42 = arith.constant 0.000000e+00 : f32
    %95 = vector.broadcast %cst_42 : f32 to vector<8x1024xf32>
    %96 = arith.select %94, %85, %95 : vector<8x1024xi1>, vector<8x1024xf32>
    %97 = arith.addf %79, %96 : vector<8x1024xf32>
    %c1024_i32 = arith.constant 1024 : i32
    %98 = arith.muli %arg0, %c1024_i32 : i32
    %99 = tpu.assume_multiple %98, 1024 : i32
    %c0_43 = arith.constant 0 : index
    %100 = arith.index_cast %99 : i32 to index
    %101 = vector.load %arg5[%c0_43, %100] : memref<8x1024xf32, #tpu.memory_space<vmem>>, vector<8x1024xf32>
    tpu.vector_store %arg5[%c0_43, %100], %97 {strides = array<i32>} : memref<8x1024xf32, #tpu.memory_space<vmem>>, vector<8x1024xf32>,
    %102 = arith.mulf %97, %97 : vector<8x1024xf32>
    %103 = vector.extract_strided_slice %97 {offsets = [0, 0], sizes = [8, 128], strides = [1, 1]} : vector<8x1024xf32> to vector<8x128xf32>
    %104 = vector.extract_strided_slice %102 {offsets = [0, 0], sizes = [8, 128], strides = [1, 1]} : vector<8x1024xf32> to vector<8x128xf32>
    %105 = vector.extract_strided_slice %97 {offsets = [0, 128], sizes = [8, 128], strides = [1, 1]} : vector<8x1024xf32> to vector<8x128xf32>
    %106 = arith.addf %103, %105 : vector<8x128xf32>
    %107 = vector.extract_strided_slice %102 {offsets = [0, 128], sizes = [8, 128], strides = [1, 1]} : vector<8x1024xf32> to vector<8x128xf32>
    %108 = arith.addf %104, %107 : vector<8x128xf32>
    %109 = vector.extract_strided_slice %97 {offsets = [0, 256], sizes = [8, 128], strides = [1, 1]} : vector<8x1024xf32> to vector<8x128xf32>
    %110 = arith.addf %106, %109 : vector<8x128xf32>
    %111 = vector.extract_strided_slice %102 {offsets = [0, 256], sizes = [8, 128], strides = [1, 1]} : vector<8x1024xf32> to vector<8x128xf32>
    %112 = arith.addf %108, %111 : vector<8x128xf32>
    %113 = vector.extract_strided_slice %97 {offsets = [0, 384], sizes = [8, 128], strides = [1, 1]} : vector<8x1024xf32> to vector<8x128xf32>
    %114 = arith.addf %110, %113 : vector<8x128xf32>
    %115 = vector.extract_strided_slice %102 {offsets = [0, 384], sizes = [8, 128], strides = [1, 1]} : vector<8x1024xf32> to vector<8x128xf32>
    %116 = arith.addf %112, %115 : vector<8x128xf32>
    %117 = vector.extract_strided_slice %97 {offsets = [0, 512], sizes = [8, 128], strides = [1, 1]} : vector<8x1024xf32> to vector<8x128xf32>
    %118 = arith.addf %114, %117 : vector<8x128xf32>
    %119 = vector.extract_strided_slice %102 {offsets = [0, 512], sizes = [8, 128], strides = [1, 1]} : vector<8x1024xf32> to vector<8x128xf32>
    %120 = arith.addf %116, %119 : vector<8x128xf32>
    %121 = vector.extract_strided_slice %97 {offsets = [0, 640], sizes = [8, 128], strides = [1, 1]} : vector<8x1024xf32> to vector<8x128xf32>
    %122 = arith.addf %118, %121 : vector<8x128xf32>
    %123 = vector.extract_strided_slice %102 {offsets = [0, 640], sizes = [8, 128], strides = [1, 1]} : vector<8x1024xf32> to vector<8x128xf32>
    %124 = arith.addf %120, %123 : vector<8x128xf32>
    %125 = vector.extract_strided_slice %97 {offsets = [0, 768], sizes = [8, 128], strides = [1, 1]} : vector<8x1024xf32> to vector<8x128xf32>
    %126 = arith.addf %122, %125 : vector<8x128xf32>
    %127 = vector.extract_strided_slice %102 {offsets = [0, 768], sizes = [8, 128], strides = [1, 1]} : vector<8x1024xf32> to vector<8x128xf32>
    %128 = arith.addf %124, %127 : vector<8x128xf32>
    %129 = vector.extract_strided_slice %97 {offsets = [0, 896], sizes = [8, 128], strides = [1, 1]} : vector<8x1024xf32> to vector<8x128xf32>
    %130 = arith.addf %126, %129 : vector<8x128xf32>
    %131 = vector.extract_strided_slice %102 {offsets = [0, 896], sizes = [8, 128], strides = [1, 1]} : vector<8x1024xf32> to vector<8x128xf32>
    %132 = arith.addf %128, %131 : vector<8x128xf32>
    %c0_44 = arith.constant 0 : index
    %c0_45 = arith.constant 0 : index
    %133 = vector.load %arg6[%c0_44, %c0_45] : memref<8x256xf32, #tpu.memory_space<vmem>>, vector<8x128xf32>
    %134 = arith.addf %133, %130 : vector<8x128xf32>
    %c0_46 = arith.constant 0 : index
    %c0_47 = arith.constant 0 : index
    %135 = vector.load %arg6[%c0_46, %c0_47] : memref<8x256xf32, #tpu.memory_space<vmem>>, vector<8x128xf32>
    tpu.vector_store %arg6[%c0_46, %c0_47], %134 {strides = array<i32>} : memref<8x256xf32, #tpu.memory_space<vmem>>, vector<8x128xf32>,
    %c0_48 = arith.constant 0 : index
    %c128 = arith.constant 128 : index
    %136 = vector.load %arg6[%c0_48, %c128] : memref<8x256xf32, #tpu.memory_space<vmem>>, vector<8x128xf32>
    %137 = arith.addf %136, %132 : vector<8x128xf32>
    %c0_49 = arith.constant 0 : index
    %c128_50 = arith.constant 128 : index
    %138 = vector.load %arg6[%c0_49, %c128_50] : memref<8x256xf32, #tpu.memory_space<vmem>>, vector<8x128xf32>
    tpu.vector_store %arg6[%c0_49, %c128_50], %137 {strides = array<i32>} : memref<8x256xf32, #tpu.memory_space<vmem>>, vector<8x128xf32>,
    %c0_i32_51 = arith.constant 0 : i32
    %139 = arith.cmpi eq, %arg0, %c0_i32_51 : i32
    %140 = arith.extui %139 : i1 to i32
    %c0_i32_52 = arith.constant 0 : i32
    %141 = arith.cmpi ne, %140, %c0_i32_52 : i32
    scf.if %141 {
      %c0_53 = arith.constant 0 : index
      %c0_54 = arith.constant 0 : index
      %142 = vector.load %arg6[%c0_53, %c0_54] : memref<8x256xf32, #tpu.memory_space<vmem>>, vector<8x128xf32>
      %cst_55 = arith.constant dense<0.000000e+00> : vector<8xf32>
      %143 = vector.multi_reduction <add>, %142, %cst_55 [1] : vector<8x128xf32> to vector<8xf32>
      %144 = vector.shape_cast %143 : vector<8xf32> to vector<8x1xf32>
      %c0_56 = arith.constant 0 : index
      %c128_57 = arith.constant 128 : index
      %145 = vector.load %arg6[%c0_56, %c128_57] : memref<8x256xf32, #tpu.memory_space<vmem>>, vector<8x128xf32>
      %cst_58 = arith.constant dense<0.000000e+00> : vector<8xf32>
      %146 = vector.multi_reduction <add>, %145, %cst_58 [1] : vector<8x128xf32> to vector<8xf32>
      %147 = vector.shape_cast %146 : vector<8xf32> to vector<8x1xf32>
      %cst_59 = arith.constant 9.765625E-4 : f32
      %148 = vector.broadcast %cst_59 : f32 to vector<8x1xf32>
      %149 = arith.mulf %144, %148 : vector<8x1xf32>
      %cst_60 = arith.constant 9.765625E-4 : f32
      %150 = vector.broadcast %cst_60 : f32 to vector<8x1xf32>
      %151 = arith.mulf %147, %150 : vector<8x1xf32>
      %152 = arith.mulf %149, %149 : vector<8x1xf32>
      %153 = arith.subf %151, %152 : vector<8x1xf32>
      %c0_61 = arith.constant 0 : index
      %c0_62 = arith.constant 0 : index
      %154 = vector.load %arg3[%c0_61, %c0_62] : memref<8x2xf32, #tpu.memory_space<vmem>>, vector<8x1xf32>
      %cst_63 = arith.constant 9.99999974E-6 : f32
      %155 = vector.broadcast %cst_63 : f32 to vector<8x1xf32>
      %156 = arith.addf %153, %155 : vector<8x1xf32>
      %157 = math.rsqrt %156 : vector<8x1xf32>
      %158 = arith.mulf %154, %157 : vector<8x1xf32>
      %c0_64 = arith.constant 0 : index
      %c1_65 = arith.constant 1 : index
      %159 = vector.load %arg3[%c0_64, %c1_65] : memref<8x2xf32, #tpu.memory_space<vmem>>, vector<8x1xf32>
      %160 = arith.mulf %149, %158 : vector<8x1xf32>
      %161 = arith.subf %159, %160 : vector<8x1xf32>
      %162 = vector.shape_cast %158 : vector<8x1xf32> to vector<8x1xf32>
      %163 = vector.broadcast %162 : vector<8x1xf32> to vector<8x1024xf32>
      %164 = vector.shape_cast %161 : vector<8x1xf32> to vector<8x1xf32>
      %165 = vector.broadcast %164 : vector<8x1xf32> to vector<8x1024xf32>
      %c0_i32_66 = arith.constant 0 : i32
      %c1024_i32_67 = arith.constant 1024 : i32
      %166 = arith.muli %c0_i32_66, %c1024_i32_67 : i32
      %167 = tpu.assume_multiple %166, 1024 : i32
      %c0_68 = arith.constant 0 : index
      %168 = arith.index_cast %167 : i32 to index
      %169 = vector.load %arg5[%c0_68, %168] : memref<8x1024xf32, #tpu.memory_space<vmem>>, vector<8x1024xf32>
      %170 = arith.mulf %169, %163 : vector<8x1024xf32>
      %171 = arith.addf %170, %165 : vector<8x1024xf32>
      %cst_69 = arith.constant 0.000000e+00 : f32
      %172 = vector.broadcast %cst_69 : f32 to vector<8x1024xf32>
      %173 = arith.cmpf ogt, %171, %172 : vector<8x1024xf32>
      %cst_70 = arith.constant 0.000000e+00 : f32
      %174 = vector.broadcast %cst_70 : f32 to vector<8x1024xf32>
      %175 = arith.minimumf %171, %174 : vector<8x1024xf32>
      %176 = math.exp %175 : vector<8x1024xf32>
      %cst_71 = arith.constant 1.000000e+00 : f32
      %177 = vector.broadcast %cst_71 : f32 to vector<8x1024xf32>
      %178 = arith.subf %176, %177 : vector<8x1024xf32>
      %179 = arith.select %173, %171, %178 : vector<8x1024xi1>, vector<8x1024xf32>
      %c0_72 = arith.constant 0 : index
      %180 = arith.index_cast %167 : i32 to index
      %181 = vector.load %arg4[%c0_72, %180] : memref<8x1024xf32, #tpu.memory_space<vmem>>, vector<8x1024xf32>
      %182 = arith.addf %179, %181 : vector<8x1024xf32>
      %cst_73 = arith.constant 0.000000e+00 : f32
      %183 = vector.broadcast %cst_73 : f32 to vector<8x1024xf32>
      %184 = arith.cmpf ogt, %182, %183 : vector<8x1024xf32>
      %cst_74 = arith.constant 0.000000e+00 : f32
      %185 = vector.broadcast %cst_74 : f32 to vector<8x1024xf32>
      %186 = arith.minimumf %182, %185 : vector<8x1024xf32>
      %187 = math.exp %186 : vector<8x1024xf32>
      %cst_75 = arith.constant 1.000000e+00 : f32
      %188 = vector.broadcast %cst_75 : f32 to vector<8x1024xf32>
      %189 = arith.subf %187, %188 : vector<8x1024xf32>
      %190 = arith.select %184, %182, %189 : vector<8x1024xi1>, vector<8x1024xf32>
      %c0_76 = arith.constant 0 : index
      %191 = arith.index_cast %167 : i32 to index
      %192 = vector.load %arg5[%c0_76, %191] : memref<8x1024xf32, #tpu.memory_space<vmem>>, vector<8x1024xf32>
      tpu.vector_store %arg5[%c0_76, %191], %190 {strides = array<i32>} : memref<8x1024xf32, #tpu.memory_space<vmem>>, vector<8x1024xf32>,
      %c1_i32_77 = arith.constant 1 : i32
    } else {
    }
    return
  }
  func.func @transform_0(%arg0: i32) -> (i32, i32) {
    %c0_i32 = arith.constant 0 : i32
    %c0_i32_0 = arith.constant 0 : i32
    return %c0_i32, %arg0 : i32, i32
  }
  func.func @transform_1(%arg0: i32) -> (i32, i32, i32) {
    %c0_i32 = arith.constant 0 : i32
    %c0_i32_0 = arith.constant 0 : i32
    %c0_i32_1 = arith.constant 0 : i32
    %c0_i32_2 = arith.constant 0 : i32
    return %c0_i32, %c0_i32_0, %c0_i32_1 : i32, i32, i32
  }
  func.func @transform_2(%arg0: i32) -> (i32, i32) {
    %c0_i32 = arith.constant 0 : i32
    %c0_i32_0 = arith.constant 0 : i32
    %c0_i32_1 = arith.constant 0 : i32
    return %c0_i32, %c0_i32_0 : i32, i32
  }
  func.func @transform_3(%arg0: i32) -> (i32, i32) {
    %c0_i32 = arith.constant 0 : i32
    %c0_i32_0 = arith.constant 0 : i32
    %c0_i32_1 = arith.constant 0 : i32
    return %c0_i32, %c0_i32_0 : i32, i32
  }
  func.func @transform_4(%arg0: i32) -> (i32, i32) {
    %c0_i32 = arith.constant 0 : i32
    %c0_i32_0 = arith.constant 0 : i32
    %c0_i32_1 = arith.constant 0 : i32
    return %c0_i32, %c0_i32_0 : i32, i32
  }
}

</mosaic_0001>

<bundles_post_ra>
// kernel: down_transition_pallas.3
= control target key start
LH: loop header
LB: loop body
LE: loop exit
PB: predicated region body
PF: predicated region fallthrough
CT: control target
= control target key end

     0   :  { %v569_v3 = vmov 0.0   ;;  %vm53_vm0 = vcmask 261120   ;;  %s572_s24 = smov 1   ;;  %s737_s0 = inlined_call_operand.vmem [shape: f32[32,1024], index: 0, kind: input, shape index: {}]   ;;  %s738_s1 = inlined_call_operand.vmem [shape: f32[1,8,32], index: 1, kind: input, shape index: {}]   ;;  %s739_s2 = inlined_call_operand.vmem [shape: f32[8,2], index: 2, kind: input, shape index: {}]   ;;  %s740_s3 = inlined_call_operand.vmem [shape: f32[8,1024], index: 3, kind: output, shape index: {}]  }
   0x1   :  { %v22_v0 = vld [vmem:[%s737_s0 + $0x8] sm:$0xff]  ;;  %v21_v2 = vld [vmem:[%s737_s0] sm:$0xff]  ;;  %121 = vmatprep.mubr.f32.mxu0 %v569_v3  ;;  %192 = vmatprep.mubr.f32.mxu1 %v569_v3  ;;  %v24_v6 = vld [vmem:[%s737_s0 + $0x18] sm:$0xff] }
   0x2   :  { %v30_v1 = vld [vmem:[%s737_s0 + $0x48] sm:$0xff]  ;;  %v29_v5 = vld [vmem:[%s737_s0 + $0x40] sm:$0xff]  ;;  %v32_v7 = vld [vmem:[%s737_s0 + $0x58] sm:$0xff] }
   0x3   :  { %v513_v4 = vpack.c.bf16 %v30_v1, %v22_v0  ;;  %v515_v8 = vpack.c.bf16 %v29_v5, %v21_v2  ;;  %v521_v9 = vpack.c.bf16 %v32_v7, %v24_v6  ;;  %v38_v10 = vld [vmem:[%s737_s0 + $0x88] sm:$0xff]  ;;  %v23_v12 = vld [vmem:[%s737_s0 + $0x10] sm:$0xff]  ;;  %v37_v15 = vld [vmem:[%s737_s0 + $0x80] sm:$0xff] }
   0x4   :  { %v46_v11 = vld [vmem:[%s737_s0 + $0xc8] sm:$0xff]  ;;  %v31_v14 = vld [vmem:[%s737_s0 + $0x50] sm:$0xff]  ;;  %v45_v16 = vld [vmem:[%s737_s0 + $0xc0] sm:$0xff] }
   0x5   :  { %514 = vmatprep.subr.bf16.mxu0 %v513_v4  ;;  %v517_v13 = vpack.c.bf16 %v46_v11, %v38_v10  ;;  %522 = vmatprep.subr.bf16.mxu1 %v521_v9  ;;  %v523_v17 = vpack.c.bf16 %v31_v14, %v23_v12  ;;  %v519_v18 = vpack.c.bf16 %v45_v16, %v37_v15  ;;  %v40_v19 = vld [vmem:[%s737_s0 + $0x98] sm:$0xff]  ;;  %v39_v22 = vld [vmem:[%s737_s0 + $0x90] sm:$0xff]  ;;  %v26_v24 = vld [vmem:[%s737_s0 + $0x28] sm:$0xff]  ;;  %v570_v16 = vmov 0  }
   0x6   :  { %516 = vmatpush1.bf16.msra.mxu0 %v515_v8  ;;  %v48_v20 = vld [vmem:[%s737_s0 + $0xd8] sm:$0xff]  ;;  %v47_v23 = vld [vmem:[%s737_s0 + $0xd0] sm:$0xff]  ;;  %v20_v25 = vld [vmem:[%s738_s1] sm:$0xff]  ;;  %549 = vset.pattern.permute.xlu1 %v570_v16 }
   0x7   :  { %518 = vmatprep.subr.bf16.mxu0 %v517_v13  ;;  %v525_v21 = vpack.c.bf16 %v48_v20, %v40_v19  ;;  %524 = vmatpush1.bf16.msra.mxu1 %v523_v17  ;;  %v527_v26 = vpack.c.bf16 %v47_v23, %v39_v22  ;;  %v34_v27 = vld [vmem:[%s737_s0 + $0x68] sm:$0xff]  ;;  %v25_v28 = vld [vmem:[%s737_s0 + $0x20] sm:$0xff]  ;;  %v28_v31 = vld [vmem:[%s737_s0 + $0x38] sm:$0xff] }
   0x8   :  { %v33_v29 = vld [vmem:[%s737_s0 + $0x60] sm:$0xff]  ;;  %v529_v30 = vpack.c.bf16 %v34_v27, %v26_v24  ;;  %v36_v32 = vld [vmem:[%s737_s0 + $0x78] sm:$0xff]  ;;  %v42_v33 = vld [vmem:[%s737_s0 + $0xa8] sm:$0xff]  ;;  %v571_v24 = vmov 1  }
   0x9   :  { %526 = vmatprep.subr.bf16.mxu1 %v525_v21  ;;  %v531_v34 = vpack.c.bf16 %v33_v29, %v25_v28  ;;  %v537_v35 = vpack.c.bf16 %v36_v32, %v28_v31  ;;  %v50_v36 = vld [vmem:[%s737_s0 + $0xe8] sm:$0xff]  ;;  %v27_v37 = vld [vmem:[%s737_s0 + $0x30] sm:$0xff]  ;;  %v41_v40 = vld [vmem:[%s737_s0 + $0xa0] sm:$0xff]  ;;  %550 = vset.pattern.permute.xlu0 %v571_v24 }
   0xa   :  { %520 = vmatpush1.bf16.msra.mxu0 %v519_v18  ;;  %v35_v38 = vld [vmem:[%s737_s0 + $0x70] sm:$0xff]  ;;  %v533_v39 = vpack.c.bf16 %v50_v36, %v42_v33  ;;  %v49_v41 = vld [vmem:[%s737_s0 + $0xe0] sm:$0xff]  ;;  %v44_v42 = vld [vmem:[%s737_s0 + $0xb8] sm:$0xff] }
   0xb   :  { %530 = vmatprep.subr.bf16.mxu0 %v529_v30  ;;  %528 = vmatpush1.bf16.msra.mxu1 %v527_v26  ;;  %v539_v43 = vpack.c.bf16 %v35_v38, %v27_v37  ;;  %v52_v44 = vld [vmem:[%s737_s0 + $0xf8] sm:$0xff]  ;;  %v43_v46 = vld [vmem:[%s737_s0 + $0xb0] sm:$0xff]  ;;  %v535_v48 = vpack.c.bf16 %v49_v41, %v41_v40 }
   0xc   :  { %538 = vmatprep.subr.bf16.mxu1 %v537_v35  ;;  %v541_v45 = vpack.c.bf16 %v52_v44, %v44_v42  ;;  %v51_v47 = vld [vmem:[%s737_s0 + $0xf0] sm:$0xff] }
   0xd   :  { %501 = vmatmul.mubr.msk.f32.vlgmr.msra.gmra.mrb[0].mxu0 %vm53_vm0, %v20_v25  ;;  %v543_v49 = vpack.c.bf16 %v51_v47, %v43_v46 }
   0xe   :  { %532 = vmatpush1.bf16.msra.mxu0 %v531_v34  ;;  %263 = vmatprep.mubr.f32.mxu0 %v569_v3 }
   0xf   :  { %502 = vmatmul.mubr.msk.f32.vlgmr.msra.gmra.mrb[0].mxu1 %vm53_vm0, %v20_v25  ;;  %534 = vmatprep.subr.bf16.mxu0 %v533_v39 }
  0x10   :  { %540 = vmatpush1.bf16.msra.mxu1 %v539_v43  ;;  %334 = vmatprep.mubr.f32.mxu1 %v569_v3 }
  0x11   :  { %542 = vmatprep.subr.bf16.mxu1 %v541_v45 }
  0x12   :  { %536 = vmatpush1.bf16.msra.mxu0 %v535_v48 }
  0x14   :  { %544 = vmatpush1.bf16.msra.mxu1 %v543_v49 }
  0x15   :  { %503 = vmatmul.mubr.msk.f32.vlgmr.msra.gmra.mrb[2].mxu0 %vm53_vm0, %v20_v25 }
  0x17   :  { %504 = vmatmul.mubr.msk.f32.vlgmr.msra.gmra.mrb[2].mxu1 %vm53_vm0, %v20_v25  ;;  %v395_v25 = vld [vmem:[%s739_s2] sm:$0xff] }
  0xe0   :  { %v123_v50 = vpop.f32.mrb[0].mxu0 }
  0xe1   :  { %v354_v51 = vmul.f32 %v123_v50, %v123_v50  ;;  %v125_v52 = vpop.f32.mrb[1].mxu0 }
  0xe2   :  { %v355_v53 = vmul.f32 %v125_v52, %v125_v52  ;;  %v362_v54 = vadd.f32 %v125_v52, %v123_v50  ;;  %v194_v55 = vpop.f32.mrb[0].mxu1 }
  0xe3   :  { %v356_v56 = vmul.f32 %v194_v55, %v194_v55  ;;  %v196_v57 = vpop.f32.mrb[1].mxu1 }
  0xe4   :  { %v363_v58 = vadd.f32 %v355_v53, %v354_v51  ;;  %v364_v59 = vadd.f32 %v362_v54, %v194_v55  ;;  %v357_v60 = vmul.f32 %v196_v57, %v196_v57 }
  0xe6   :  { %v365_v61 = vadd.f32 %v363_v58, %v356_v56  ;;  %v366_v62 = vadd.f32 %v364_v59, %v196_v57 }
  0xe8   :  { %v367_v63 = vadd.f32 %v365_v61, %v357_v60  ;;  %v265_v0 = vpop.f32.mrb[2].mxu0 }
  0xe9   :  { %v358_v1 = vmul.f32 %v265_v0, %v265_v0  ;;  %v368_v2 = vadd.f32 %v366_v62, %v265_v0  ;;  %v267_v3 = vpop.f32.mrb[3].mxu0 }
  0xea   :  { %v359_v4 = vmul.f32 %v267_v3, %v267_v3  ;;  %v336_v5 = vpop.f32.mrb[2].mxu1 }
  0xeb   :  { %v369_v6 = vadd.f32 %v367_v63, %v358_v1  ;;  %v370_v7 = vadd.f32 %v368_v2, %v267_v3  ;;  %v360_v8 = vmul.f32 %v336_v5, %v336_v5  ;;  %v338_v9 = vpop.f32.mrb[3].mxu1 }
  0xec   :  { %v361_v12 = vmul.f32 %v338_v9, %v338_v9 }
  0xed   :  { %v371_v10 = vadd.f32 %v369_v6, %v359_v4  ;;  %v372_v11 = vadd.f32 %v370_v7, %v336_v5 }
  0xef   :  { %v374_v13 = vadd.f32 %v372_v11, %v338_v9  ;;  %v373_v14 = vadd.f32 %v371_v10, %v360_v8 }
  0xf1   :  { %386 = vadd.xlane.f32.xlu0 %v374_v13  ;;  %v375_v15 = vadd.f32 %v373_v14, %v361_v12 }
  0xf5   :  { %389 = vadd.xlane.f32.xlu0 %v375_v15 }
 0x17e   :  { %v387_v17 = vpop.xlane.xlu0 %386 }
 0x17f   :  { %v391_v18 = vmul.f32 0.0009765625, %v387_v17 }
 0x181   :  { %v393_v20 = vmul.f32 %v391_v18, %v391_v18 }
 0x182   :  { %v390_v19 = vpop.xlane.xlu0 %389 }
 0x183   :  { %v392_v21 = vmul.f32 0.0009765625, %v390_v19 }
 0x185   :  { %v394_v22 = vsub.f32 %v392_v21, %v393_v20 }
 0x187   :  { %v396_v23 = vadd.f32 1e-05, %v394_v22 }
 0x189   :  { %551 = vrsqrt.f32 %v396_v23 }
 0x193   :  { %v552_v26 = vpop.eup %551 }
 0x194   :  { %v398_v27 = vmul.f32 %v552_v26, %v395_v25 }
 0x196   :  { %v399_v28 = vmul.f32 %v398_v27, %v391_v18 }
 0x198   :  { %401 = vrot.lane.b32.xlu1 %v399_v28, %s572_s24 }
 0x19c   :  { %407 = vperm.xlu1 %549, %v398_v27  }
 0x20a   :  { %v402_v29 = vpop.permute.xlu1 %401 }
 0x20b   :  { %v404_v30 = vsub.f32 %v395_v25, %v402_v29 }
 0x20d   :  { %412 = vperm.xlu0 %550, %v404_v30  }
 0x21b   :  { %v408_v31 = vpop.permute.xlu1 %407 }
 0x21c   :  { %v423_v32 = vmul.f32 %v408_v31, %v123_v50  ;;  %v424_v33 = vmul.f32 %v408_v31, %v125_v52  ;;  %v425_v34 = vmul.f32 %v408_v31, %v194_v55  ;;  %v426_v35 = vmul.f32 %v408_v31, %v196_v57 }
 0x21d   :  { %v427_v36 = vmul.f32 %v408_v31, %v265_v0  ;;  %v428_v37 = vmul.f32 %v408_v31, %v267_v3  ;;  %v429_v38 = vmul.f32 %v408_v31, %v336_v5  ;;  %v430_v44 = vmul.f32 %v408_v31, %v338_v9 }
 0x28c   :  { %v413_v39 = vpop.permute.xlu0 %412 }
 0x28d   :  { %v431_v40 = vadd.f32 %v423_v32, %v413_v39  ;;  %v432_v41 = vadd.f32 %v424_v33, %v413_v39  ;;  %v433_v42 = vadd.f32 %v425_v34, %v413_v39  ;;  %v434_v43 = vadd.f32 %v426_v35, %v413_v39 }
 0x28e   :  { %v435_v45 = vadd.f32 %v427_v36, %v413_v39  ;;  %v436_v46 = vadd.f32 %v428_v37, %v413_v39  ;;  %v703_v47 = vadd.f32 %v429_v38, %v413_v39  ;;  %v705_v48 = vadd.f32 %v430_v44, %v413_v39 }
 0x28f   :  { %v447_v49 = vmin.f32 %v431_v40, 0.0  ;;  %v448_v50 = vmin.f32 %v432_v41, 0.0  ;;  %v449_v51 = vmin.f32 %v433_v42, 0.0  ;;  %v450_v52 = vmin.f32 %v434_v43, 0.0 }
 0x290   :  { %v451_v53 = vmin.f32 %v435_v45, 0.0  ;;  %v452_v54 = vmin.f32 %v436_v46, 0.0  ;;  %v453_v55 = vmin.f32 %v703_v47, 0.0  ;;  %v454_v59 = vmin.f32 %v705_v48, 0.0 }
 0x291   :  { %v455_v56 = vmul.f32 1.442695, %v447_v49  ;;  %v457_v57 = vmul.f32 1.442695, %v448_v50  ;;  %v459_v58 = vmul.f32 1.442695, %v449_v51 }
 0x292   :  { %v461_v60 = vmul.f32 1.442695, %v450_v52  ;;  %v463_v61 = vmul.f32 1.442695, %v451_v53  ;;  %v465_v62 = vmul.f32 1.442695, %v452_v54 }
 0x293   :  { %553 = vpow2.f32 %v455_v56  ;;  %v467_v63 = vmul.f32 1.442695, %v453_v55  ;;  %v469_v0 = vmul.f32 1.442695, %v454_v59  ;;  %vm439_vm1 = vcmp.gt.f32.partialorder %v431_v40, 0.0 }
 0x294   :  { %555 = vpow2.f32 %v457_v57  ;;  %vm440_vm2 = vcmp.gt.f32.partialorder %v432_v41, 0.0  ;;  %vm441_vm3 = vcmp.gt.f32.partialorder %v433_v42, 0.0  ;;  %vm442_vm4 = vcmp.gt.f32.partialorder %v434_v43, 0.0 }
 0x295   :  { %557 = vpow2.f32 %v459_v58  ;;  %vm443_vm5 = vcmp.gt.f32.partialorder %v435_v45, 0.0  ;;  %vm444_vm6 = vcmp.gt.f32.partialorder %v436_v46, 0.0  ;;  %vm445_vm7 = vcmp.gt.f32.partialorder %v703_v47, 0.0 }
 0x296   :  { %559 = vpow2.f32 %v461_v60  ;;  %vm446_vm8 = vcmp.gt.f32.partialorder %v705_v48, 0.0 }
 0x297   :  { %561 = vpow2.f32 %v463_v61 }
 0x298   :  { %563 = vpow2.f32 %v465_v62 }
 0x299   :  { %565 = vpow2.f32 %v467_v63 }
 0x29a   :  { %567 = vpow2.f32 %v469_v0 }
 0x29d   :  { %v554_v1 = vpop.eup %553 }
 0x29e   :  { %v556_v2 = vpop.eup %555  ;;  %v505_v3 = vadd.f32 -1.0, %v554_v1 }
 0x29f   :  { %v558_v4 = vpop.eup %557  ;;  %v506_v5 = vadd.f32 -1.0, %v556_v2 }
 0x2a0   :  { %v560_v6 = vpop.eup %559  ;;  %v507_v7 = vadd.f32 -1.0, %v558_v4  ;;  %v479_v8 = vsel %vm439_vm1, %v431_v40, %v505_v3 }
 0x2a1   :  { %v562_v9 = vpop.eup %561  ;;  %v508_v10 = vadd.f32 -1.0, %v560_v6  ;;  %v480_v11 = vsel %vm440_vm2, %v432_v41, %v506_v5  ;;  %487 = vst [vmem:[%s740_s3] sm:$0xff] %v479_v8 }
 0x2a2   :  { %v564_v12 = vpop.eup %563  ;;  %v509_v13 = vadd.f32 -1.0, %v562_v9  ;;  %v481_v14 = vsel %vm441_vm3, %v433_v42, %v507_v7  ;;  %488 = vst [vmem:[%s740_s3 + $0x8] sm:$0xff] %v480_v11 }
 0x2a3   :  { %v566_v15 = vpop.eup %565  ;;  %v510_v16 = vadd.f32 -1.0, %v564_v12  ;;  %v482_v17 = vsel %vm442_vm4, %v434_v43, %v508_v10  ;;  %489 = vst [vmem:[%s740_s3 + $0x10] sm:$0xff] %v481_v14 }
 0x2a4   :  { %v568_v18 = vpop.eup %567  ;;  %v511_v19 = vadd.f32 -1.0, %v566_v15  ;;  %v483_v20 = vsel %vm443_vm5, %v435_v45, %v509_v13  ;;  %490 = vst [vmem:[%s740_s3 + $0x18] sm:$0xff] %v482_v17 }
 0x2a5   :  { %v512_v21 = vadd.f32 -1.0, %v568_v18  ;;  %v484_v22 = vsel %vm444_vm6, %v436_v46, %v510_v16  ;;  %491 = vst [vmem:[%s740_s3 + $0x20] sm:$0xff] %v483_v20 }
 0x2a6   :  { %v485_v23 = vsel %vm445_vm7, %v703_v47, %v511_v19  ;;  %492 = vst [vmem:[%s740_s3 + $0x28] sm:$0xff] %v484_v22 }
 0x2a7   :  { %v486_v24 = vsel %vm446_vm8, %v705_v48, %v512_v21  ;;  %493 = vst [vmem:[%s740_s3 + $0x30] sm:$0xff] %v485_v23 }
 0x2a8   :  { %494 = vst [vmem:[%s740_s3 + $0x38] sm:$0xff] %v486_v24 }

// kernel: down_transition_pallas.4
= control target key start
LH: loop header
LB: loop body
LE: loop exit
PB: predicated region body
PF: predicated region fallthrough
CT: control target
= control target key end

     0   :  { %vm733_vm0 = vcmask 588800   ;;  %vm737_vm1 = vcmask 1043456   ;;  %s2360_s28 = smov 2   ;;  %s2361_s4 = smov 1   ;;  %vm950_vm2 = vcmask 15360   ;;  %vm1214_vm10 = vcmask 7168   ;;  %s3858_s0 = inlined_call_operand.vmem [shape: bf16[200,1024], index: 0, kind: input, shape index: {}]   ;;  %s3859_s1 = inlined_call_operand.vmem [shape: bf16[5,8,200], index: 1, kind: input, shape index: {}]   ;;  %s3860_s2 = inlined_call_operand.vmem [shape: f32[8,2], index: 2, kind: input, shape index: {}]   ;;  %s3861_s3 = inlined_call_operand.vmem [shape: f32[8,1024], index: 3, kind: output, shape index: {}]  }
   0x1   :  { %v21_v0 = vld [vmem:[%s3858_s0] sm:$0xff]  ;;  %v22_v2 = vld [vmem:[%s3858_s0 + $0x8] sm:$0xff]  ;;  %s2363_s7 = smov 126  }
   0x2   :  { %v25_v1 = vld [vmem:[%s3858_s0 + $0x20] sm:$0xff]  ;;  %v26_v4 = vld [vmem:[%s3858_s0 + $0x28] sm:$0xff] }
   0x3   :  { %v2395_v3 = vcombine.high %v21_v0, %v25_v1  ;;  %v2400_v5 = vcombine.low %v21_v0, %v25_v1  ;;  %v29_v6 = vld [vmem:[%s3858_s0 + $0x40] sm:$0xff]  ;;  %v2408_v8 = vcombine.high %v22_v2, %v26_v4  ;;  %v2410_v9 = vcombine.low %v22_v2, %v26_v4  ;;  %v30_v11 = vld [vmem:[%s3858_s0 + $0x48] sm:$0xff] }
   0x4   :  { %v33_v7 = vld [vmem:[%s3858_s0 + $0x60] sm:$0xff]  ;;  %v34_v12 = vld [vmem:[%s3858_s0 + $0x68] sm:$0xff] }
   0x5   :  { %4018 = vst [vmem:[#allocation3_spill] sm:$0xff] %v2395_v3  ;;  %4019 = vst [vmem:[#allocation4_spill] sm:$0xff] %v2400_v5  ;;  %v2412_v10 = vcombine.high %v29_v6, %v33_v7  ;;  %v37_v13 = vld [vmem:[%s3858_s0 + $0x80] sm:$0xff]  ;;  %762 = vmatprep.subr.bf16.mxu0 %v2395_v3  ;;  %v2424_v14 = vcombine.high %v30_v11, %v34_v12  ;;  %v38_v16 = vld [vmem:[%s3858_s0 + $0x88] sm:$0xff]  ;;  %803 = vmatprep.subr.bf16.mxu1 %v2408_v8 }
   0x6   :  { %4020 = vst [vmem:[#allocation5_spill] sm:$0xff] %v2408_v8  ;;  %4021 = vst [vmem:[#allocation6_spill] sm:$0xff] %v2410_v9  ;;  %v41_v15 = vld [vmem:[%s3858_s0 + $0xa0] sm:$0xff]  ;;  %v42_v17 = vld [vmem:[%s3858_s0 + $0xa8] sm:$0xff]  ;;  %763 = vmatpush1.bf16.msra.mxu0 %v2400_v5  ;;  %v2437_v18 = vcombine.low %v29_v6, %v33_v7  ;;  %804 = vmatpush1.bf16.msra.mxu1 %v2410_v9  ;;  %v2441_v19 = vcombine.low %v30_v11, %v34_v12 }
   0x7   :  { %4022 = vst [vmem:[#allocation7_spill] sm:$0xff] %v2412_v10  ;;  %4023 = vst [vmem:[#allocation8_spill] sm:$0xff] %v2424_v14  ;;  %764 = vmatprep.subr.bf16.mxu0 %v2412_v10  ;;  %v2443_v20 = vcombine.high %v37_v13, %v41_v15  ;;  %805 = vmatprep.subr.bf16.mxu1 %v2424_v14  ;;  %v2446_v21 = vcombine.high %v38_v16, %v42_v17  ;;  %v45_v22 = vld [vmem:[%s3858_s0 + $0xc0] sm:$0xff]  ;;  %v46_v24 = vld [vmem:[%s3858_s0 + $0xc8] sm:$0xff] }
   0x8   :  { %v49_v23 = vld [vmem:[%s3858_s0 + $0xe0] sm:$0xff]  ;;  %v50_v25 = vld [vmem:[%s3858_s0 + $0xe8] sm:$0xff]  ;;  %v2461_v26 = vcombine.low %v37_v13, %v41_v15  ;;  %v2465_v27 = vcombine.low %v38_v16, %v42_v17 }
   0x9   :  { %v2467_v28 = vcombine.high %v45_v22, %v49_v23  ;;  %v2470_v29 = vcombine.high %v46_v24, %v50_v25  ;;  %v53_v30 = vld [vmem:[%s3858_s0 + $0x100] sm:$0xff]  ;;  %v54_v32 = vld [vmem:[%s3858_s0 + $0x108] sm:$0xff]  ;;  %v2485_v34 = vcombine.low %v45_v22, %v49_v23  ;;  %v2489_v35 = vcombine.low %v46_v24, %v50_v25 }
   0xa   :  { %765 = vmatpush1.bf16.msra.mxu0 %v2437_v18  ;;  %806 = vmatpush1.bf16.msra.mxu1 %v2441_v19  ;;  %v57_v31 = vld [vmem:[%s3858_s0 + $0x120] sm:$0xff]  ;;  %v58_v33 = vld [vmem:[%s3858_s0 + $0x128] sm:$0xff] }
   0xb   :  { %766 = vmatprep.subr.bf16.mxu0 %v2443_v20  ;;  %807 = vmatprep.subr.bf16.mxu1 %v2446_v21  ;;  %v2491_v36 = vcombine.high %v53_v30, %v57_v31  ;;  %v2494_v37 = vcombine.high %v54_v32, %v58_v33  ;;  %v61_v38 = vld [vmem:[%s3858_s0 + $0x140] sm:$0xff]  ;;  %v62_v40 = vld [vmem:[%s3858_s0 + $0x148] sm:$0xff]  ;;  %v2509_v42 = vcombine.low %v53_v30, %v57_v31 }
   0xc   :  { %v65_v39 = vld [vmem:[%s3858_s0 + $0x160] sm:$0xff]  ;;  %v66_v41 = vld [vmem:[%s3858_s0 + $0x168] sm:$0xff]  ;;  %v2518_v44 = vcombine.low %v54_v32, %v58_v33 }
   0xd   :  { %v2514_v43 = vld [vmem:[%s3859_s1] sm:$0xff]  ;;  %v2520_v45 = vcombine.high %v61_v38, %v65_v39  ;;  %v2523_v46 = vcombine.high %v62_v40, %v66_v41  ;;  %v70_v50 = vld [vmem:[%s3858_s0 + $0x188] sm:$0xff]  ;;  %v2542_v52 = vcombine.low %v61_v38, %v65_v39  ;;  %v2548_v53 = vcombine.low %v62_v40, %v66_v41 }
   0xe   :  { %767 = vmatpush1.bf16.msra.mxu0 %v2461_v26  ;;  %808 = vmatpush1.bf16.msra.mxu1 %v2465_v27  ;;  %v69_v47 = vld [vmem:[%s3858_s0 + $0x180] sm:$0xff]  ;;  %v2533_v49 = vcombine.high %v2514_v43, %v2514_v43  ;;  %v74_v51 = vld [vmem:[%s3858_s0 + $0x1a8] sm:$0xff] }
   0xf   :  { %768 = vmatprep.subr.bf16.mxu0 %v2467_v28  ;;  %809 = vmatprep.subr.bf16.mxu1 %v2470_v29  ;;  %v73_v48 = vld [vmem:[%s3858_s0 + $0x1a0] sm:$0xff]  ;;  %v2553_v55 = vcombine.high %v70_v50, %v74_v51  ;;  %v78_v58 = vld [vmem:[%s3858_s0 + $0x1c8] sm:$0xff]  ;;  %v2574_v61 = vcombine.low %v70_v50, %v74_v51 }
  0x10   :  { %2257 = vmatprep.mubr.msk.bf16.mxu0 %vm733_vm0, %v2533_v49  ;;  %v2550_v54 = vcombine.high %v69_v47, %v73_v48  ;;  %v77_v56 = vld [vmem:[%s3858_s0 + $0x1c0] sm:$0xff]  ;;  %2259 = vmatprep.mubr.msk.bf16.mxu1 %vm733_vm0, %v2533_v49  ;;  %v82_v59 = vld [vmem:[%s3858_s0 + $0x1e8] sm:$0xff]  ;;  %v2570_v60 = vcombine.low %v69_v47, %v73_v48 }
  0x11   :  { %v81_v57 = vld [vmem:[%s3858_s0 + $0x1e0] sm:$0xff]  ;;  %4025 = vst [vmem:[#allocation10_spill] sm:$0xff] %v2574_v61  ;;  %v2579_v63 = vcombine.high %v78_v58, %v82_v59  ;;  %v86_v2 = vld [vmem:[%s3858_s0 + $0x208] sm:$0xff]  ;;  %v2598_v7 = vcombine.low %v78_v58, %v82_v59 }
  0x12   :  { %769 = vmatpush1.bf16.msra.mxu0 %v2485_v34  ;;  %810 = vmatpush1.bf16.msra.mxu1 %v2489_v35  ;;  %4024 = vst [vmem:[#allocation9_spill] sm:$0xff] %v2570_v60  ;;  %v2576_v62 = vcombine.high %v77_v56, %v81_v57  ;;  %v85_v0 = vld [vmem:[%s3858_s0 + $0x200] sm:$0xff]  ;;  %v90_v4 = vld [vmem:[%s3858_s0 + $0x228] sm:$0xff]  ;;  %v2594_v6 = vcombine.low %v77_v56, %v81_v57 }
  0x13   :  { %770 = vmatprep.subr.bf16.mxu0 %v2491_v36  ;;  %811 = vmatprep.subr.bf16.mxu1 %v2494_v37  ;;  %4027 = vst [vmem:[#allocation12_spill] sm:$0xff] %v2579_v63  ;;  %v89_v1 = vld [vmem:[%s3858_s0 + $0x220] sm:$0xff]  ;;  %4029 = vst [vmem:[#allocation14_spill] sm:$0xff] %v2598_v7  ;;  %v2603_v12 = vcombine.high %v86_v2, %v90_v4  ;;  %v94_v16 = vld [vmem:[%s3858_s0 + $0x248] sm:$0xff]  ;;  %v2622_v23 = vcombine.low %v86_v2, %v90_v4 }
  0x14   :  { %4026 = vst [vmem:[#allocation11_spill] sm:$0xff] %v2576_v62  ;;  %4028 = vst [vmem:[#allocation13_spill] sm:$0xff] %v2594_v6  ;;  %v2600_v11 = vcombine.high %v85_v0, %v89_v1  ;;  %v93_v13 = vld [vmem:[%s3858_s0 + $0x240] sm:$0xff]  ;;  %v98_v17 = vld [vmem:[%s3858_s0 + $0x268] sm:$0xff]  ;;  %v2618_v22 = vcombine.low %v85_v0, %v89_v1 }
  0x15   :  { %4031 = vst [vmem:[#allocation16_spill] sm:$0xff] %v2603_v12  ;;  %v97_v15 = vld [vmem:[%s3858_s0 + $0x260] sm:$0xff]  ;;  %4033 = vst [vmem:[#allocation18_spill] sm:$0xff] %v2622_v23  ;;  %v2627_v25 = vcombine.high %v94_v16, %v98_v17  ;;  %v102_v32 = vld [vmem:[%s3858_s0 + $0x288] sm:$0xff]  ;;  %v2646_v39 = vcombine.low %v94_v16, %v98_v17 }
  0x16   :  { %771 = vmatpush1.bf16.msra.mxu0 %v2509_v42  ;;  %812 = vmatpush1.bf16.msra.mxu1 %v2518_v44  ;;  %4030 = vst [vmem:[#allocation15_spill] sm:$0xff] %v2600_v11  ;;  %4032 = vst [vmem:[#allocation17_spill] sm:$0xff] %v2618_v22  ;;  %v2624_v24 = vcombine.high %v93_v13, %v97_v15  ;;  %v101_v30 = vld [vmem:[%s3858_s0 + $0x280] sm:$0xff]  ;;  %v106_v33 = vld [vmem:[%s3858_s0 + $0x2a8] sm:$0xff]  ;;  %v2642_v38 = vcombine.low %v93_v13, %v97_v15 }
  0x17   :  { %772 = vmatprep.subr.bf16.mxu0 %v2520_v45  ;;  %813 = vmatprep.subr.bf16.mxu1 %v2523_v46  ;;  %4035 = vst [vmem:[#allocation20_spill] sm:$0xff] %v2627_v25  ;;  %v105_v31 = vld [vmem:[%s3858_s0 + $0x2a0] sm:$0xff]  ;;  %4037 = vst [vmem:[#allocation22_spill] sm:$0xff] %v2646_v39  ;;  %v2651_v41 = vcombine.high %v102_v32, %v106_v33  ;;  %v110_v50 = vld [vmem:[%s3858_s0 + $0x2c8] sm:$0xff]  ;;  %v2670_v57 = vcombine.low %v102_v32, %v106_v33 }
  0x18   :  { %4034 = vst [vmem:[#allocation19_spill] sm:$0xff] %v2624_v24  ;;  %4036 = vst [vmem:[#allocation21_spill] sm:$0xff] %v2642_v38  ;;  %v2648_v40 = vcombine.high %v101_v30, %v105_v31  ;;  %v109_v47 = vld [vmem:[%s3858_s0 + $0x2c0] sm:$0xff]  ;;  %v114_v51 = vld [vmem:[%s3858_s0 + $0x2e8] sm:$0xff]  ;;  %v2666_v56 = vcombine.low %v101_v30, %v105_v31 }
  0x19   :  { %4039 = vst [vmem:[#allocation24_spill] sm:$0xff] %v2651_v41  ;;  %v113_v48 = vld [vmem:[%s3858_s0 + $0x2e0] sm:$0xff]  ;;  %4041 = vst [vmem:[#allocation26_spill] sm:$0xff] %v2670_v57  ;;  %v2675_v59 = vcombine.high %v110_v50, %v114_v51  ;;  %v118_v1 = vld [vmem:[%s3858_s0 + $0x308] sm:$0xff]  ;;  %v2688_v4 = vcombine.low %v110_v50, %v114_v51 }
  0x1a   :  { %773 = vmatpush1.bf16.msra.mxu0 %v2542_v52  ;;  %814 = vmatpush1.bf16.msra.mxu1 %v2548_v53  ;;  %4038 = vst [vmem:[#allocation23_spill] sm:$0xff] %v2648_v40  ;;  %4040 = vst [vmem:[#allocation25_spill] sm:$0xff] %v2666_v56  ;;  %v2672_v58 = vcombine.high %v109_v47, %v113_v48  ;;  %v117_v0 = vld [vmem:[%s3858_s0 + $0x300] sm:$0xff]  ;;  %v2684_v2 = vcombine.low %v109_v47, %v113_v48  ;;  %v23_v30 = vld [vmem:[%s3858_s0 + $0x10] sm:$0xff] }
  0x1b   :  { %774 = vmatprep.subr.bf16.mxu0 %v2550_v54  ;;  %815 = vmatprep.subr.bf16.mxu1 %v2553_v55  ;;  %4043 = vst [vmem:[#allocation28_spill] sm:$0xff] %v2675_v59  ;;  %4045 = vst [vmem:[#allocation30_spill] sm:$0xff] %v2688_v4  ;;  %v2690_v13 = vcombine.high %v117_v0, %v117_v0  ;;  %v2248_v15 = vcombine.low %v117_v0, %v117_v0  ;;  %v27_v31 = vld [vmem:[%s3858_s0 + $0x30] sm:$0xff]  ;;  %v24_v32 = vld [vmem:[%s3858_s0 + $0x18] sm:$0xff] }
  0x1c   :  { %4042 = vst [vmem:[#allocation27_spill] sm:$0xff] %v2672_v58  ;;  %4044 = vst [vmem:[#allocation29_spill] sm:$0xff] %v2684_v2  ;;  %v2693_v16 = vcombine.high %v118_v1, %v118_v1  ;;  %v2250_v17 = vcombine.low %v118_v1, %v118_v1  ;;  %v28_v33 = vld [vmem:[%s3858_s0 + $0x38] sm:$0xff]  ;;  %v2714_v48 = vcombine.high %v23_v30, %v27_v31  ;;  %v31_v0 = vld [vmem:[%s3858_s0 + $0x50] sm:$0xff] }
  0x1d   :  { %4046 = vst [vmem:[#allocation31_spill] sm:$0xff] %v2690_v13  ;;  %v2712_v47 = vsel %vm737_vm1, %v2248_v15, 0  ;;  %v2721_v51 = vcombine.high %v24_v32, %v28_v33  ;;  %v35_v1 = vld [vmem:[%s3858_s0 + $0x70] sm:$0xff]  ;;  %v2731_v15 = vcombine.low %v2514_v43, %v2514_v43 }
  0x1e   :  { %775 = vmatpush1.bf16.msra.mxu0 %v2570_v60  ;;  %816 = vmatpush1.bf16.msra.mxu1 %v2574_v61  ;;  %4047 = vst [vmem:[#allocation32_spill] sm:$0xff] %v2693_v16  ;;  %4048 = vst [vmem:[#allocation33_spill] sm:$0xff] %v2712_v47  ;;  %v2719_v50 = vsel %vm737_vm1, %v2250_v17, 0  ;;  %v36_v17 = vld [vmem:[%s3858_s0 + $0x78] sm:$0xff]  ;;  %v2746_v43 = vcombine.high %v31_v0, %v35_v1 }
  0x1f   :  { %776 = vmatprep.subr.bf16.mxu0 %v2576_v62  ;;  %817 = vmatprep.subr.bf16.mxu1 %v2579_v63  ;;  %4049 = vst [vmem:[#allocation34_spill] sm:$0xff] %v2714_v48  ;;  %4050 = vst [vmem:[#allocation35_spill] sm:$0xff] %v2719_v50 }
  0x20   :  { %4051 = vst [vmem:[#allocation36_spill] sm:$0xff] %v2721_v51  ;;  %4054 = vst [vmem:[#allocation39_spill] sm:$0xff] %v2746_v43 }
  0x22   :  { %777 = vmatpush1.bf16.msra.mxu0 %v2594_v6  ;;  %818 = vmatpush1.bf16.msra.mxu1 %v2598_v7 }
  0x23   :  { %778 = vmatprep.subr.bf16.mxu0 %v2600_v11  ;;  %819 = vmatprep.subr.bf16.mxu1 %v2603_v12 }
  0x26   :  { %779 = vmatpush1.bf16.msra.mxu0 %v2618_v22  ;;  %820 = vmatpush1.bf16.msra.mxu1 %v2622_v23 }
  0x27   :  { %780 = vmatprep.subr.bf16.mxu0 %v2624_v24  ;;  %821 = vmatprep.subr.bf16.mxu1 %v2627_v25 }
  0x2a   :  { %781 = vmatpush1.bf16.msra.mxu0 %v2642_v38  ;;  %822 = vmatpush1.bf16.msra.mxu1 %v2646_v39 }
  0x2b   :  { %782 = vmatprep.subr.bf16.mxu0 %v2648_v40  ;;  %823 = vmatprep.subr.bf16.mxu1 %v2651_v41 }
  0x2e   :  { %783 = vmatpush1.bf16.msra.mxu0 %v2666_v56  ;;  %824 = vmatpush1.bf16.msra.mxu1 %v2670_v57 }
  0x2f   :  { %784 = vmatprep.subr.bf16.mxu0 %v2672_v58  ;;  %825 = vmatprep.subr.bf16.mxu1 %v2675_v59  ;;  %v39_v59 = vld [vmem:[%s3858_s0 + $0x90] sm:$0xff] }
  0x32   :  { %785 = vmatpush1.bf16.msra.mxu0 %v2684_v2  ;;  %826 = vmatpush1.bf16.msra.mxu1 %v2688_v4  ;;  %v2744_v4 = vcombine.low %v24_v32, %v28_v33  ;;  %v44_v32 = vld [vmem:[%s3858_s0 + $0xb8] sm:$0xff]  ;;  %v2766_v33 = vcombine.low %v31_v0, %v35_v1  ;;  %v51_v0 = vld [vmem:[%s3858_s0 + $0xf0] sm:$0xff] }
  0x33   :  { %2256 = vmatprep.subr.msk.bf16.mxu0 %vm737_vm1, %v2690_v13  ;;  %2258 = vmatprep.subr.msk.bf16.mxu1 %vm737_vm1, %v2693_v16  ;;  %v32_v16 = vld [vmem:[%s3858_s0 + $0x58] sm:$0xff]  ;;  %v2740_v13 = vcombine.low %v23_v30, %v27_v31  ;;  %v43_v30 = vld [vmem:[%s3858_s0 + $0xb0] sm:$0xff] }
  0x34   :  { %4053 = vst [vmem:[#allocation38_spill] sm:$0xff] %v2744_v4  ;;  %v2749_v2 = vcombine.high %v32_v16, %v36_v17  ;;  %v40_v31 = vld [vmem:[%s3858_s0 + $0x98] sm:$0xff]  ;;  %4056 = vst [vmem:[#allocation41_spill] sm:$0xff] %v2766_v33 }
  0x35   :  { %4052 = vst [vmem:[#allocation37_spill] sm:$0xff] %v2740_v13  ;;  %v52_v1 = vld [vmem:[%s3858_s0 + $0xf8] sm:$0xff] }
  0x36   :  { %787 = vmatpush1.bf16.msra.mxu0 %v2712_v47  ;;  %828 = vmatpush1.bf16.msra.mxu1 %v2719_v50  ;;  %4055 = vst [vmem:[#allocation40_spill] sm:$0xff] %v2749_v2  ;;  %v2775_v50 = vcombine.high %v40_v31, %v44_v32  ;;  %v47_v47 = vld [vmem:[%s3858_s0 + $0xd0] sm:$0xff] }
  0x37   :  { %844 = vmatprep.subr.bf16.mxu0 %v2714_v48  ;;  %885 = vmatprep.subr.bf16.mxu1 %v2721_v51  ;;  %v2770_v51 = vcombine.low %v32_v16, %v36_v17  ;;  %v2772_v48 = vcombine.high %v39_v59, %v43_v30  ;;  %v48_v16 = vld [vmem:[%s3858_s0 + $0xd8] sm:$0xff]  ;;  %v2794_v17 = vcombine.low %v39_v59, %v43_v30  ;;  %v59_v59 = vld [vmem:[%s3858_s0 + $0x130] sm:$0xff] }
  0x38   :  { %4059 = vst [vmem:[#allocation44_spill] sm:$0xff] %v2775_v50  ;;  %v56_v30 = vld [vmem:[%s3858_s0 + $0x118] sm:$0xff] }
  0x39   :  { %795 = vmatmul.mubr.bf16.vlgmr.msra.gmra.mrb[0].mxu0 %v2731_v15  ;;  %836 = vmatmul.mubr.bf16.vlgmr.msra.gmra.mrb[0].mxu1 %v2731_v15  ;;  %4057 = vst [vmem:[#allocation42_spill] sm:$0xff] %v2770_v51  ;;  %4058 = vst [vmem:[#allocation43_spill] sm:$0xff] %v2772_v48 }
  0x3a   :  { %845 = vmatpush1.bf16.msra.mxu0 %v2740_v13  ;;  %886 = vmatpush1.bf16.msra.mxu1 %v2744_v4  ;;  %4060 = vst [vmem:[#allocation45_spill] sm:$0xff] %v2794_v17  ;;  %v2803_v4 = vcombine.high %v48_v16, %v52_v1 }
  0x3b   :  { %846 = vmatprep.subr.bf16.mxu0 %v2746_v43  ;;  %887 = vmatprep.subr.bf16.mxu1 %v2749_v2  ;;  %v2798_v2 = vcombine.low %v40_v31, %v44_v32  ;;  %v2800_v43 = vcombine.high %v47_v47, %v51_v0  ;;  %v60_v31 = vld [vmem:[%s3858_s0 + $0x138] sm:$0xff]  ;;  %v2818_v32 = vcombine.low %v47_v47, %v51_v0  ;;  %v67_v47 = vld [vmem:[%s3858_s0 + $0x170] sm:$0xff] }
  0x3c   :  { %2261 = vmatprep.mubr.msk.bf16.mxu0 %vm733_vm0, %v2533_v49  ;;  %2263 = vmatprep.mubr.msk.bf16.mxu1 %vm733_vm0, %v2533_v49  ;;  %4063 = vst [vmem:[#allocation48_spill] sm:$0xff] %v2803_v4  ;;  %v55_v49 = vld [vmem:[%s3858_s0 + $0x110] sm:$0xff]  ;;  %v64_v0 = vld [vmem:[%s3858_s0 + $0x158] sm:$0xff] }
  0x3d   :  { %4061 = vst [vmem:[#allocation46_spill] sm:$0xff] %v2798_v2  ;;  %4062 = vst [vmem:[#allocation47_spill] sm:$0xff] %v2800_v43 }
  0x3e   :  { %847 = vmatpush1.bf16.msra.mxu0 %v2766_v33  ;;  %888 = vmatpush1.bf16.msra.mxu1 %v2770_v51  ;;  %4064 = vst [vmem:[#allocation49_spill] sm:$0xff] %v2818_v32  ;;  %v2827_v51 = vcombine.high %v56_v30, %v60_v31  ;;  %v63_v33 = vld [vmem:[%s3858_s0 + $0x150] sm:$0xff] }
  0x3f   :  { %848 = vmatprep.subr.bf16.mxu0 %v2772_v48  ;;  %889 = vmatprep.subr.bf16.mxu1 %v2775_v50  ;;  %v2822_v50 = vcombine.low %v48_v16, %v52_v1  ;;  %v2824_v48 = vcombine.high %v55_v49, %v59_v59  ;;  %v68_v16 = vld [vmem:[%s3858_s0 + $0x178] sm:$0xff]  ;;  %v2842_v1 = vcombine.low %v55_v49, %v59_v59  ;;  %v75_v49 = vld [vmem:[%s3858_s0 + $0x1b0] sm:$0xff] }
  0x40   :  { %4067 = vst [vmem:[#allocation52_spill] sm:$0xff] %v2827_v51  ;;  %v72_v59 = vld [vmem:[%s3858_s0 + $0x198] sm:$0xff] }
  0x41   :  { %4065 = vst [vmem:[#allocation50_spill] sm:$0xff] %v2822_v50  ;;  %4066 = vst [vmem:[#allocation51_spill] sm:$0xff] %v2824_v48 }
  0x42   :  { %849 = vmatpush1.bf16.msra.mxu0 %v2794_v17  ;;  %890 = vmatpush1.bf16.msra.mxu1 %v2798_v2  ;;  %4068 = vst [vmem:[#allocation53_spill] sm:$0xff] %v2842_v1  ;;  %v2851_v2 = vcombine.high %v64_v0, %v68_v16  ;;  %v71_v17 = vld [vmem:[%s3858_s0 + $0x190] sm:$0xff] }
  0x43   :  { %850 = vmatprep.subr.bf16.mxu0 %v2800_v43  ;;  %891 = vmatprep.subr.bf16.mxu1 %v2803_v4  ;;  %v2846_v4 = vcombine.low %v56_v30, %v60_v31  ;;  %v2848_v43 = vcombine.high %v63_v33, %v67_v47  ;;  %v76_v30 = vld [vmem:[%s3858_s0 + $0x1b8] sm:$0xff]  ;;  %v2866_v31 = vcombine.low %v63_v33, %v67_v47  ;;  %v83_v33 = vld [vmem:[%s3858_s0 + $0x1f0] sm:$0xff] }
  0x44   :  { %4071 = vst [vmem:[#allocation56_spill] sm:$0xff] %v2851_v2  ;;  %v80_v47 = vld [vmem:[%s3858_s0 + $0x1d8] sm:$0xff] }
  0x45   :  { %4069 = vst [vmem:[#allocation54_spill] sm:$0xff] %v2846_v4  ;;  %4070 = vst [vmem:[#allocation55_spill] sm:$0xff] %v2848_v43 }
  0x46   :  { %851 = vmatpush1.bf16.msra.mxu0 %v2818_v32  ;;  %892 = vmatpush1.bf16.msra.mxu1 %v2822_v50  ;;  %4072 = vst [vmem:[#allocation57_spill] sm:$0xff] %v2866_v31  ;;  %v2875_v50 = vcombine.high %v72_v59, %v76_v30  ;;  %v79_v32 = vld [vmem:[%s3858_s0 + $0x1d0] sm:$0xff] }
  0x47   :  { %852 = vmatprep.subr.bf16.mxu0 %v2824_v48  ;;  %893 = vmatprep.subr.bf16.mxu1 %v2827_v51  ;;  %v2870_v51 = vcombine.low %v64_v0, %v68_v16  ;;  %v2872_v48 = vcombine.high %v71_v17, %v75_v49  ;;  %v84_v0 = vld [vmem:[%s3858_s0 + $0x1f8] sm:$0xff]  ;;  %v2890_v16 = vcombine.low %v71_v17, %v75_v49  ;;  %v91_v17 = vld [vmem:[%s3858_s0 + $0x230] sm:$0xff] }
  0x48   :  { %4075 = vst [vmem:[#allocation60_spill] sm:$0xff] %v2875_v50  ;;  %v88_v49 = vld [vmem:[%s3858_s0 + $0x218] sm:$0xff] }
  0x49   :  { %4073 = vst [vmem:[#allocation58_spill] sm:$0xff] %v2870_v51  ;;  %4074 = vst [vmem:[#allocation59_spill] sm:$0xff] %v2872_v48 }
  0x4a   :  { %853 = vmatpush1.bf16.msra.mxu0 %v2842_v1  ;;  %894 = vmatpush1.bf16.msra.mxu1 %v2846_v4  ;;  %4076 = vst [vmem:[#allocation61_spill] sm:$0xff] %v2890_v16  ;;  %v2899_v4 = vcombine.high %v80_v47, %v84_v0  ;;  %v87_v1 = vld [vmem:[%s3858_s0 + $0x210] sm:$0xff] }
  0x4b   :  { %854 = vmatprep.subr.bf16.mxu0 %v2848_v43  ;;  %895 = vmatprep.subr.bf16.mxu1 %v2851_v2  ;;  %v2894_v2 = vcombine.low %v72_v59, %v76_v30  ;;  %v2896_v43 = vcombine.high %v79_v32, %v83_v33  ;;  %v92_v59 = vld [vmem:[%s3858_s0 + $0x238] sm:$0xff]  ;;  %v2914_v30 = vcombine.low %v79_v32, %v83_v33  ;;  %v99_v32 = vld [vmem:[%s3858_s0 + $0x270] sm:$0xff] }
  0x4c   :  { %4079 = vst [vmem:[#allocation64_spill] sm:$0xff] %v2899_v4  ;;  %v96_v33 = vld [vmem:[%s3858_s0 + $0x258] sm:$0xff] }
  0x4d   :  { %4077 = vst [vmem:[#allocation62_spill] sm:$0xff] %v2894_v2  ;;  %4078 = vst [vmem:[#allocation63_spill] sm:$0xff] %v2896_v43 }
  0x4e   :  { %855 = vmatpush1.bf16.msra.mxu0 %v2866_v31  ;;  %896 = vmatpush1.bf16.msra.mxu1 %v2870_v51  ;;  %4080 = vst [vmem:[#allocation65_spill] sm:$0xff] %v2914_v30  ;;  %v2923_v51 = vcombine.high %v88_v49, %v92_v59  ;;  %v95_v31 = vld [vmem:[%s3858_s0 + $0x250] sm:$0xff] }
  0x4f   :  { %856 = vmatprep.subr.bf16.mxu0 %v2872_v48  ;;  %897 = vmatprep.subr.bf16.mxu1 %v2875_v50  ;;  %v2918_v50 = vcombine.low %v80_v47, %v84_v0  ;;  %v2920_v48 = vcombine.high %v87_v1, %v91_v17  ;;  %v100_v47 = vld [vmem:[%s3858_s0 + $0x278] sm:$0xff]  ;;  %v2938_v0 = vcombine.low %v87_v1, %v91_v17  ;;  %v107_v1 = vld [vmem:[%s3858_s0 + $0x2b0] sm:$0xff] }
  0x50   :  { %4083 = vst [vmem:[#allocation68_spill] sm:$0xff] %v2923_v51  ;;  %v104_v17 = vld [vmem:[%s3858_s0 + $0x298] sm:$0xff] }
  0x51   :  { %4081 = vst [vmem:[#allocation66_spill] sm:$0xff] %v2918_v50  ;;  %4082 = vst [vmem:[#allocation67_spill] sm:$0xff] %v2920_v48 }
  0x52   :  { %857 = vmatpush1.bf16.msra.mxu0 %v2890_v16  ;;  %898 = vmatpush1.bf16.msra.mxu1 %v2894_v2  ;;  %4084 = vst [vmem:[#allocation69_spill] sm:$0xff] %v2938_v0  ;;  %v2947_v2 = vcombine.high %v96_v33, %v100_v47  ;;  %v103_v16 = vld [vmem:[%s3858_s0 + $0x290] sm:$0xff] }
  0x53   :  { %858 = vmatprep.subr.bf16.mxu0 %v2896_v43  ;;  %899 = vmatprep.subr.bf16.mxu1 %v2899_v4  ;;  %v2942_v4 = vcombine.low %v88_v49, %v92_v59  ;;  %v2944_v43 = vcombine.high %v95_v31, %v99_v32  ;;  %v108_v49 = vld [vmem:[%s3858_s0 + $0x2b8] sm:$0xff]  ;;  %v2962_v59 = vcombine.low %v95_v31, %v99_v32  ;;  %v115_v31 = vld [vmem:[%s3858_s0 + $0x2f0] sm:$0xff] }
  0x54   :  { %4087 = vst [vmem:[#allocation72_spill] sm:$0xff] %v2947_v2  ;;  %v112_v32 = vld [vmem:[%s3858_s0 + $0x2d8] sm:$0xff] }
  0x55   :  { %4085 = vst [vmem:[#allocation70_spill] sm:$0xff] %v2942_v4  ;;  %4086 = vst [vmem:[#allocation71_spill] sm:$0xff] %v2944_v43 }
  0x56   :  { %859 = vmatpush1.bf16.msra.mxu0 %v2914_v30  ;;  %900 = vmatpush1.bf16.msra.mxu1 %v2918_v50  ;;  %v2971_v50 = vcombine.high %v104_v17, %v108_v49  ;;  %v111_v30 = vld [vmem:[%s3858_s0 + $0x2d0] sm:$0xff] }
  0x57   :  { %860 = vmatprep.subr.bf16.mxu0 %v2920_v48  ;;  %901 = vmatprep.subr.bf16.mxu1 %v2923_v51  ;;  %v2966_v51 = vcombine.low %v96_v33, %v100_v47  ;;  %v2968_v48 = vcombine.high %v103_v16, %v107_v1  ;;  %v116_v33 = vld [vmem:[%s3858_s0 + $0x2f8] sm:$0xff]  ;;  %v2986_v47 = vcombine.low %v103_v16, %v107_v1 }
  0x58   :  { %4090 = vst [vmem:[#allocation75_spill] sm:$0xff] %v2971_v50  ;;  %v120_v16 = vld [vmem:[%s3858_s0 + $0x318] sm:$0xff]  ;;  %v3004_v1 = vcombine.low %v111_v30, %v115_v31 }
  0x59   :  { %4088 = vst [vmem:[#allocation73_spill] sm:$0xff] %v2966_v51  ;;  %4089 = vst [vmem:[#allocation74_spill] sm:$0xff] %v2968_v48 }
  0x5a   :  { %861 = vmatpush1.bf16.msra.mxu0 %v2938_v0  ;;  %902 = vmatpush1.bf16.msra.mxu1 %v2942_v4  ;;  %4091 = vst [vmem:[#allocation76_spill] sm:$0xff] %v2986_v47  ;;  %v2995_v4 = vcombine.high %v112_v32, %v116_v33  ;;  %v119_v0 = vld [vmem:[%s3858_s0 + $0x310] sm:$0xff]  ;;  %4095 = vst [vmem:[#allocation80_spill] sm:$0xff] %v3004_v1 }
  0x5b   :  { %862 = vmatprep.subr.bf16.mxu0 %v2944_v43  ;;  %903 = vmatprep.subr.bf16.mxu1 %v2947_v2  ;;  %v2990_v2 = vcombine.low %v104_v17, %v108_v49  ;;  %v2992_v43 = vcombine.high %v111_v30, %v115_v31  ;;  %v3008_v17 = vcombine.low %v112_v32, %v116_v33  ;;  %v2264_v31 = vld [vmem:[%s3859_s1 + $0x8] sm:$0xff]  ;;  %v4103_v32 = vld [vmem:[#allocation30_spill] sm:$0xff]  ;;  %v4104_v33 = vld [vmem:[#allocation31_spill] sm:$0xff] }
  0x5c   :  { %4094 = vst [vmem:[#allocation79_spill] sm:$0xff] %v2995_v4  ;;  %v3010_v49 = vcombine.high %v119_v0, %v119_v0 }
  0x5d   :  { %4092 = vst [vmem:[#allocation77_spill] sm:$0xff] %v2990_v2  ;;  %4093 = vst [vmem:[#allocation78_spill] sm:$0xff] %v2992_v43 }
  0x5e   :  { %863 = vmatpush1.bf16.msra.mxu0 %v2962_v59  ;;  %904 = vmatpush1.bf16.msra.mxu1 %v2966_v51  ;;  %4096 = vst [vmem:[#allocation81_spill] sm:$0xff] %v3008_v17  ;;  %4097 = vst [vmem:[#allocation82_spill] sm:$0xff] %v3010_v49  ;;  %v2254_v51 = vcombine.low %v120_v16, %v120_v16 }
  0x5f   :  { %864 = vmatprep.subr.bf16.mxu0 %v2968_v48  ;;  %905 = vmatprep.subr.bf16.mxu1 %v2971_v50  ;;  %v2252_v50 = vcombine.low %v119_v0, %v119_v0  ;;  %v3013_v48 = vcombine.high %v120_v16, %v120_v16  ;;  %v4105_v16 = vld [vmem:[#allocation32_spill] sm:$0xff] }
  0x60   :  { %v3025_v0 = vsel %vm737_vm1, %v2254_v51, 0  ;;  %v4101_v51 = vld [vmem:[#allocation28_spill] sm:$0xff] }
  0x61   :  { %4098 = vst [vmem:[#allocation83_spill] sm:$0xff] %v3013_v48  ;;  %v3020_v30 = vsel %vm737_vm1, %v2252_v50, 0  ;;  %4100 = vst [vmem:[#allocation85_spill] sm:$0xff] %v3025_v0  ;;  %v3034_v50 = vcombine.high %v2264_v31, %v2264_v31 }
  0x62   :  { %865 = vmatpush1.bf16.msra.mxu0 %v2986_v47  ;;  %906 = vmatpush1.bf16.msra.mxu1 %v2990_v2  ;;  %4099 = vst [vmem:[#allocation84_spill] sm:$0xff] %v3020_v30 }
  0x63   :  { %866 = vmatprep.subr.bf16.mxu0 %v2992_v43  ;;  %907 = vmatprep.subr.bf16.mxu1 %v2995_v4 }
  0x66   :  { %867 = vmatpush1.bf16.msra.mxu0 %v3004_v1  ;;  %908 = vmatpush1.bf16.msra.mxu1 %v3008_v17 }
  0x67   :  { %2260 = vmatprep.subr.msk.bf16.mxu0 %vm737_vm1, %v3010_v49  ;;  %2262 = vmatprep.subr.msk.bf16.mxu1 %vm737_vm1, %v3013_v48 }
  0x6a   :  { %869 = vmatpush1.bf16.msra.mxu0 %v3020_v30  ;;  %910 = vmatpush1.bf16.msra.mxu1 %v3025_v0 }
  0x6b   :  { %1026 = vmatprep.subr.bf16.mxu0 %v2395_v3  ;;  %1067 = vmatprep.subr.bf16.mxu1 %v2408_v8 }
  0x6d   :  { %877 = vmatmul.mubr.bf16.vlgmr.msra.gmra.mrb[4].mxu0 %v2731_v15  ;;  %918 = vmatmul.mubr.bf16.vlgmr.msra.gmra.mrb[4].mxu1 %v2731_v15  ;;  %v4102_v15 = vld [vmem:[#allocation29_spill] sm:$0xff] }
  0x6e   :  { %1027 = vmatpush1.bf16.msra.mxu0 %v2400_v5  ;;  %1068 = vmatpush1.bf16.msra.mxu1 %v2410_v9 }
  0x6f   :  { %1028 = vmatprep.subr.bf16.mxu0 %v2412_v10  ;;  %1069 = vmatprep.subr.bf16.mxu1 %v2424_v14 }
  0x70   :  { %2268 = vmatprep.mubr.msk.bf16.mxu0 %vm733_vm0, %v3034_v50  ;;  %2270 = vmatprep.mubr.msk.bf16.mxu1 %vm733_vm0, %v3034_v50 }
  0x72   :  { %1029 = vmatpush1.bf16.msra.mxu0 %v2437_v18  ;;  %1070 = vmatpush1.bf16.msra.mxu1 %v2441_v19 }
  0x73   :  { %1030 = vmatprep.subr.bf16.mxu0 %v2443_v20  ;;  %1071 = vmatprep.subr.bf16.mxu1 %v2446_v21 }
  0x76   :  { %1031 = vmatpush1.bf16.msra.mxu0 %v2461_v26  ;;  %1072 = vmatpush1.bf16.msra.mxu1 %v2465_v27 }
  0x77   :  { %1032 = vmatprep.subr.bf16.mxu0 %v2467_v28  ;;  %1073 = vmatprep.subr.bf16.mxu1 %v2470_v29 }
  0x7a   :  { %1033 = vmatpush1.bf16.msra.mxu0 %v2485_v34  ;;  %1074 = vmatpush1.bf16.msra.mxu1 %v2489_v35 }
  0x7b   :  { %1034 = vmatprep.subr.bf16.mxu0 %v2491_v36  ;;  %1075 = vmatprep.subr.bf16.mxu1 %v2494_v37 }
  0x7e   :  { %1035 = vmatpush1.bf16.msra.mxu0 %v2509_v42  ;;  %1076 = vmatpush1.bf16.msra.mxu1 %v2518_v44 }
  0x7f   :  { %1036 = vmatprep.subr.bf16.mxu0 %v2520_v45  ;;  %1077 = vmatprep.subr.bf16.mxu1 %v2523_v46 }
  0x82   :  { %1037 = vmatpush1.bf16.msra.mxu0 %v2542_v52  ;;  %1078 = vmatpush1.bf16.msra.mxu1 %v2548_v53 }
  0x83   :  { %1038 = vmatprep.subr.bf16.mxu0 %v2550_v54  ;;  %1079 = vmatprep.subr.bf16.mxu1 %v2553_v55 }
  0x86   :  { %1039 = vmatpush1.bf16.msra.mxu0 %v2570_v60  ;;  %1080 = vmatpush1.bf16.msra.mxu1 %v2574_v61 }
  0x87   :  { %1040 = vmatprep.subr.bf16.mxu0 %v2576_v62  ;;  %1081 = vmatprep.subr.bf16.mxu1 %v2579_v63 }
  0x8a   :  { %1041 = vmatpush1.bf16.msra.mxu0 %v2594_v6  ;;  %1082 = vmatpush1.bf16.msra.mxu1 %v2598_v7 }
  0x8b   :  { %1042 = vmatprep.subr.bf16.mxu0 %v2600_v11  ;;  %1083 = vmatprep.subr.bf16.mxu1 %v2603_v12 }
  0x8e   :  { %1043 = vmatpush1.bf16.msra.mxu0 %v2618_v22  ;;  %1084 = vmatpush1.bf16.msra.mxu1 %v2622_v23 }
  0x8f   :  { %1044 = vmatprep.subr.bf16.mxu0 %v2624_v24  ;;  %1085 = vmatprep.subr.bf16.mxu1 %v2627_v25 }
  0x92   :  { %1045 = vmatpush1.bf16.msra.mxu0 %v2642_v38  ;;  %1086 = vmatpush1.bf16.msra.mxu1 %v2646_v39 }
  0x93   :  { %1046 = vmatprep.subr.bf16.mxu0 %v2648_v40  ;;  %1087 = vmatprep.subr.bf16.mxu1 %v2651_v41  ;;  %v3092_v40 = vcombine.low %v2264_v31, %v2264_v31  ;;  %v4106_v41 = vld [vmem:[#allocation33_spill] sm:$0xff]  ;;  %v4112_v31 = vld [vmem:[#allocation40_spill] sm:$0xff] }
  0x96   :  { %1047 = vmatpush1.bf16.msra.mxu0 %v2666_v56  ;;  %1088 = vmatpush1.bf16.msra.mxu1 %v2670_v57  ;;  %v4107_v56 = vld [vmem:[#allocation35_spill] sm:$0xff]  ;;  %v4108_v57 = vld [vmem:[#allocation34_spill] sm:$0xff] }
  0x97   :  { %1048 = vmatprep.subr.bf16.mxu0 %v2672_v58  ;;  %1089 = vmatprep.subr.bf16.mxu1 %v4101_v51  ;;  %v4109_v58 = vld [vmem:[#allocation36_spill] sm:$0xff] }
  0x9a   :  { %1049 = vmatpush1.bf16.msra.mxu0 %v4102_v15  ;;  %1090 = vmatpush1.bf16.msra.mxu1 %v4103_v32  ;;  %v4111_v32 = vld [vmem:[#allocation39_spill] sm:$0xff]  ;;  %v4122_v15 = vld [vmem:[#allocation50_spill] sm:$0xff] }
  0x9b   :  { %2267 = vmatprep.subr.msk.bf16.mxu0 %vm737_vm1, %v4104_v33  ;;  %2269 = vmatprep.subr.msk.bf16.mxu1 %vm737_vm1, %v4105_v16  ;;  %v4110_v33 = vld [vmem:[#allocation38_spill] sm:$0xff]  ;;  %v4121_v16 = vld [vmem:[#allocation49_spill] sm:$0xff] }
  0x9e   :  { %1051 = vmatpush1.bf16.msra.mxu0 %v4106_v41  ;;  %1092 = vmatpush1.bf16.msra.mxu1 %v4107_v56  ;;  %v4115_v56 = vld [vmem:[#allocation43_spill] sm:$0xff]  ;;  %v4116_v41 = vld [vmem:[#allocation44_spill] sm:$0xff] }
  0x9f   :  { %1108 = vmatprep.subr.bf16.mxu0 %v4108_v57  ;;  %1149 = vmatprep.subr.bf16.mxu1 %v4109_v58  ;;  %v4113_v57 = vld [vmem:[#allocation41_spill] sm:$0xff]  ;;  %v4114_v58 = vld [vmem:[#allocation42_spill] sm:$0xff] }
  0xa1   :  { %1059 = vmatmul.mubr.bf16.vlgmr.msra.gmra.mrb[8].mxu0 %v3092_v40  ;;  %1100 = vmatmul.mubr.bf16.vlgmr.msra.gmra.mrb[8].mxu1 %v3092_v40 }
  0xa2   :  { %1109 = vmatpush1.bf16.msra.mxu0 %v2740_v13  ;;  %1150 = vmatpush1.bf16.msra.mxu1 %v4110_v33  ;;  %v4117_v13 = vld [vmem:[#allocation45_spill] sm:$0xff]  ;;  %v4118_v33 = vld [vmem:[#allocation46_spill] sm:$0xff] }
  0xa3   :  { %1110 = vmatprep.subr.bf16.mxu0 %v4111_v32  ;;  %1151 = vmatprep.subr.bf16.mxu1 %v4112_v31  ;;  %v4119_v32 = vld [vmem:[#allocation47_spill] sm:$0xff]  ;;  %v4120_v31 = vld [vmem:[#allocation48_spill] sm:$0xff] }
  0xa4   :  { %2272 = vmatprep.mubr.msk.bf16.mxu0 %vm733_vm0, %v3034_v50  ;;  %2274 = vmatprep.mubr.msk.bf16.mxu1 %vm733_vm0, %v3034_v50  ;;  %v4123_v50 = vld [vmem:[#allocation51_spill] sm:$0xff] }
  0xa6   :  { %1111 = vmatpush1.bf16.msra.mxu0 %v4113_v57  ;;  %1152 = vmatpush1.bf16.msra.mxu1 %v4114_v58  ;;  %v4124_v57 = vld [vmem:[#allocation52_spill] sm:$0xff]  ;;  %v4125_v58 = vld [vmem:[#allocation53_spill] sm:$0xff] }
  0xa7   :  { %1112 = vmatprep.subr.bf16.mxu0 %v4115_v56  ;;  %1153 = vmatprep.subr.bf16.mxu1 %v4116_v41  ;;  %v4126_v56 = vld [vmem:[#allocation54_spill] sm:$0xff]  ;;  %v4127_v41 = vld [vmem:[#allocation55_spill] sm:$0xff] }
  0xaa   :  { %1113 = vmatpush1.bf16.msra.mxu0 %v4117_v13  ;;  %1154 = vmatpush1.bf16.msra.mxu1 %v4118_v33  ;;  %v4128_v13 = vld [vmem:[#allocation56_spill] sm:$0xff]  ;;  %v4129_v33 = vld [vmem:[#allocation57_spill] sm:$0xff] }
  0xab   :  { %1114 = vmatprep.subr.bf16.mxu0 %v4119_v32  ;;  %1155 = vmatprep.subr.bf16.mxu1 %v4120_v31  ;;  %v4130_v32 = vld [vmem:[#allocation58_spill] sm:$0xff]  ;;  %v4131_v31 = vld [vmem:[#allocation59_spill] sm:$0xff] }
  0xae   :  { %1115 = vmatpush1.bf16.msra.mxu0 %v4121_v16  ;;  %1156 = vmatpush1.bf16.msra.mxu1 %v4122_v15  ;;  %v4132_v16 = vld [vmem:[#allocation60_spill] sm:$0xff]  ;;  %v4133_v15 = vld [vmem:[#allocation61_spill] sm:$0xff] }
  0xaf   :  { %1116 = vmatprep.subr.bf16.mxu0 %v4123_v50  ;;  %1157 = vmatprep.subr.bf16.mxu1 %v4124_v57  ;;  %v4134_v50 = vld [vmem:[#allocation62_spill] sm:$0xff]  ;;  %v4135_v57 = vld [vmem:[#allocation63_spill] sm:$0xff] }
  0xb2   :  { %1117 = vmatpush1.bf16.msra.mxu0 %v4125_v58  ;;  %1158 = vmatpush1.bf16.msra.mxu1 %v4126_v56  ;;  %v4136_v58 = vld [vmem:[#allocation64_spill] sm:$0xff]  ;;  %v4137_v56 = vld [vmem:[#allocation65_spill] sm:$0xff] }
  0xb3   :  { %1118 = vmatprep.subr.bf16.mxu0 %v4127_v41  ;;  %1159 = vmatprep.subr.bf16.mxu1 %v4128_v13  ;;  %v4138_v41 = vld [vmem:[#allocation66_spill] sm:$0xff]  ;;  %v4139_v13 = vld [vmem:[#allocation67_spill] sm:$0xff] }
  0xb6   :  { %1119 = vmatpush1.bf16.msra.mxu0 %v4129_v33  ;;  %1160 = vmatpush1.bf16.msra.mxu1 %v4130_v32  ;;  %v4140_v33 = vld [vmem:[#allocation68_spill] sm:$0xff]  ;;  %v4141_v32 = vld [vmem:[#allocation69_spill] sm:$0xff] }
  0xb7   :  { %1120 = vmatprep.subr.bf16.mxu0 %v4131_v31  ;;  %1161 = vmatprep.subr.bf16.mxu1 %v4132_v16  ;;  %v4142_v31 = vld [vmem:[#allocation70_spill] sm:$0xff]  ;;  %v4143_v16 = vld [vmem:[#allocation71_spill] sm:$0xff] }
  0xba   :  { %1121 = vmatpush1.bf16.msra.mxu0 %v4133_v15  ;;  %1162 = vmatpush1.bf16.msra.mxu1 %v4134_v50  ;;  %v4144_v15 = vld [vmem:[#allocation72_spill] sm:$0xff] }
  0xbb   :  { %1122 = vmatprep.subr.bf16.mxu0 %v4135_v57  ;;  %1163 = vmatprep.subr.bf16.mxu1 %v4136_v58  ;;  %v4145_v57 = vld [vmem:[#allocation73_spill] sm:$0xff]  ;;  %v4146_v58 = vld [vmem:[#allocation74_spill] sm:$0xff] }
  0xbe   :  { %1123 = vmatpush1.bf16.msra.mxu0 %v4137_v56  ;;  %1164 = vmatpush1.bf16.msra.mxu1 %v4138_v41  ;;  %v4147_v56 = vld [vmem:[#allocation75_spill] sm:$0xff] }
  0xbf   :  { %1124 = vmatprep.subr.bf16.mxu0 %v4139_v13  ;;  %1165 = vmatprep.subr.bf16.mxu1 %v4140_v33 }
  0xc2   :  { %1125 = vmatpush1.bf16.msra.mxu0 %v4141_v32  ;;  %1166 = vmatpush1.bf16.msra.mxu1 %v4142_v31 }
  0xc3   :  { %1126 = vmatprep.subr.bf16.mxu0 %v4143_v16  ;;  %1167 = vmatprep.subr.bf16.mxu1 %v4144_v15 }
  0xc6   :  { %1127 = vmatpush1.bf16.msra.mxu0 %v2962_v59  ;;  %1168 = vmatpush1.bf16.msra.mxu1 %v4145_v57 }
  0xc7   :  { %1128 = vmatprep.subr.bf16.mxu0 %v4146_v58  ;;  %1169 = vmatprep.subr.bf16.mxu1 %v4147_v56 }
  0xca   :  { %1129 = vmatpush1.bf16.msra.mxu0 %v2986_v47  ;;  %1170 = vmatpush1.bf16.msra.mxu1 %v2990_v2  ;;  %v2275_v47 = vld [vmem:[%s3859_s1 + $0x10] sm:$0xff] }
  0xcb   :  { %1130 = vmatprep.subr.bf16.mxu0 %v2992_v43  ;;  %1171 = vmatprep.subr.bf16.mxu1 %v2995_v4 }
  0xce   :  { %1131 = vmatpush1.bf16.msra.mxu0 %v3004_v1  ;;  %1172 = vmatpush1.bf16.msra.mxu1 %v3008_v17  ;;  %v3161_v1 = vcombine.high %v2275_v47, %v2275_v47 }
  0xcf   :  { %2271 = vmatprep.subr.msk.bf16.mxu0 %vm737_vm1, %v3010_v49  ;;  %2273 = vmatprep.subr.msk.bf16.mxu1 %vm737_vm1, %v3013_v48 }
  0xd2   :  { %1133 = vmatpush1.bf16.msra.mxu0 %v3020_v30  ;;  %1174 = vmatpush1.bf16.msra.mxu1 %v3025_v0 }
  0xd3   :  { %1290 = vmatprep.subr.bf16.mxu0 %v2395_v3  ;;  %1331 = vmatprep.subr.bf16.mxu1 %v2408_v8 }
  0xd5   :  { %1141 = vmatmul.mubr.bf16.vlgmr.msra.gmra.mrb[12].mxu0 %v3092_v40  ;;  %1182 = vmatmul.mubr.bf16.vlgmr.msra.gmra.mrb[12].mxu1 %v3092_v40  ;;  %v4148_v40 = vld [vmem:[#allocation23_spill] sm:$0xff] }
  0xd6   :  { %1291 = vmatpush1.bf16.msra.mxu0 %v2400_v5  ;;  %1332 = vmatpush1.bf16.msra.mxu1 %v2410_v9 }
  0xd7   :  { %1292 = vmatprep.subr.bf16.mxu0 %v2412_v10  ;;  %1333 = vmatprep.subr.bf16.mxu1 %v2424_v14 }
  0xd8   :  { %2279 = vmatprep.mubr.msk.bf16.mxu0 %vm733_vm0, %v3161_v1  ;;  %2281 = vmatprep.mubr.msk.bf16.mxu1 %vm733_vm0, %v3161_v1 }
  0xda   :  { %1293 = vmatpush1.bf16.msra.mxu0 %v2437_v18  ;;  %1334 = vmatpush1.bf16.msra.mxu1 %v2441_v19 }
  0xdb   :  { %1294 = vmatprep.subr.bf16.mxu0 %v2443_v20  ;;  %1335 = vmatprep.subr.bf16.mxu1 %v2446_v21 }
  0xde   :  { %1295 = vmatpush1.bf16.msra.mxu0 %v2461_v26  ;;  %1336 = vmatpush1.bf16.msra.mxu1 %v2465_v27 }
  0xdf   :  { %1296 = vmatprep.subr.bf16.mxu0 %v2467_v28  ;;  %1337 = vmatprep.subr.bf16.mxu1 %v2470_v29 }
  0xe2   :  { %1297 = vmatpush1.bf16.msra.mxu0 %v2485_v34  ;;  %1338 = vmatpush1.bf16.msra.mxu1 %v2489_v35 }
  0xe3   :  { %1298 = vmatprep.subr.bf16.mxu0 %v2491_v36  ;;  %1339 = vmatprep.subr.bf16.mxu1 %v2494_v37 }
  0xe6   :  { %1299 = vmatpush1.bf16.msra.mxu0 %v2509_v42  ;;  %1340 = vmatpush1.bf16.msra.mxu1 %v2518_v44 }
  0xe7   :  { %1300 = vmatprep.subr.bf16.mxu0 %v2520_v45  ;;  %1341 = vmatprep.subr.bf16.mxu1 %v2523_v46 }
  0xea   :  { %1301 = vmatpush1.bf16.msra.mxu0 %v2542_v52  ;;  %1342 = vmatpush1.bf16.msra.mxu1 %v2548_v53 }
  0xeb   :  { %1302 = vmatprep.subr.bf16.mxu0 %v2550_v54  ;;  %1343 = vmatprep.subr.bf16.mxu1 %v2553_v55 }
  0xee   :  { %1303 = vmatpush1.bf16.msra.mxu0 %v2570_v60  ;;  %1344 = vmatpush1.bf16.msra.mxu1 %v2574_v61 }
  0xef   :  { %1304 = vmatprep.subr.bf16.mxu0 %v2576_v62  ;;  %1345 = vmatprep.subr.bf16.mxu1 %v2579_v63  ;;  %v4170_v63 = vld [vmem:[#allocation46_spill] sm:$0xff] }
  0xf2   :  { %1305 = vmatpush1.bf16.msra.mxu0 %v2594_v6  ;;  %1346 = vmatpush1.bf16.msra.mxu1 %v2598_v7  ;;  %v4149_v6 = vld [vmem:[#allocation24_spill] sm:$0xff]  ;;  %v4150_v7 = vld [vmem:[#allocation25_spill] sm:$0xff] }
  0xf3   :  { %1306 = vmatprep.subr.bf16.mxu0 %v2600_v11  ;;  %1347 = vmatprep.subr.bf16.mxu1 %v2603_v12  ;;  %v4151_v11 = vld [vmem:[#allocation26_spill] sm:$0xff]  ;;  %v4152_v12 = vld [vmem:[#allocation27_spill] sm:$0xff] }
  0xf6   :  { %1307 = vmatpush1.bf16.msra.mxu0 %v2618_v22  ;;  %1348 = vmatpush1.bf16.msra.mxu1 %v2622_v23  ;;  %v4153_v23 = vld [vmem:[#allocation29_spill] sm:$0xff] }
  0xf7   :  { %1308 = vmatprep.subr.bf16.mxu0 %v2624_v24  ;;  %1349 = vmatprep.subr.bf16.mxu1 %v2627_v25  ;;  %v4154_v24 = vld [vmem:[#allocation30_spill] sm:$0xff]  ;;  %v4155_v25 = vld [vmem:[#allocation31_spill] sm:$0xff] }
  0xfa   :  { %1309 = vmatpush1.bf16.msra.mxu0 %v2642_v38  ;;  %1350 = vmatpush1.bf16.msra.mxu1 %v2646_v39  ;;  %v4156_v39 = vld [vmem:[#allocation32_spill] sm:$0xff] }
  0xfb   :  { %1310 = vmatprep.subr.bf16.mxu0 %v4148_v40  ;;  %1351 = vmatprep.subr.bf16.mxu1 %v4149_v6  ;;  %v3219_v40 = vcombine.low %v2275_v47, %v2275_v47  ;;  %v4157_v6 = vld [vmem:[#allocation33_spill] sm:$0xff]  ;;  %v4168_v38 = vld [vmem:[#allocation44_spill] sm:$0xff] }
  0xfe   :  { %1311 = vmatpush1.bf16.msra.mxu0 %v4150_v7  ;;  %1352 = vmatpush1.bf16.msra.mxu1 %v4151_v11  ;;  %v4158_v7 = vld [vmem:[#allocation35_spill] sm:$0xff]  ;;  %v4159_v11 = vld [vmem:[#allocation34_spill] sm:$0xff] }
  0xff   :  { %1312 = vmatprep.subr.bf16.mxu0 %v4152_v12  ;;  %1353 = vmatprep.subr.bf16.mxu1 %v4101_v51  ;;  %v4160_v12 = vld [vmem:[#allocation36_spill] sm:$0xff]  ;;  %v4167_v51 = vld [vmem:[#allocation43_spill] sm:$0xff] }
 0x102   :  { %1313 = vmatpush1.bf16.msra.mxu0 %v4153_v23  ;;  %1354 = vmatpush1.bf16.msra.mxu1 %v4154_v24  ;;  %v4161_v24 = vld [vmem:[#allocation37_spill] sm:$0xff]  ;;  %v4163_v23 = vld [vmem:[#allocation39_spill] sm:$0xff] }
 0x103   :  { %2278 = vmatprep.subr.msk.bf16.mxu0 %vm737_vm1, %v4155_v25  ;;  %2280 = vmatprep.subr.msk.bf16.mxu1 %vm737_vm1, %v4156_v39  ;;  %v4162_v25 = vld [vmem:[#allocation38_spill] sm:$0xff]  ;;  %v4164_v39 = vld [vmem:[#allocation40_spill] sm:$0xff] }
 0x106   :  { %1315 = vmatpush1.bf16.msra.mxu0 %v4157_v6  ;;  %1356 = vmatpush1.bf16.msra.mxu1 %v4158_v7  ;;  %v4166_v6 = vld [vmem:[#allocation42_spill] sm:$0xff] }
 0x107   :  { %1372 = vmatprep.subr.bf16.mxu0 %v4159_v11  ;;  %1413 = vmatprep.subr.bf16.mxu1 %v4160_v12 }
 0x109   :  { %1323 = vmatmul.mubr.bf16.vlgmr.msra.gmra.mrb[16].mxu0 %v3219_v40  ;;  %1364 = vmatmul.mubr.bf16.vlgmr.msra.gmra.mrb[16].mxu1 %v3219_v40 }
 0x10a   :  { %1373 = vmatpush1.bf16.msra.mxu0 %v4161_v24  ;;  %1414 = vmatpush1.bf16.msra.mxu1 %v4162_v25  ;;  %v4165_v24 = vld [vmem:[#allocation41_spill] sm:$0xff] }
 0x10b   :  { %1374 = vmatprep.subr.bf16.mxu0 %v4163_v23  ;;  %1415 = vmatprep.subr.bf16.mxu1 %v4164_v39 }
 0x10c   :  { %v796_v47 = vpop.f32.mrb[0].mxu0  ;;  %2283 = vmatprep.mubr.msk.bf16.mxu0 %vm733_vm0, %v3161_v1  ;;  %v837_v11 = vpop.f32.mrb[0].mxu1  ;;  %2285 = vmatprep.mubr.msk.bf16.mxu1 %vm733_vm0, %v3161_v1  ;;  %v4171_v1 = vld [vmem:[#allocation47_spill] sm:$0xff] }
 0x10d   :  { %934 = vrot.lane.b32.xlu0 %v796_v47, %s2360_s28  ;;  %v798_v12 = vpop.f32.mrb[1].mxu0  ;;  %v839_v25 = vpop.f32.mrb[1].mxu1  ;;  %v4169_v47 = vld [vmem:[#allocation45_spill] sm:$0xff] }
 0x10e   :  { %v800_v7 = vpop.f32.mrb[2].mxu0  ;;  %1375 = vmatpush1.bf16.msra.mxu0 %v4165_v24  ;;  %1416 = vmatpush1.bf16.msra.mxu1 %v4166_v6  ;;  %v841_v39 = vpop.f32.mrb[2].mxu1  ;;  %v4173_v6 = vld [vmem:[#allocation49_spill] sm:$0xff] }
 0x10f   :  { %v801_v23 = vpop.f32.mrb[3].mxu0  ;;  %1376 = vmatprep.subr.bf16.mxu0 %v4167_v51  ;;  %1417 = vmatprep.subr.bf16.mxu1 %v4168_v38  ;;  %v842_v22 = vpop.f32.mrb[3].mxu1  ;;  %v4172_v7 = vld [vmem:[#allocation48_spill] sm:$0xff]  ;;  %v4175_v39 = vld [vmem:[#allocation51_spill] sm:$0xff] }
 0x110   :  { %v4174_v23 = vld [vmem:[#allocation50_spill] sm:$0xff]  ;;  %v4176_v38 = vld [vmem:[#allocation52_spill] sm:$0xff] }
 0x111   :  { %938 = vrot.lane.b32.xlu0 %v837_v11, %s2360_s28  ;;  %v4177_v11 = vld [vmem:[#allocation53_spill] sm:$0xff]  ;;  %v4178_v22 = vld [vmem:[#allocation54_spill] sm:$0xff] }
 0x112   :  { %1377 = vmatpush1.bf16.msra.mxu0 %v4169_v47  ;;  %1418 = vmatpush1.bf16.msra.mxu1 %v4170_v63  ;;  %v4179_v63 = vld [vmem:[#allocation55_spill] sm:$0xff] }
 0x113   :  { %1378 = vmatprep.subr.bf16.mxu0 %v4171_v1  ;;  %1419 = vmatprep.subr.bf16.mxu1 %v4172_v7  ;;  %v4180_v1 = vld [vmem:[#allocation56_spill] sm:$0xff]  ;;  %v4181_v7 = vld [vmem:[#allocation57_spill] sm:$0xff] }
 0x115   :  { %936 = vrot.lane.b32.xlu0 %v798_v12, %s2360_s28  ;;  %v4182_v12 = vld [vmem:[#allocation58_spill] sm:$0xff] }
 0x116   :  { %1379 = vmatpush1.bf16.msra.mxu0 %v4173_v6  ;;  %1420 = vmatpush1.bf16.msra.mxu1 %v4174_v23  ;;  %v4183_v6 = vld [vmem:[#allocation59_spill] sm:$0xff]  ;;  %v4184_v23 = vld [vmem:[#allocation60_spill] sm:$0xff] }
 0x117   :  { %1380 = vmatprep.subr.bf16.mxu0 %v4175_v39  ;;  %1421 = vmatprep.subr.bf16.mxu1 %v4176_v38  ;;  %v4185_v39 = vld [vmem:[#allocation61_spill] sm:$0xff] }
 0x119   :  { %940 = vrot.lane.b32.xlu0 %v839_v25, %s2360_s28  ;;  %v4186_v25 = vld [vmem:[#allocation63_spill] sm:$0xff] }
 0x11a   :  { %1381 = vmatpush1.bf16.msra.mxu0 %v4177_v11  ;;  %1422 = vmatpush1.bf16.msra.mxu1 %v4178_v22  ;;  %v4187_v11 = vld [vmem:[#allocation64_spill] sm:$0xff]  ;;  %v4188_v22 = vld [vmem:[#allocation65_spill] sm:$0xff] }
 0x11b   :  { %1382 = vmatprep.subr.bf16.mxu0 %v4179_v63  ;;  %1423 = vmatprep.subr.bf16.mxu1 %v4180_v1 }
 0x11e   :  { %1383 = vmatpush1.bf16.msra.mxu0 %v4181_v7  ;;  %1424 = vmatpush1.bf16.msra.mxu1 %v4182_v12 }
 0x11f   :  { %1384 = vmatprep.subr.bf16.mxu0 %v4183_v6  ;;  %1425 = vmatprep.subr.bf16.mxu1 %v4184_v23 }
 0x122   :  { %1385 = vmatpush1.bf16.msra.mxu0 %v4185_v39  ;;  %1426 = vmatpush1.bf16.msra.mxu1 %v4134_v50 }
 0x123   :  { %1386 = vmatprep.subr.bf16.mxu0 %v4186_v25  ;;  %1427 = vmatprep.subr.bf16.mxu1 %v4187_v11 }
 0x126   :  { %1387 = vmatpush1.bf16.msra.mxu0 %v4188_v22  ;;  %1428 = vmatpush1.bf16.msra.mxu1 %v4138_v41  ;;  %v4189_v41 = vld [vmem:[#allocation76_spill] sm:$0xff] }
 0x127   :  { %1388 = vmatprep.subr.bf16.mxu0 %v4139_v13  ;;  %1429 = vmatprep.subr.bf16.mxu1 %v4140_v33 }
 0x12a   :  { %1389 = vmatpush1.bf16.msra.mxu0 %v4141_v32  ;;  %1430 = vmatpush1.bf16.msra.mxu1 %v4142_v31  ;;  %v4190_v31 = vld [vmem:[#allocation80_spill] sm:$0xff] }
 0x12b   :  { %1390 = vmatprep.subr.bf16.mxu0 %v4143_v16  ;;  %1431 = vmatprep.subr.bf16.mxu1 %v4144_v15 }
 0x12e   :  { %1391 = vmatpush1.bf16.msra.mxu0 %v2962_v59  ;;  %1432 = vmatpush1.bf16.msra.mxu1 %v4145_v57 }
 0x12f   :  { %1392 = vmatprep.subr.bf16.mxu0 %v4146_v58  ;;  %1433 = vmatprep.subr.bf16.mxu1 %v4147_v56 }
 0x132   :  { %1393 = vmatpush1.bf16.msra.mxu0 %v4189_v41  ;;  %1434 = vmatpush1.bf16.msra.mxu1 %v2990_v2  ;;  %v3288_v41 = vld [vmem:[%s3859_s1 + $0x18] sm:$0xff] }
 0x133   :  { %1394 = vmatprep.subr.bf16.mxu0 %v2992_v43  ;;  %1435 = vmatprep.subr.bf16.mxu1 %v2995_v4 }
 0x136   :  { %1395 = vmatpush1.bf16.msra.mxu0 %v4190_v31  ;;  %1436 = vmatpush1.bf16.msra.mxu1 %v3008_v17  ;;  %v3296_v17 = vcombine.high %v3288_v41, %v3288_v41 }
 0x137   :  { %2282 = vmatprep.subr.msk.bf16.mxu0 %vm737_vm1, %v3010_v49  ;;  %2284 = vmatprep.subr.msk.bf16.mxu1 %vm737_vm1, %v3013_v48 }
 0x13a   :  { %1397 = vmatpush1.bf16.msra.mxu0 %v3020_v30  ;;  %1438 = vmatpush1.bf16.msra.mxu1 %v3025_v0 }
 0x13b   :  { %1473 = vmatprep.subr.bf16.mxu0 %v2395_v3  ;;  %1514 = vmatprep.subr.bf16.mxu1 %v2408_v8 }
 0x13d   :  { %1405 = vmatmul.mubr.bf16.vlgmr.msra.gmra.mrb[20].mxu0 %v3219_v40  ;;  %1446 = vmatmul.mubr.bf16.vlgmr.msra.gmra.mrb[20].mxu1 %v3219_v40 }
 0x13e   :  { %1474 = vmatpush1.bf16.msra.mxu0 %v2400_v5  ;;  %1515 = vmatpush1.bf16.msra.mxu1 %v2410_v9 }
 0x13f   :  { %1475 = vmatprep.subr.bf16.mxu0 %v2412_v10  ;;  %1516 = vmatprep.subr.bf16.mxu1 %v2424_v14 }
 0x140   :  { %v878_v30 = vpop.f32.mrb[4].mxu0  ;;  %2290 = vmatprep.mubr.msk.bf16.mxu0 %vm733_vm0, %v3296_v17  ;;  %v919_v3 = vpop.f32.mrb[4].mxu1  ;;  %2292 = vmatprep.mubr.msk.bf16.mxu1 %vm733_vm0, %v3296_v17 }
 0x141   :  { %942 = vrot.lane.b32.xlu1 %v878_v30, %s2360_s28  ;;  %v880_v8 = vpop.f32.mrb[5].mxu0  ;;  %v921_v5 = vpop.f32.mrb[5].mxu1  ;;  %v4197_v30 = vld [vmem:[#allocation18_spill] sm:$0xff] }
 0x142   :  { %v882_v40 = vpop.f32.mrb[6].mxu0  ;;  %1476 = vmatpush1.bf16.msra.mxu0 %v2437_v18  ;;  %1517 = vmatpush1.bf16.msra.mxu1 %v2441_v19  ;;  %v923_v14 = vpop.f32.mrb[6].mxu1 }
 0x143   :  { %v883_v10 = vpop.f32.mrb[7].mxu0  ;;  %1477 = vmatprep.subr.bf16.mxu0 %v2443_v20  ;;  %1518 = vmatprep.subr.bf16.mxu1 %v2446_v21  ;;  %v924_v9 = vpop.f32.mrb[7].mxu1  ;;  %v4196_v14 = vld [vmem:[#allocation17_spill] sm:$0xff]  ;;  %v4198_v40 = vld [vmem:[#allocation19_spill] sm:$0xff] }
 0x144   :  { %v4194_v9 = vld [vmem:[#allocation15_spill] sm:$0xff]  ;;  %v4195_v10 = vld [vmem:[#allocation16_spill] sm:$0xff] }
 0x145   :  { %946 = vrot.lane.b32.xlu1 %v919_v3, %s2360_s28  ;;  %v4191_v3 = vld [vmem:[#allocation12_spill] sm:$0xff] }
 0x146   :  { %1478 = vmatpush1.bf16.msra.mxu0 %v2461_v26  ;;  %1519 = vmatpush1.bf16.msra.mxu1 %v2465_v27 }
 0x147   :  { %1479 = vmatprep.subr.bf16.mxu0 %v2467_v28  ;;  %1520 = vmatprep.subr.bf16.mxu1 %v2470_v29 }
 0x149   :  { %944 = vrot.lane.b32.xlu1 %v880_v8, %s2360_s28  ;;  %v4193_v8 = vld [vmem:[#allocation14_spill] sm:$0xff] }
 0x14a   :  { %1480 = vmatpush1.bf16.msra.mxu0 %v2485_v34  ;;  %1521 = vmatpush1.bf16.msra.mxu1 %v2489_v35 }
 0x14b   :  { %1481 = vmatprep.subr.bf16.mxu0 %v2491_v36  ;;  %1522 = vmatprep.subr.bf16.mxu1 %v2494_v37 }
 0x14d   :  { %948 = vrot.lane.b32.xlu1 %v921_v5, %s2360_s28  ;;  %v4192_v5 = vld [vmem:[#allocation13_spill] sm:$0xff] }
 0x14e   :  { %1482 = vmatpush1.bf16.msra.mxu0 %v2509_v42  ;;  %1523 = vmatpush1.bf16.msra.mxu1 %v2518_v44 }
 0x14f   :  { %1483 = vmatprep.subr.bf16.mxu0 %v2520_v45  ;;  %1524 = vmatprep.subr.bf16.mxu1 %v2523_v46 }
 0x152   :  { %1484 = vmatpush1.bf16.msra.mxu0 %v2542_v52  ;;  %1525 = vmatpush1.bf16.msra.mxu1 %v2548_v53 }
 0x153   :  { %1485 = vmatprep.subr.bf16.mxu0 %v2550_v54  ;;  %1526 = vmatprep.subr.bf16.mxu1 %v2553_v55 }
 0x156   :  { %1486 = vmatpush1.bf16.msra.mxu0 %v2570_v60  ;;  %1527 = vmatpush1.bf16.msra.mxu1 %v2574_v61  ;;  %v4199_v60 = vld [vmem:[#allocation20_spill] sm:$0xff]  ;;  %v4200_v61 = vld [vmem:[#allocation21_spill] sm:$0xff] }
 0x157   :  { %1487 = vmatprep.subr.bf16.mxu0 %v2576_v62  ;;  %1528 = vmatprep.subr.bf16.mxu1 %v4191_v3  ;;  %v4201_v62 = vld [vmem:[#allocation22_spill] sm:$0xff]  ;;  %v4202_v3 = vld [vmem:[#allocation23_spill] sm:$0xff] }
 0x15a   :  { %1488 = vmatpush1.bf16.msra.mxu0 %v4192_v5  ;;  %1529 = vmatpush1.bf16.msra.mxu1 %v4193_v8  ;;  %v4203_v5 = vld [vmem:[#allocation24_spill] sm:$0xff]  ;;  %v4204_v8 = vld [vmem:[#allocation25_spill] sm:$0xff] }
 0x15b   :  { %1489 = vmatprep.subr.bf16.mxu0 %v4194_v9  ;;  %1530 = vmatprep.subr.bf16.mxu1 %v4195_v10  ;;  %v4205_v9 = vld [vmem:[#allocation26_spill] sm:$0xff]  ;;  %v4206_v10 = vld [vmem:[#allocation27_spill] sm:$0xff] }
 0x15e   :  { %1490 = vmatpush1.bf16.msra.mxu0 %v4196_v14  ;;  %1531 = vmatpush1.bf16.msra.mxu1 %v4197_v30  ;;  %v4207_v14 = vld [vmem:[#allocation28_spill] sm:$0xff]  ;;  %v4208_v30 = vld [vmem:[#allocation29_spill] sm:$0xff] }
 0x15f   :  { %1491 = vmatprep.subr.bf16.mxu0 %v4198_v40  ;;  %1532 = vmatprep.subr.bf16.mxu1 %v4199_v60  ;;  %v4209_v40 = vld [vmem:[#allocation30_spill] sm:$0xff]  ;;  %v4210_v60 = vld [vmem:[#allocation31_spill] sm:$0xff] }
 0x162   :  { %1492 = vmatpush1.bf16.msra.mxu0 %v4200_v61  ;;  %1533 = vmatpush1.bf16.msra.mxu1 %v4201_v62  ;;  %v4211_v62 = vld [vmem:[#allocation32_spill] sm:$0xff] }
 0x163   :  { %1493 = vmatprep.subr.bf16.mxu0 %v4202_v3  ;;  %1534 = vmatprep.subr.bf16.mxu1 %v4203_v5  ;;  %v3360_v5 = vcombine.low %v3288_v41, %v3288_v41 }
 0x166   :  { %1494 = vmatpush1.bf16.msra.mxu0 %v4204_v8  ;;  %1535 = vmatpush1.bf16.msra.mxu1 %v4205_v9  ;;  %v4212_v8 = vld [vmem:[#allocation33_spill] sm:$0xff]  ;;  %v4213_v9 = vld [vmem:[#allocation35_spill] sm:$0xff] }
 0x167   :  { %1495 = vmatprep.subr.bf16.mxu0 %v4206_v10  ;;  %1536 = vmatprep.subr.bf16.mxu1 %v4207_v14  ;;  %v4214_v10 = vld [vmem:[#allocation34_spill] sm:$0xff]  ;;  %v4215_v14 = vld [vmem:[#allocation36_spill] sm:$0xff] }
 0x16a   :  { %1496 = vmatpush1.bf16.msra.mxu0 %v4208_v30  ;;  %1537 = vmatpush1.bf16.msra.mxu1 %v4209_v40  ;;  %v4217_v40 = vld [vmem:[#allocation38_spill] sm:$0xff]  ;;  %v4219_v30 = vld [vmem:[#allocation40_spill] sm:$0xff] }
 0x16b   :  { %2289 = vmatprep.subr.msk.bf16.mxu0 %vm737_vm1, %v4210_v60  ;;  %2291 = vmatprep.subr.msk.bf16.mxu1 %vm737_vm1, %v4211_v62  ;;  %v4216_v60 = vld [vmem:[#allocation37_spill] sm:$0xff]  ;;  %v4218_v62 = vld [vmem:[#allocation39_spill] sm:$0xff] }
 0x16e   :  { %1498 = vmatpush1.bf16.msra.mxu0 %v4212_v8  ;;  %1539 = vmatpush1.bf16.msra.mxu1 %v4213_v9  ;;  %v4221_v8 = vld [vmem:[#allocation44_spill] sm:$0xff] }
 0x16f   :  { %1555 = vmatprep.subr.bf16.mxu0 %v4214_v10  ;;  %1596 = vmatprep.subr.bf16.mxu1 %v4215_v14 }
 0x171   :  { %1506 = vmatmul.mubr.bf16.vlgmr.msra.gmra.mrb[24].mxu0 %v3360_v5  ;;  %1547 = vmatmul.mubr.bf16.vlgmr.msra.gmra.mrb[24].mxu1 %v3360_v5 }
 0x172   :  { %1556 = vmatpush1.bf16.msra.mxu0 %v4216_v60  ;;  %1597 = vmatpush1.bf16.msra.mxu1 %v4217_v40  ;;  %v4220_v60 = vld [vmem:[#allocation42_spill] sm:$0xff] }
 0x173   :  { %1557 = vmatprep.subr.bf16.mxu0 %v4218_v62  ;;  %1598 = vmatprep.subr.bf16.mxu1 %v4219_v30 }
 0x174   :  { %v1060_v41 = vpop.f32.mrb[8].mxu0  ;;  %2294 = vmatprep.mubr.msk.bf16.mxu0 %vm733_vm0, %v3296_v17  ;;  %v1101_v10 = vpop.f32.mrb[8].mxu1  ;;  %2296 = vmatprep.mubr.msk.bf16.mxu1 %vm733_vm0, %v3296_v17  ;;  %v4223_v17 = vld [vmem:[#allocation47_spill] sm:$0xff] }
 0x175   :  { %1198 = vrot.lane.b32.xlu1 %v1060_v41, %s2361_s4  ;;  %v1062_v14 = vpop.f32.mrb[9].mxu0  ;;  %v1103_v40 = vpop.f32.mrb[9].mxu1  ;;  %v4222_v41 = vld [vmem:[#allocation46_spill] sm:$0xff] }
 0x176   :  { %v1064_v9 = vpop.f32.mrb[10].mxu0  ;;  %1558 = vmatpush1.bf16.msra.mxu0 %v4165_v24  ;;  %1599 = vmatpush1.bf16.msra.mxu1 %v4220_v60  ;;  %v1105_v30 = vpop.f32.mrb[10].mxu1  ;;  %v4225_v60 = vld [vmem:[#allocation49_spill] sm:$0xff] }
 0x177   :  { %v1065_v62 = vpop.f32.mrb[11].mxu0  ;;  %1559 = vmatprep.subr.bf16.mxu0 %v4167_v51  ;;  %1600 = vmatprep.subr.bf16.mxu1 %v4221_v8  ;;  %v1106_v3 = vpop.f32.mrb[11].mxu1  ;;  %v4224_v9 = vld [vmem:[#allocation48_spill] sm:$0xff]  ;;  %v4227_v30 = vld [vmem:[#allocation51_spill] sm:$0xff] }
 0x178   :  { %v4226_v62 = vld [vmem:[#allocation50_spill] sm:$0xff]  ;;  %v4228_v3 = vld [vmem:[#allocation53_spill] sm:$0xff] }
 0x179   :  { %1202 = vrot.lane.b32.xlu1 %v1101_v10, %s2361_s4  ;;  %v4229_v10 = vld [vmem:[#allocation54_spill] sm:$0xff] }
 0x17a   :  { %1560 = vmatpush1.bf16.msra.mxu0 %v4169_v47  ;;  %1601 = vmatpush1.bf16.msra.mxu1 %v4222_v41 }
 0x17b   :  { %1561 = vmatprep.subr.bf16.mxu0 %v4223_v17  ;;  %1602 = vmatprep.subr.bf16.mxu1 %v4224_v9 }
 0x17d   :  { %1200 = vrot.lane.b32.xlu1 %v1062_v14, %s2361_s4  ;;  %v4230_v14 = vld [vmem:[#allocation66_spill] sm:$0xff] }
 0x17e   :  { %1562 = vmatpush1.bf16.msra.mxu0 %v4225_v60  ;;  %1603 = vmatpush1.bf16.msra.mxu1 %v4226_v62 }
 0x17f   :  { %1563 = vmatprep.subr.bf16.mxu0 %v4227_v30  ;;  %1604 = vmatprep.subr.bf16.mxu1 %v4176_v38 }
 0x181   :  { %1204 = vrot.lane.b32.xlu1 %v1103_v40, %s2361_s4  ;;  %v4231_v40 = vld [vmem:[#allocation70_spill] sm:$0xff] }
 0x182   :  { %1564 = vmatpush1.bf16.msra.mxu0 %v4228_v3  ;;  %1605 = vmatpush1.bf16.msra.mxu1 %v4229_v10 }
 0x183   :  { %1565 = vmatprep.subr.bf16.mxu0 %v4179_v63  ;;  %1606 = vmatprep.subr.bf16.mxu1 %v4180_v1 }
 0x186   :  { %1566 = vmatpush1.bf16.msra.mxu0 %v4181_v7  ;;  %1607 = vmatpush1.bf16.msra.mxu1 %v4182_v12 }
 0x187   :  { %1567 = vmatprep.subr.bf16.mxu0 %v4183_v6  ;;  %1608 = vmatprep.subr.bf16.mxu1 %v4184_v23 }
 0x18a   :  { %1568 = vmatpush1.bf16.msra.mxu0 %v4185_v39  ;;  %1609 = vmatpush1.bf16.msra.mxu1 %v4134_v50 }
 0x18b   :  { %1569 = vmatprep.subr.bf16.mxu0 %v4186_v25  ;;  %1610 = vmatprep.subr.bf16.mxu1 %v4187_v11 }
 0x18e   :  { %1570 = vmatpush1.bf16.msra.mxu0 %v4188_v22  ;;  %1611 = vmatpush1.bf16.msra.mxu1 %v4230_v14  ;;  %v4232_v14 = vld [vmem:[#allocation76_spill] sm:$0xff] }
 0x18f   :  { %1571 = vmatprep.subr.bf16.mxu0 %v4139_v13  ;;  %1612 = vmatprep.subr.bf16.mxu1 %v4140_v33 }
 0x192   :  { %1572 = vmatpush1.bf16.msra.mxu0 %v4141_v32  ;;  %1613 = vmatpush1.bf16.msra.mxu1 %v4231_v40 }
 0x193   :  { %1573 = vmatprep.subr.bf16.mxu0 %v4143_v16  ;;  %1614 = vmatprep.subr.bf16.mxu1 %v4144_v15  ;;  %v4233_v16 = vld [vmem:[#allocation81_spill] sm:$0xff] }
 0x196   :  { %1574 = vmatpush1.bf16.msra.mxu0 %v2962_v59  ;;  %1615 = vmatpush1.bf16.msra.mxu1 %v4145_v57 }
 0x197   :  { %1575 = vmatprep.subr.bf16.mxu0 %v4146_v58  ;;  %1616 = vmatprep.subr.bf16.mxu1 %v4147_v56 }
 0x19a   :  { %1576 = vmatpush1.bf16.msra.mxu0 %v4232_v14  ;;  %1617 = vmatpush1.bf16.msra.mxu1 %v2990_v2  ;;  %v3429_v14 = vld [vmem:[%s3859_s1 + $0x20] sm:$0xff]  ;;  %v4234_v2 = vld [vmem:[#allocation84_spill] sm:$0xff]  ;;  %s2362_s1 = smov 127  }
 0x19b   :  { %1577 = vmatprep.subr.bf16.mxu0 %v2992_v43  ;;  %1618 = vmatprep.subr.bf16.mxu1 %v2995_v4  ;;  %v4235_v4 = vld [vmem:[#allocation3_spill] sm:$0xff] }
 0x19c   :  { %v4239_v43 = vld [vmem:[#allocation7_spill] sm:$0xff] }
 0x19e   :  { %1578 = vmatpush1.bf16.msra.mxu0 %v4190_v31  ;;  %1619 = vmatpush1.bf16.msra.mxu1 %v4233_v16  ;;  %v4236_v31 = vld [vmem:[#allocation5_spill] sm:$0xff]  ;;  %v3437_v16 = vcombine.high %v3429_v14, %v3429_v14 }
 0x19f   :  { %2293 = vmatprep.subr.msk.bf16.mxu0 %vm737_vm1, %v3010_v49  ;;  %2295 = vmatprep.subr.msk.bf16.mxu1 %vm737_vm1, %v3013_v48  ;;  %v4237_v48 = vld [vmem:[#allocation4_spill] sm:$0xff]  ;;  %v4238_v49 = vld [vmem:[#allocation6_spill] sm:$0xff] }
 0x1a2   :  { %1580 = vmatpush1.bf16.msra.mxu0 %v4234_v2  ;;  %1621 = vmatpush1.bf16.msra.mxu1 %v3025_v0  ;;  %v4240_v0 = vld [vmem:[#allocation8_spill] sm:$0xff] }
 0x1a3   :  { %1737 = vmatprep.subr.bf16.mxu0 %v4235_v4  ;;  %1778 = vmatprep.subr.bf16.mxu1 %v4236_v31 }
 0x1a5   :  { %1588 = vmatmul.mubr.bf16.vlgmr.msra.gmra.mrb[28].mxu0 %v3360_v5  ;;  %1629 = vmatmul.mubr.bf16.vlgmr.msra.gmra.mrb[28].mxu1 %v3360_v5 }
 0x1a6   :  { %1738 = vmatpush1.bf16.msra.mxu0 %v4237_v48  ;;  %1779 = vmatpush1.bf16.msra.mxu1 %v4238_v49 }
 0x1a7   :  { %1739 = vmatprep.subr.bf16.mxu0 %v4239_v43  ;;  %1780 = vmatprep.subr.bf16.mxu1 %v4240_v0 }
 0x1a8   :  { %v1142_v2 = vpop.f32.mrb[12].mxu0  ;;  %2301 = vmatprep.mubr.msk.bf16.mxu0 %vm733_vm0, %v3437_v16  ;;  %v1183_v31 = vpop.f32.mrb[12].mxu1  ;;  %2303 = vmatprep.mubr.msk.bf16.mxu1 %vm733_vm0, %v3437_v16 }
 0x1a9   :  { %1206 = vrot.lane.b32.xlu0 %v1142_v2, %s2361_s4  ;;  %v1144_v4 = vpop.f32.mrb[13].mxu0  ;;  %v1185_v48 = vpop.f32.mrb[13].mxu1  ;;  %v4261_v2 = vld [vmem:[#allocation30_spill] sm:$0xff] }
 0x1aa   :  { %v1146_v5 = vpop.f32.mrb[14].mxu0  ;;  %1740 = vmatpush1.bf16.msra.mxu0 %v2437_v18  ;;  %1781 = vmatpush1.bf16.msra.mxu1 %v2441_v19  ;;  %v1187_v49 = vpop.f32.mrb[14].mxu1  ;;  %v4241_v18 = vld [vmem:[#allocation9_spill] sm:$0xff]  ;;  %v4242_v19 = vld [vmem:[#allocation10_spill] sm:$0xff] }
 0x1ab   :  { %v1147_v43 = vpop.f32.mrb[15].mxu0  ;;  %1741 = vmatprep.subr.bf16.mxu0 %v2443_v20  ;;  %1782 = vmatprep.subr.bf16.mxu1 %v2446_v21  ;;  %v1188_v0 = vpop.f32.mrb[15].mxu1  ;;  %v4243_v20 = vld [vmem:[#allocation11_spill] sm:$0xff]  ;;  %v4244_v21 = vld [vmem:[#allocation12_spill] sm:$0xff]  ;;  %v4264_v5 = vld [vmem:[#allocation33_spill] sm:$0xff] }
 0x1ac   :  { %v4266_v43 = vld [vmem:[#allocation34_spill] sm:$0xff]  ;;  %v4267_v49 = vld [vmem:[#allocation36_spill] sm:$0xff]  ;;  %v4268_v0 = vld [vmem:[#allocation37_spill] sm:$0xff] }
 0x1ad   :  { %1210 = vrot.lane.b32.xlu0 %v1183_v31, %s2361_s4  ;;  %v3501_v31 = vcombine.low %v3429_v14, %v3429_v14 }
 0x1ae   :  { %1742 = vmatpush1.bf16.msra.mxu0 %v2461_v26  ;;  %1783 = vmatpush1.bf16.msra.mxu1 %v2465_v27  ;;  %v4245_v26 = vld [vmem:[#allocation13_spill] sm:$0xff]  ;;  %v4246_v27 = vld [vmem:[#allocation14_spill] sm:$0xff] }
 0x1af   :  { %1743 = vmatprep.subr.bf16.mxu0 %v2467_v28  ;;  %1784 = vmatprep.subr.bf16.mxu1 %v2470_v29  ;;  %v4247_v28 = vld [vmem:[#allocation15_spill] sm:$0xff]  ;;  %v4248_v29 = vld [vmem:[#allocation16_spill] sm:$0xff] }
 0x1b1   :  { %1208 = vrot.lane.b32.xlu0 %v1144_v4, %s2361_s4  ;;  %v4262_v4 = vld [vmem:[#allocation31_spill] sm:$0xff] }
 0x1b2   :  { %1744 = vmatpush1.bf16.msra.mxu0 %v2485_v34  ;;  %1785 = vmatpush1.bf16.msra.mxu1 %v2489_v35  ;;  %v4249_v34 = vld [vmem:[#allocation17_spill] sm:$0xff]  ;;  %v4250_v35 = vld [vmem:[#allocation18_spill] sm:$0xff] }
 0x1b3   :  { %1745 = vmatprep.subr.bf16.mxu0 %v2491_v36  ;;  %1786 = vmatprep.subr.bf16.mxu1 %v2494_v37  ;;  %v4251_v36 = vld [vmem:[#allocation19_spill] sm:$0xff]  ;;  %v4252_v37 = vld [vmem:[#allocation20_spill] sm:$0xff] }
 0x1b5   :  { %1212 = vrot.lane.b32.xlu0 %v1185_v48, %s2361_s4  ;;  %v4265_v48 = vld [vmem:[#allocation35_spill] sm:$0xff] }
 0x1b6   :  { %1746 = vmatpush1.bf16.msra.mxu0 %v2509_v42  ;;  %1787 = vmatpush1.bf16.msra.mxu1 %v2518_v44  ;;  %v4253_v42 = vld [vmem:[#allocation22_spill] sm:$0xff]  ;;  %v4254_v44 = vld [vmem:[#allocation23_spill] sm:$0xff] }
 0x1b7   :  { %1747 = vmatprep.subr.bf16.mxu0 %v2520_v45  ;;  %1788 = vmatprep.subr.bf16.mxu1 %v2523_v46  ;;  %v4255_v45 = vld [vmem:[#allocation24_spill] sm:$0xff]  ;;  %v4256_v46 = vld [vmem:[#allocation25_spill] sm:$0xff] }
 0x1ba   :  { %1748 = vmatpush1.bf16.msra.mxu0 %v2542_v52  ;;  %1789 = vmatpush1.bf16.msra.mxu1 %v2548_v53  ;;  %v4257_v52 = vld [vmem:[#allocation26_spill] sm:$0xff]  ;;  %v4258_v53 = vld [vmem:[#allocation27_spill] sm:$0xff] }
 0x1bb   :  { %1749 = vmatprep.subr.bf16.mxu0 %v2550_v54  ;;  %1790 = vmatprep.subr.bf16.mxu1 %v2553_v55  ;;  %v4259_v54 = vld [vmem:[#allocation28_spill] sm:$0xff]  ;;  %v4260_v55 = vld [vmem:[#allocation29_spill] sm:$0xff] }
 0x1be   :  { %1750 = vmatpush1.bf16.msra.mxu0 %v4241_v18  ;;  %1791 = vmatpush1.bf16.msra.mxu1 %v4242_v19  ;;  %v4269_v18 = vld [vmem:[#allocation38_spill] sm:$0xff]  ;;  %v4270_v19 = vld [vmem:[#allocation39_spill] sm:$0xff] }
 0x1bf   :  { %1751 = vmatprep.subr.bf16.mxu0 %v4243_v20  ;;  %1792 = vmatprep.subr.bf16.mxu1 %v4244_v21  ;;  %v4271_v20 = vld [vmem:[#allocation40_spill] sm:$0xff] }
 0x1c2   :  { %1752 = vmatpush1.bf16.msra.mxu0 %v4245_v26  ;;  %1793 = vmatpush1.bf16.msra.mxu1 %v4246_v27 }
 0x1c3   :  { %1753 = vmatprep.subr.bf16.mxu0 %v4247_v28  ;;  %1794 = vmatprep.subr.bf16.mxu1 %v4248_v29  ;;  %v4272_v29 = vld [vmem:[#allocation42_spill] sm:$0xff] }
 0x1c6   :  { %1754 = vmatpush1.bf16.msra.mxu0 %v4249_v34  ;;  %1795 = vmatpush1.bf16.msra.mxu1 %v4250_v35 }
 0x1c7   :  { %1755 = vmatprep.subr.bf16.mxu0 %v4251_v36  ;;  %1796 = vmatprep.subr.bf16.mxu1 %v4252_v37 }
 0x1ca   :  { %1756 = vmatpush1.bf16.msra.mxu0 %v4200_v61  ;;  %1797 = vmatpush1.bf16.msra.mxu1 %v4253_v42  ;;  %v4263_v61 = vld [vmem:[#allocation32_spill] sm:$0xff] }
 0x1cb   :  { %1757 = vmatprep.subr.bf16.mxu0 %v4254_v44  ;;  %1798 = vmatprep.subr.bf16.mxu1 %v4255_v45 }
 0x1ce   :  { %1758 = vmatpush1.bf16.msra.mxu0 %v4256_v46  ;;  %1799 = vmatpush1.bf16.msra.mxu1 %v4257_v52 }
 0x1cf   :  { %1759 = vmatprep.subr.bf16.mxu0 %v4258_v53  ;;  %1800 = vmatprep.subr.bf16.mxu1 %v4259_v54 }
 0x1d2   :  { %1760 = vmatpush1.bf16.msra.mxu0 %v4260_v55  ;;  %1801 = vmatpush1.bf16.msra.mxu1 %v4261_v2 }
 0x1d3   :  { %2300 = vmatprep.subr.msk.bf16.mxu0 %vm737_vm1, %v4262_v4  ;;  %2302 = vmatprep.subr.msk.bf16.mxu1 %vm737_vm1, %v4263_v61 }
 0x1d6   :  { %1762 = vmatpush1.bf16.msra.mxu0 %v4264_v5  ;;  %1803 = vmatpush1.bf16.msra.mxu1 %v4265_v48 }
 0x1d7   :  { %1819 = vmatprep.subr.bf16.mxu0 %v4266_v43  ;;  %1860 = vmatprep.subr.bf16.mxu1 %v4267_v49 }
 0x1d9   :  { %1770 = vmatmul.mubr.bf16.vlgmr.msra.gmra.mrb[32].mxu0 %v3501_v31  ;;  %1811 = vmatmul.mubr.bf16.vlgmr.msra.gmra.mrb[32].mxu1 %v3501_v31 }
 0x1da   :  { %1820 = vmatpush1.bf16.msra.mxu0 %v4268_v0  ;;  %1861 = vmatpush1.bf16.msra.mxu1 %v4269_v18  ;;  %v3591_v18 = vpop.permute.xlu1 %942 }
 0x1db   :  { %1821 = vmatprep.subr.bf16.mxu0 %v4270_v19  ;;  %1862 = vmatprep.subr.bf16.mxu1 %v4271_v20  ;;  %v935_v19 = vpop.permute.xlu0 %934 }
 0x1dc   :  { %v3512_v14 = vpop.f32.mrb[16].mxu0  ;;  %2305 = vmatprep.mubr.msk.bf16.mxu0 %vm733_vm0, %v3437_v16  ;;  %v3519_v26 = vpop.f32.mrb[16].mxu1  ;;  %2307 = vmatprep.mubr.msk.bf16.mxu1 %vm733_vm0, %v3437_v16 }
 0x1dd   :  { %v3517_v21 = vpop.f32.mrb[17].mxu0  ;;  %v3524_v28 = vpop.f32.mrb[17].mxu1 }
 0x1de   :  { %v1328_v27 = vpop.f32.mrb[18].mxu0  ;;  %1822 = vmatpush1.bf16.msra.mxu0 %v4165_v24  ;;  %1863 = vmatpush1.bf16.msra.mxu1 %v4272_v29  ;;  %v1369_v35 = vpop.f32.mrb[18].mxu1  ;;  %v4276_v24 = vld [vmem:[#allocation77_spill] sm:$0xff] }
 0x1df   :  { %v1329_v34 = vpop.f32.mrb[19].mxu0  ;;  %1823 = vmatprep.subr.bf16.mxu0 %v4167_v51  ;;  %1864 = vmatprep.subr.bf16.mxu1 %v4221_v8  ;;  %v1370_v36 = vpop.f32.mrb[19].mxu1  ;;  %v4279_v51 = vld [vmem:[#allocation80_spill] sm:$0xff] }
 0x1e0   :  { %v3593_v20 = vpop.permute.xlu1 %946  ;;  %v3595_v27 = vpop.permute.xlu0 %938 }
 0x1e2   :  { %1824 = vmatpush1.bf16.msra.mxu0 %v4169_v47  ;;  %1865 = vmatpush1.bf16.msra.mxu1 %v4222_v41 }
 0x1e3   :  { %1825 = vmatprep.subr.bf16.mxu0 %v4223_v17  ;;  %1866 = vmatprep.subr.bf16.mxu1 %v4224_v9 }
 0x1e4   :  { %v3597_v29 = vpop.permute.xlu1 %944  ;;  %v937_v34 = vpop.permute.xlu0 %936 }
 0x1e6   :  { %1826 = vmatpush1.bf16.msra.mxu0 %v4225_v60  ;;  %1867 = vmatpush1.bf16.msra.mxu1 %v4226_v62  ;;  %v4273_v60 = vld [vmem:[#allocation66_spill] sm:$0xff] }
 0x1e7   :  { %1827 = vmatprep.subr.bf16.mxu0 %v4227_v30  ;;  %1868 = vmatprep.subr.bf16.mxu1 %v4176_v38  ;;  %v4277_v38 = vld [vmem:[#allocation78_spill] sm:$0xff] }
 0x1e8   :  { %v3599_v35 = vpop.permute.xlu1 %948  ;;  %v3601_v36 = vpop.permute.xlu0 %940 }
 0x1ea   :  { %1828 = vmatpush1.bf16.msra.mxu0 %v4228_v3  ;;  %1869 = vmatpush1.bf16.msra.mxu1 %v4229_v10 }
 0x1eb   :  { %1829 = vmatprep.subr.bf16.mxu0 %v4179_v63  ;;  %1870 = vmatprep.subr.bf16.mxu1 %v4180_v1  ;;  %v4274_v63 = vld [vmem:[#allocation71_spill] sm:$0xff] }
 0x1ee   :  { %1830 = vmatpush1.bf16.msra.mxu0 %v4181_v7  ;;  %1871 = vmatpush1.bf16.msra.mxu1 %v4182_v12 }
 0x1ef   :  { %1831 = vmatprep.subr.bf16.mxu0 %v4183_v6  ;;  %1872 = vmatprep.subr.bf16.mxu1 %v4184_v23  ;;  %v4275_v6 = vld [vmem:[#allocation76_spill] sm:$0xff] }
 0x1f2   :  { %1832 = vmatpush1.bf16.msra.mxu0 %v4185_v39  ;;  %1873 = vmatpush1.bf16.msra.mxu1 %v4134_v50 }
 0x1f3   :  { %1833 = vmatprep.subr.bf16.mxu0 %v4186_v25  ;;  %1874 = vmatprep.subr.bf16.mxu1 %v4187_v11 }
 0x1f6   :  { %1834 = vmatpush1.bf16.msra.mxu0 %v4188_v22  ;;  %1875 = vmatpush1.bf16.msra.mxu1 %v4273_v60  ;;  %v3603_v60 = vpop.permute.xlu1 %1198 }
 0x1f7   :  { %1835 = vmatprep.subr.bf16.mxu0 %v4139_v13  ;;  %1876 = vmatprep.subr.bf16.mxu1 %v4140_v33  ;;  %v4278_v13 = vld [vmem:[#allocation79_spill] sm:$0xff] }
 0x1fa   :  { %1836 = vmatpush1.bf16.msra.mxu0 %v4141_v32  ;;  %1877 = vmatpush1.bf16.msra.mxu1 %v4231_v40  ;;  %v4280_v32 = vld [vmem:[#allocation81_spill] sm:$0xff] }
 0x1fb   :  { %1837 = vmatprep.subr.bf16.mxu0 %v4274_v63  ;;  %1878 = vmatprep.subr.bf16.mxu1 %v4144_v15  ;;  %v4281_v15 = vld [vmem:[#allocation82_spill] sm:$0xff] }
 0x1fe   :  { %1838 = vmatpush1.bf16.msra.mxu0 %v2962_v59  ;;  %1879 = vmatpush1.bf16.msra.mxu1 %v4145_v57  ;;  %v4282_v57 = vld [vmem:[#allocation83_spill] sm:$0xff] }
 0x1ff   :  { %1839 = vmatprep.subr.bf16.mxu0 %v4146_v58  ;;  %1880 = vmatprep.subr.bf16.mxu1 %v4147_v56  ;;  %v4283_v58 = vld [vmem:[#allocation84_spill] sm:$0xff]  ;;  %v4284_v56 = vld [vmem:[#allocation85_spill] sm:$0xff] }
 0x202   :  { %1840 = vmatpush1.bf16.msra.mxu0 %v4275_v6  ;;  %1881 = vmatpush1.bf16.msra.mxu1 %v4276_v24  ;;  %v3607_v6 = vpop.permute.xlu1 %1202  ;;  %v121_v24 = vlaneseq }
 0x203   :  { %1841 = vmatprep.subr.bf16.mxu0 %v4277_v38  ;;  %1882 = vmatprep.subr.bf16.mxu1 %v4278_v13 }
 0x204   :  { %v122_v13 = vand.u32 127, %v121_v24 }
 0x206   :  { %1842 = vmatpush1.bf16.msra.mxu0 %v4279_v51  ;;  %1883 = vmatpush1.bf16.msra.mxu1 %v4280_v32  ;;  %v1201_v51 = vpop.permute.xlu1 %1200  ;;  %v123_v32 = vadd.s32 128, %v122_v13 }
 0x207   :  { %2304 = vmatprep.subr.msk.bf16.mxu0 %vm737_vm1, %v4281_v15  ;;  %2306 = vmatprep.subr.msk.bf16.mxu1 %vm737_vm1, %v4282_v57  ;;  %v124_v57 = vadd.s32 256, %v122_v13 }
 0x20a   :  { %1844 = vmatpush1.bf16.msra.mxu0 %v4283_v58  ;;  %1885 = vmatpush1.bf16.msra.mxu1 %v4284_v56  ;;  %v125_v58 = vadd.s32 384, %v122_v13  ;;  %v126_v56 = vadd.s32 512, %v122_v13 }
 0x20d   :  { %1852 = vmatmul.mubr.bf16.vlgmr.msra.gmra.mrb[36].mxu0 %v3501_v31  ;;  %1893 = vmatmul.mubr.bf16.vlgmr.msra.gmra.mrb[36].mxu1 %v3501_v31 }
 0x210   :  { %v3575_v59 = vpop.f32.mrb[20].mxu0  ;;  %v3579_v16 = vpop.f32.mrb[20].mxu1 }
 0x211   :  { %v3577_v33 = vpop.f32.mrb[21].mxu0  ;;  %v3581_v47 = vpop.f32.mrb[21].mxu1 }
 0x212   :  { %v1410_v50 = vpop.f32.mrb[22].mxu0  ;;  %v1451_v7 = vpop.f32.mrb[22].mxu1 }
 0x213   :  { %v1411_v1 = vpop.f32.mrb[23].mxu0  ;;  %v1452_v23 = vpop.f32.mrb[23].mxu1  ;;  %v127_v50 = vadd.s32 640, %v122_v13  ;;  %v3613_v7 = vand.u32 7, %v122_v13 }
 0x214   :  { %v128_v1 = vadd.s32 768, %v122_v13  ;;  %v129_v23 = vadd.s32 896, %v122_v13  ;;  %v953_v13 = vsel %vm950_vm2, %v3595_v27, %v3601_v36 }
 0x21b   :  { %v3605_v63 = vpop.permute.xlu0 %1206 }
 0x21f   :  { %v3609_v38 = vpop.permute.xlu0 %1210 }
 0x223   :  { %v3611_v15 = vpop.permute.xlu0 %1208 }
 0x244   :  { %v1507_v39 = vpop.f32.mrb[24].mxu0  ;;  %v1548_v22 = vpop.f32.mrb[24].mxu1 }
 0x245   :  { %1645 = vrot.lane.b32.xlu0 %v1507_v39, %s2362_s1  ;;  %v1509_v11 = vpop.f32.mrb[25].mxu0  ;;  %v1550_v25 = vpop.f32.mrb[25].mxu1  ;;  %v3615_v39 = vand.u32 7, %v123_v32  ;;  %v1215_v32 = vsel %vm1214_vm10, %v3603_v60, %v1201_v51 }
 0x246   :  { %1647 = vrot.lane.b32.xlu1 %v1509_v11, %s2362_s1  ;;  %v1511_v12 = vpop.f32.mrb[26].mxu0  ;;  %v1552_v41 = vpop.f32.mrb[26].mxu1 }
 0x247   :  { %v1512_v8 = vpop.f32.mrb[27].mxu0  ;;  %v1553_v17 = vpop.f32.mrb[27].mxu1  ;;  %v3619_v12 = vand.u32 7, %v125_v58  ;;  %v3625_v41 = vand.u32 7, %v128_v1 }
 0x248   :  { %v1205_v11 = vpop.permute.xlu1 %1204  ;;  %v3623_v8 = vand.u32 7, %v127_v50  ;;  %v3627_v17 = vpop.permute.xlu0 %1212 }
 0x249   :  { %1649 = vrot.lane.b32.xlu0 %v1548_v22, %s2362_s1  ;;  %v3617_v22 = vand.u32 7, %v124_v57  ;;  %v1216_v57 = vsel %vm1214_vm10, %v1201_v51, %v3607_v6  ;;  %v1218_v50 = vsel %vm1214_vm10, %v1205_v11, %v3605_v63 }
 0x24a   :  { %1651 = vrot.lane.b32.xlu1 %v1550_v25, %s2362_s1  ;;  %v3621_v25 = vand.u32 7, %v126_v56  ;;  %v1217_v56 = vsel %vm1214_vm10, %v3607_v6, %v1205_v11  ;;  %v954_v6 = vsel %vm950_vm2, %v3601_v36, %v3591_v18  ;;  %v957_v36 = vsel %vm950_vm2, %v3593_v20, %v3599_v35 }
 0x278   :  { %v1589_v9 = vpop.f32.mrb[28].mxu0  ;;  %v1630_v30 = vpop.f32.mrb[28].mxu1 }
 0x279   :  { %1653 = vrot.lane.b32.xlu1 %v1589_v9, %s2362_s1  ;;  %v1591_v62 = vpop.f32.mrb[29].mxu0  ;;  %v1632_v10 = vpop.f32.mrb[29].mxu1  ;;  %v967_v9 = vadd.s32 4294967294, %v3613_v7 }
 0x27a   :  { %v1593_v3 = vpop.f32.mrb[30].mxu0  ;;  %v1634_v37 = vpop.f32.mrb[30].mxu1 }
 0x27b   :  { %v1594_v40 = vpop.f32.mrb[31].mxu0  ;;  %v1635_v42 = vpop.f32.mrb[31].mxu1  ;;  %v971_v37 = vadd.s32 4294967294, %v3621_v25  ;;  %vm975_vm3 = vcmp.ge.s32.totalorder %v967_v9, 0 }
 0x27c   :  { %v970_v40 = vadd.s32 4294967294, %v3619_v12  ;;  %v3639_v42 = vadd.s32 4294967294, %v3623_v8 }
 0x27d   :  { %1655 = vrot.lane.b32.xlu1 %v1591_v62, %s2362_s1  ;;  %v3630_v62 = vand.u32 7, %v129_v23  ;;  %vm979_vm7 = vcmp.ge.s32.totalorder %v971_v37, 0 }
 0x27e   :  { %vm978_vm6 = vcmp.ge.s32.totalorder %v970_v40, 0  ;;  %vm980_vm8 = vcmp.ge.s32.totalorder %v3639_v42, 0  ;;  %v1678_v42 = vadd.s32 1, %v3613_v7 }
 0x27f   :  { %v1238_v9 = vadd.s32 4294967295, %v3630_v62 }
 0x2ac   :  { %v1771_v44 = vpop.f32.mrb[32].mxu0  ;;  %v1812_v46 = vpop.f32.mrb[32].mxu1 }
 0x2ad   :  { %1909 = vrot.lane.b32.xlu0 %v1771_v44, %s2363_s7  ;;  %v1773_v45 = vpop.f32.mrb[33].mxu0  ;;  %v1814_v53 = vpop.f32.mrb[33].mxu1  ;;  %v3642_v44 = vadd.s32 4294967294, %v3625_v41 }
 0x2ae   :  { %1911 = vrot.lane.b32.xlu1 %v1773_v45, %s2363_s7  ;;  %v1775_v52 = vpop.f32.mrb[34].mxu0  ;;  %v1816_v55 = vpop.f32.mrb[34].mxu1 }
 0x2af   :  { %v1776_v54 = vpop.f32.mrb[35].mxu0  ;;  %v1817_v2 = vpop.f32.mrb[35].mxu1  ;;  %v1231_v52 = vadd.s32 4294967295, %v3613_v7  ;;  %v1234_v55 = vadd.s32 4294967295, %v3619_v12  ;;  %vm981_vm9 = vcmp.ge.s32.totalorder %v3642_v44, 0  ;;  %v1679_v44 = vadd.s32 1, %v3615_v39 }
 0x2b0   :  { %v1233_v54 = vadd.s32 4294967295, %v3617_v22  ;;  %v966_v2 = vsel %vm950_vm2, 0.0, %v935_v19 }
 0x2b1   :  { %1913 = vrot.lane.b32.xlu0 %v1812_v46, %s2363_s7  ;;  %v3647_v46 = vadd.s32 4294967294, %v3630_v62  ;;  %vm1239_vm12 = vcmp.ge.s32.totalorder %v1231_v52, 0  ;;  %vm1242_vm15 = vcmp.ge.s32.totalorder %v1234_v55, 0 }
 0x2b2   :  { %1657 = vrot.lane.b32.xlu1 %v1630_v30, %s2362_s1  ;;  %v968_v30 = vadd.s32 4294967294, %v3615_v39  ;;  %vm1241_vm14 = vcmp.ge.s32.totalorder %v1233_v54, 0 }
 0x2b3   :  { %vm982_vm11 = vcmp.ge.s32.totalorder %v3647_v46, 0  ;;  %v1265_v11 = vsel %vm1241_vm14, %v1216_v57, 0.0  ;;  %v1680_v46 = vadd.s32 1, %v3617_v22 }
 0x2b4   :  { %vm976_vm4 = vcmp.ge.s32.totalorder %v968_v30, 0  ;;  %v1266_v30 = vsel %vm1242_vm15, %v1217_v56, 0.0  ;;  %v1006_v35 = vsel %vm982_vm11, %v957_v36, 0.0  ;;  %v1942_v56 = vadd.s32 2, %v3613_v7 }
 0x2b5   :  { %1915 = vrot.lane.b32.xlu0 %v1814_v53, %s2363_s7  ;;  %v1232_v53 = vadd.s32 4294967295, %v3615_v39  ;;  %v1682_v7 = vadd.s32 1, %v3621_v25 }
 0x2b6   :  { %1659 = vrot.lane.b32.xlu1 %v1632_v10, %s2362_s1  ;;  %v969_v10 = vadd.s32 4294967294, %v3617_v22  ;;  %vm1958_vm11 = vcmp.lt.s32.totalorder %v1942_v56, 8 }
 0x2b7   :  { %v3644_v45 = vpop.permute.xlu0 %1645  ;;  %vm1240_vm13 = vcmp.ge.s32.totalorder %v1232_v53, 0 }
 0x2b8   :  { %v3633_v3 = vpop.permute.xlu1 %1647  ;;  %vm977_vm5 = vcmp.ge.s32.totalorder %v969_v10, 0  ;;  %v1264_v23 = vsel %vm1240_vm13, %v1215_v32, 0.0  ;;  %vm1698_vm13 = vcmp.lt.s32.totalorder %v1682_v7, 8 }
 0x2e0   :  { %v1853_v4 = vpop.f32.mrb[36].mxu0  ;;  %v1894_v61 = vpop.f32.mrb[36].mxu1 }
 0x2e1   :  { %1917 = vrot.lane.b32.xlu0 %v1853_v4, %s2363_s7  ;;  %v1855_v31 = vpop.f32.mrb[37].mxu0  ;;  %v1896_v5 = vpop.f32.mrb[37].mxu1  ;;  %v951_v4 = vsel %vm950_vm2, %v935_v19, %v937_v34 }
 0x2e2   :  { %v1857_v48 = vpop.f32.mrb[38].mxu0  ;;  %1923 = vrot.lane.b32.xlu1 %v1896_v5, %s2363_s7  ;;  %v1898_v49 = vpop.f32.mrb[38].mxu1  ;;  %v1235_v5 = vadd.s32 4294967295, %v3621_v25  ;;  %v1000_v19 = vsel %vm976_vm4, %v951_v4, 0.0  ;;  %v1003_v4 = vsel %vm979_vm7, %v954_v6, 0.0  ;;  %vm1661_vm4 = vcmask 1039360  }
 0x2e3   :  { %v1858_v43 = vpop.f32.mrb[39].mxu0  ;;  %v1899_v0 = vpop.f32.mrb[39].mxu1  ;;  %v1236_v48 = vadd.s32 4294967295, %v3623_v8  ;;  %vm1696_vm7 = vcmp.lt.s32.totalorder %v1680_v46, 8 }
 0x2e4   :  { %v1237_v43 = vadd.s32 4294967295, %v3625_v41  ;;  %v3665_v49 = vpop.permute.xlu0 %1649  ;;  %v999_v0 = vsel %vm975_vm3, %v966_v2, 0.0  ;;  %vm1243_vm0 = vcmp.ge.s32.totalorder %v1235_v5, 0  ;;  %v1002_v2 = vsel %vm978_vm6, %v953_v13, 0.0 }
 0x2e5   :  { %1919 = vrot.lane.b32.xlu0 %v1855_v31, %s2363_s7  ;;  %v952_v31 = vsel %vm950_vm2, %v937_v34, %v3595_v27  ;;  %v1230_v34 = vsel %vm1214_vm10, 0.0, %v3603_v60  ;;  %vm1244_vm1 = vcmp.ge.s32.totalorder %v1236_v48, 0  ;;  %v1219_v27 = vsel %vm1214_vm10, %v3605_v63, %v3611_v15 }
 0x2e6   :  { %v1001_v24 = vsel %vm977_vm5, %v952_v31, 0.0  ;;  %v1263_v1 = vsel %vm1239_vm12, %v1230_v34, 0.0  ;;  %vm1245_vm3 = vcmp.ge.s32.totalorder %v1237_v43, 0  ;;  %v1220_v60 = vsel %vm1214_vm10, %v3611_v15, %v3609_v38 }
 0x2e7   :  { %v955_v63 = vsel %vm950_vm2, %v3591_v18, %v3597_v29  ;;  %v956_v15 = vsel %vm950_vm2, %v3597_v29, %v3593_v20  ;;  %v1267_v10 = vsel %vm1243_vm0, %v1218_v50, 0.0  ;;  %v1271_v52 = vadd.f32 %v1263_v1, %v999_v0 }
 0x2e8   :  { %v1268_v53 = vsel %vm1244_vm1, %v1219_v27, 0.0  ;;  %v1269_v54 = vsel %vm1245_vm3, %v1220_v60, 0.0  ;;  %v1272_v18 = vadd.f32 %v1264_v23, %v1000_v19  ;;  %v1273_v31 = vadd.f32 %v1265_v11, %v1001_v24 }
 0x2e9   :  { %1921 = vrot.lane.b32.xlu0 %v1894_v61, %s2363_s7  ;;  %v3657_v61 = vpop.permute.xlu1 %1651  ;;  %v1004_v29 = vsel %vm980_vm8, %v955_v63, 0.0  ;;  %v1005_v55 = vsel %vm981_vm9, %v956_v15, 0.0  ;;  %v1274_v43 = vadd.f32 %v1266_v30, %v1002_v2  ;;  %v1275_v20 = vadd.f32 %v1267_v10, %v1003_v4 }
 0x2ea   :  { %v1276_v48 = vadd.f32 %v1268_v53, %v1004_v29  ;;  %v1277_v40 = vadd.f32 %v1269_v54, %v1005_v55  ;;  %vm1246_vm2 = vcmp.ge.s32.totalorder %v1238_v9, 0  ;;  %v1221_v0 = vsel %vm1214_vm10, %v3609_v38, %v3627_v17 }
 0x2eb   :  { %v1454_v19 = vadd.f32 %v3512_v14, %v1271_v52  ;;  %v1455_v34 = vadd.f32 %v3517_v21, %v1272_v18  ;;  %v1456_v24 = vadd.f32 %v3519_v26, %v1273_v31  ;;  %v1681_v13 = vadd.s32 1, %v3619_v12 }
 0x2ec   :  { %v1457_v57 = vadd.f32 %v3524_v28, %v1274_v43  ;;  %v3733_v38 = vadd.f32 %v3575_v59, %v1275_v20  ;;  %v1943_v14 = vadd.s32 2, %v3615_v39  ;;  %v1270_v17 = vsel %vm1246_vm2, %v1221_v0, 0.0 }
 0x2ed   :  { %v3679_v58 = vpop.permute.xlu1 %1653  ;;  %v3738_v21 = vadd.f32 %v3577_v33, %v1276_v48  ;;  %v3741_v26 = vadd.f32 %v3579_v16, %v1277_v40  ;;  %vm1694_vm5 = vcmp.lt.s32.totalorder %v1678_v42, 8  ;;  %vm1695_vm6 = vcmp.lt.s32.totalorder %v1679_v44, 8 }
 0x2ee   :  { %v1663_v28 = vsel %vm1661_vm4, %v3633_v3, %v3665_v49  ;;  %v1944_v59 = vadd.s32 2, %v3617_v22  ;;  %v1662_v39 = vsel %vm1661_vm4, %v3644_v45, %v3633_v3  ;;  %vm1697_vm8 = vcmp.lt.s32.totalorder %v1681_v13, 8 }
 0x2ef   :  { %vm1925_vm9 = vcmask 1031168   ;;  %v1664_v16 = vsel %vm1661_vm4, %v3665_v49, %v3657_v61  ;;  %vm1959_vm10 = vcmp.lt.s32.totalorder %v1943_v14, 8  ;;  %v1711_v1 = vsel %vm1695_vm6, %v1663_v28, 0.0 }
 0x2f0   :  { %v1683_v22 = vadd.s32 1, %v3623_v8  ;;  %v1684_v3 = vadd.s32 1, %v3625_v41  ;;  %v1710_v45 = vsel %vm1694_vm5, %v1662_v39, 0.0  ;;  %vm1960_vm12 = vcmp.lt.s32.totalorder %v1944_v59, 8 }
 0x2f1   :  { %v3713_v5 = vpop.permute.xlu1 %1655  ;;  %v1712_v6 = vsel %vm1696_vm7, %v1664_v16, 0.0  ;;  %v1665_v23 = vsel %vm1661_vm4, %v3657_v61, %v3679_v58  ;;  %v1945_v9 = vadd.s32 2, %v3619_v12  ;;  %v1278_v63 = vadd.f32 %v1270_v17, %v1006_v35 }
 0x2f2   :  { %v1719_v15 = vadd.f32 %v1711_v1, %v1455_v34  ;;  %v1685_v30 = vadd.s32 1, %v3630_v62  ;;  %v1718_v10 = vadd.f32 %v1710_v45, %v1454_v19  ;;  %vm1699_vm14 = vcmp.lt.s32.totalorder %v1683_v22, 8 }
 0x2f3   :  { %v1720_v52 = vadd.f32 %v1712_v6, %v1456_v24  ;;  %v1713_v53 = vsel %vm1697_vm8, %v1665_v23, 0.0  ;;  %v1666_v61 = vsel %vm1661_vm4, %v3679_v58, %v3713_v5  ;;  %vm1700_vm15 = vcmp.lt.s32.totalorder %v1684_v3, 8 }
 0x2f4   :  { %vm1961_vm0 = vcmp.lt.s32.totalorder %v1945_v9, 8  ;;  %v1949_v2 = vadd.s32 2, %v3630_v62  ;;  %v1946_v4 = vadd.s32 2, %v3621_v25  ;;  %vm1701_vm1 = vcmp.lt.s32.totalorder %v1685_v30, 8 }
 0x2f5   :  { %v1947_v55 = vadd.s32 2, %v3623_v8  ;;  %v1721_v43 = vadd.f32 %v1713_v53, %v1457_v57  ;;  %v1714_v58 = vsel %vm1698_vm13, %v1666_v61, 0.0  ;;  %v1948_v35 = vadd.s32 2, %v3625_v41 }
 0x2f6   :  { %vm1965_vm3 = vcmp.lt.s32.totalorder %v1949_v2, 8  ;;  %vm1962_vm2 = vcmp.lt.s32.totalorder %v1946_v4, 8  ;;  %v1722_v8 = vadd.f32 %v1714_v58, %v3733_v38  ;;  %v1461_v39 = vadd.f32 %v3581_v47, %v1278_v63 }
 0x2f7   :  { %vm1963_vm5 = vcmp.lt.s32.totalorder %v1947_v55, 8  ;;  %v2364_v53 = vmov 0   ;;  %v2365_v58 = vmov 1  }
 0x2f8   :  { %2322 = vset.pattern.permute.xlu1 %v2364_v53  ;;  %2323 = vset.pattern.permute.xlu0 %v2365_v58 }
 0x31f   :  { %v3692_v51 = vpop.permute.xlu0 %1909 }
 0x320   :  { %v1912_v32 = vpop.permute.xlu1 %1911 }
 0x321   :  { %v1926_v60 = vsel %vm1925_vm9, %v3692_v51, %v1912_v32 }
 0x322   :  { %v1974_v51 = vsel %vm1958_vm11, %v1926_v60, 0.0 }
 0x323   :  { %v1914_v37 = vpop.permute.xlu0 %1913  ;;  %v3776_v18 = vadd.f32 %v1974_v51, %v1718_v10 }
 0x324   :  { %v1927_v50 = vsel %vm1925_vm9, %v1912_v32, %v1914_v37  ;;  %v1658_v27 = vpop.permute.xlu1 %1657 }
 0x325   :  { %v1975_v11 = vsel %vm1959_vm10, %v1927_v50, 0.0  ;;  %v1667_v25 = vsel %vm1661_vm4, %v3713_v5, %v1658_v27  ;;  %v2003_v41 = vmul.f32 %v3776_v18, %v3776_v18 }
 0x326   :  { %v3772_v54 = vadd.f32 %v1975_v11, %v1719_v15  ;;  %v1715_v34 = vsel %vm1699_vm14, %v1667_v25, 0.0 }
 0x327   :  { %v1916_v33 = vpop.permute.xlu0 %1915  ;;  %v1723_v28 = vadd.f32 %v1715_v34, %v3738_v21 }
 0x328   :  { %v1928_v49 = vsel %vm1925_vm9, %v1914_v37, %v1916_v33  ;;  %v1660_v12 = vpop.permute.xlu1 %1659  ;;  %v2004_v62 = vmul.f32 %v3772_v54, %v3772_v54  ;;  %v2011_v5 = vadd.f32 %v3772_v54, %v3776_v18 }
 0x329   :  { %v1976_v36 = vsel %vm1960_vm12, %v1928_v49, 0.0  ;;  %v1668_v48 = vsel %vm1661_vm4, %v1658_v27, %v1660_v12  ;;  %v1677_v37 = vsel %vm1661_vm4, %v1660_v12, 0.0  ;;  %vm1964_vm4 = vcmp.lt.s32.totalorder %v1948_v35, 8 }
 0x32a   :  { %v3778_v31 = vadd.f32 %v1976_v36, %v1720_v52  ;;  %v1716_v24 = vsel %vm1700_vm15, %v1668_v48, 0.0  ;;  %v2012_v13 = vadd.f32 %v2004_v62, %v2003_v41  ;;  %v1717_v32 = vsel %vm1701_vm1, %v1677_v37, 0.0 }
 0x32b   :  { %v1725_v27 = vadd.f32 %v1717_v32, %v1461_v39 }
 0x32c   :  { %v2005_v19 = vmul.f32 %v3778_v31, %v3778_v31  ;;  %v2013_v38 = vadd.f32 %v2011_v5, %v3778_v31 }
 0x32e   :  { %v2014_v59 = vadd.f32 %v2012_v13, %v2005_v19 }
 0x353   :  { %v1918_v29 = vpop.permute.xlu0 %1917 }
 0x354   :  { %v1929_v20 = vsel %vm1925_vm9, %v1916_v33, %v1918_v29  ;;  %v1924_v42 = vpop.permute.xlu1 %1923  ;;  %v1724_v33 = vadd.f32 %v1716_v24, %v3741_v26 }
 0x355   :  { %v1977_v40 = vsel %vm1961_vm0, %v1929_v20, 0.0  ;;  %v1941_v17 = vsel %vm1925_vm9, %v1924_v42, 0.0  ;;  %v2044_v20 = vld [vmem:[%s3860_s2] sm:$0xff] }
 0x356   :  { %v3790_v0 = vadd.f32 %v1977_v40, %v1721_v43  ;;  %v1981_v3 = vsel %vm1965_vm3, %v1941_v17, 0.0 }
 0x357   :  { %v1920_v44 = vpop.permute.xlu0 %1919  ;;  %v1989_v26 = vadd.f32 %v1981_v3, %v1725_v27 }
 0x358   :  { %v1930_v46 = vsel %vm1925_vm9, %v1918_v29, %v1920_v44  ;;  %v2006_v14 = vmul.f32 %v3790_v0, %v3790_v0  ;;  %v2015_v7 = vadd.f32 %v2013_v38, %v3790_v0 }
 0x359   :  { %v1978_v57 = vsel %vm1962_vm2, %v1930_v46, 0.0  ;;  %v2010_v51 = vmul.f32 %v1989_v26, %v1989_v26 }
 0x35a   :  { %v1986_v56 = vadd.f32 %v1978_v57, %v1722_v8  ;;  %v2016_v6 = vadd.f32 %v2014_v59, %v2006_v14 }
 0x35b   :  { %v1922_v16 = vpop.permute.xlu0 %1921 }
 0x35c   :  { %v2007_v50 = vmul.f32 %v1986_v56, %v1986_v56  ;;  %v1931_v1 = vsel %vm1925_vm9, %v1920_v44, %v1922_v16  ;;  %v1932_v22 = vsel %vm1925_vm9, %v1922_v16, %v1924_v42  ;;  %v2017_v47 = vadd.f32 %v2015_v7, %v1986_v56 }
 0x35d   :  { %v1979_v45 = vsel %vm1963_vm5, %v1931_v1, 0.0  ;;  %v1980_v21 = vsel %vm1964_vm4, %v1932_v22, 0.0 }
 0x35e   :  { %v1987_v60 = vadd.f32 %v1979_v45, %v1723_v28  ;;  %v1988_v49 = vadd.f32 %v1980_v21, %v1724_v33  ;;  %v2018_v9 = vadd.f32 %v2016_v6, %v2007_v50 }
 0x360   :  { %v2019_v23 = vadd.f32 %v2017_v47, %v1987_v60  ;;  %v2008_v11 = vmul.f32 %v1987_v60, %v1987_v60  ;;  %v2009_v15 = vmul.f32 %v1988_v49, %v1988_v49 }
 0x362   :  { %v2021_v63 = vadd.f32 %v2019_v23, %v1988_v49  ;;  %v2020_v30 = vadd.f32 %v2018_v9, %v2008_v11 }
 0x364   :  { %v2023_v10 = vadd.f32 %v2021_v63, %v1989_v26  ;;  %v2022_v36 = vadd.f32 %v2020_v30, %v2009_v15 }
 0x366   :  { %2035 = vadd.xlane.f32.xlu0 %v2023_v10  ;;  %v2024_v52 = vadd.f32 %v2022_v36, %v2010_v51 }
 0x368   :  { %2038 = vadd.xlane.f32.xlu1 %v2024_v52 }
 0x3f3   :  { %v2036_v61 = vpop.xlane.xlu0 %2035 }
 0x3f4   :  { %v2040_v12 = vmul.f32 0.0009765625, %v2036_v61 }
 0x3f5   :  { %v2039_v2 = vpop.xlane.xlu1 %2038 }
 0x3f6   :  { %v2042_v4 = vmul.f32 %v2040_v12, %v2040_v12  ;;  %v2041_v29 = vmul.f32 0.0009765625, %v2039_v2 }
 0x3f8   :  { %v2043_v55 = vsub.f32 %v2041_v29, %v2042_v4 }
 0x3fa   :  { %v2045_v43 = vadd.f32 1e-05, %v2043_v55 }
 0x3fc   :  { %2342 = vrsqrt.f32 %v2045_v43 }
 0x406   :  { %v2343_v35 = vpop.eup %2342 }
 0x407   :  { %v2047_v62 = vmul.f32 %v2343_v35, %v2044_v20 }
 0x409   :  { %2056 = vperm.xlu1 %2322, %v2047_v62   ;;  %v2048_v25 = vmul.f32 %v2047_v62, %v2040_v12 }
 0x40b   :  { %2050 = vrot.lane.b32.xlu0 %v2048_v25, %s2361_s4 }
 0x47d   :  { %v2051_v48 = vpop.permute.xlu0 %2050 }
 0x47e   :  { %v2053_v40 = vsub.f32 %v2044_v20, %v2051_v48 }
 0x480   :  { %2061 = vperm.xlu0 %2323, %v2053_v40  }
 0x488   :  { %v2057_v37 = vpop.permute.xlu1 %2056 }
 0x489   :  { %v2072_v8 = vmul.f32 %v2057_v37, %v3776_v18  ;;  %v2073_v41 = vmul.f32 %v2057_v37, %v3772_v54  ;;  %v2074_v19 = vmul.f32 %v2057_v37, %v3778_v31  ;;  %v2075_v42 = vmul.f32 %v2057_v37, %v3790_v0 }
 0x48a   :  { %v2076_v44 = vmul.f32 %v2057_v37, %v1986_v56  ;;  %v2077_v5 = vmul.f32 %v2057_v37, %v1987_v60  ;;  %v2078_v34 = vmul.f32 %v2057_v37, %v1988_v49  ;;  %v2079_v38 = vmul.f32 %v2057_v37, %v1989_v26 }
 0x4ff   :  { %v2062_v24 = vpop.permute.xlu0 %2061 }
 0x500   :  { %v2080_v46 = vadd.f32 %v2072_v8, %v2062_v24  ;;  %v2081_v13 = vadd.f32 %v2073_v41, %v2062_v24  ;;  %v2082_v32 = vadd.f32 %v2074_v19, %v2062_v24  ;;  %v2083_v57 = vadd.f32 %v2075_v42, %v2062_v24 }
 0x501   :  { %v2084_v14 = vadd.f32 %v2076_v44, %v2062_v24  ;;  %v2085_v17 = vadd.f32 %v2077_v5, %v2062_v24  ;;  %v3824_v28 = vadd.f32 %v2078_v34, %v2062_v24  ;;  %v3826_v18 = vadd.f32 %v2079_v38, %v2062_v24 }
 0x502   :  { %v2096_v54 = vmin.f32 %v2080_v46, 0.0  ;;  %v2097_v59 = vmin.f32 %v2081_v13, 0.0  ;;  %v2098_v31 = vmin.f32 %v2082_v32, 0.0  ;;  %v2099_v39 = vmin.f32 %v2083_v57, 0.0 }
 0x503   :  { %v2100_v0 = vmin.f32 %v2084_v14, 0.0  ;;  %v2101_v56 = vmin.f32 %v2085_v17, 0.0  ;;  %v2102_v33 = vmin.f32 %v3824_v28, 0.0  ;;  %v2103_v1 = vmin.f32 %v3826_v18, 0.0 }
 0x504   :  { %v2104_v16 = vmul.f32 1.442695, %v2096_v54  ;;  %v2106_v7 = vmul.f32 1.442695, %v2097_v59  ;;  %v2108_v50 = vmul.f32 1.442695, %v2098_v31 }
 0x505   :  { %v2110_v22 = vmul.f32 1.442695, %v2099_v39  ;;  %v2112_v27 = vmul.f32 1.442695, %v2100_v0  ;;  %v2114_v3 = vmul.f32 1.442695, %v2101_v56 }
 0x506   :  { %2344 = vpow2.f32 %v2104_v16  ;;  %v2116_v45 = vmul.f32 1.442695, %v2102_v33  ;;  %v2118_v21 = vmul.f32 1.442695, %v2103_v1  ;;  %vm2088_vm6 = vcmp.gt.f32.partialorder %v2080_v46, 0.0 }
 0x507   :  { %2346 = vpow2.f32 %v2106_v7  ;;  %vm2089_vm7 = vcmp.gt.f32.partialorder %v2081_v13, 0.0  ;;  %vm2090_vm8 = vcmp.gt.f32.partialorder %v2082_v32, 0.0  ;;  %vm2091_vm9 = vcmp.gt.f32.partialorder %v2083_v57, 0.0 }
 0x508   :  { %2348 = vpow2.f32 %v2108_v50  ;;  %vm2092_vm10 = vcmp.gt.f32.partialorder %v2084_v14, 0.0  ;;  %vm2093_vm11 = vcmp.gt.f32.partialorder %v2085_v17, 0.0  ;;  %vm2094_vm12 = vcmp.gt.f32.partialorder %v3824_v28, 0.0 }
 0x509   :  { %2350 = vpow2.f32 %v2110_v22  ;;  %vm2095_vm13 = vcmp.gt.f32.partialorder %v3826_v18, 0.0 }
 0x50a   :  { %2352 = vpow2.f32 %v2112_v27 }
 0x50b   :  { %2354 = vpow2.f32 %v2114_v3 }
 0x50c   :  { %2356 = vpow2.f32 %v2116_v45 }
 0x50d   :  { %2358 = vpow2.f32 %v2118_v21 }
 0x510   :  { %v2345_v60 = vpop.eup %2344 }
 0x511   :  { %v2347_v49 = vpop.eup %2346  ;;  %v2308_v47 = vadd.f32 -1.0, %v2345_v60 }
 0x512   :  { %v2349_v6 = vpop.eup %2348  ;;  %v2309_v26 = vadd.f32 -1.0, %v2347_v49 }
 0x513   :  { %v2351_v23 = vpop.eup %2350  ;;  %v2310_v11 = vadd.f32 -1.0, %v2349_v6  ;;  %v2128_v9 = vsel %vm2088_vm6, %v2080_v46, %v2308_v47 }
 0x514   :  { %v2353_v63 = vpop.eup %2352  ;;  %v2311_v15 = vadd.f32 -1.0, %v2351_v23  ;;  %v2129_v30 = vsel %vm2089_vm7, %v2081_v13, %v2309_v26  ;;  %2136 = vst [vmem:[%s3861_s3] sm:$0xff] %v2128_v9 }
 0x515   :  { %v2355_v10 = vpop.eup %2354  ;;  %v2312_v51 = vadd.f32 -1.0, %v2353_v63  ;;  %v2130_v36 = vsel %vm2090_vm8, %v2082_v32, %v2310_v11  ;;  %2137 = vst [vmem:[%s3861_s3 + $0x8] sm:$0xff] %v2129_v30 }
 0x516   :  { %v2357_v52 = vpop.eup %2356  ;;  %v2313_v53 = vadd.f32 -1.0, %v2355_v10  ;;  %v2131_v61 = vsel %vm2091_vm9, %v2083_v57, %v2311_v15  ;;  %2138 = vst [vmem:[%s3861_s3 + $0x10] sm:$0xff] %v2130_v36 }
 0x517   :  { %v2359_v12 = vpop.eup %2358  ;;  %v2314_v2 = vadd.f32 -1.0, %v2357_v52  ;;  %v2132_v4 = vsel %vm2092_vm10, %v2084_v14, %v2312_v51  ;;  %2139 = vst [vmem:[%s3861_s3 + $0x18] sm:$0xff] %v2131_v61 }
 0x518   :  { %v2315_v29 = vadd.f32 -1.0, %v2359_v12  ;;  %v2133_v55 = vsel %vm2093_vm11, %v2085_v17, %v2313_v53  ;;  %2140 = vst [vmem:[%s3861_s3 + $0x20] sm:$0xff] %v2132_v4 }
 0x519   :  { %v2134_v43 = vsel %vm2094_vm12, %v3824_v28, %v2314_v2  ;;  %2141 = vst [vmem:[%s3861_s3 + $0x28] sm:$0xff] %v2133_v55 }
 0x51a   :  { %v2135_v58 = vsel %vm2095_vm13, %v3826_v18, %v2315_v29  ;;  %2142 = vst [vmem:[%s3861_s3 + $0x30] sm:$0xff] %v2134_v43 }
 0x51b   :  { %2143 = vst [vmem:[%s3861_s3 + $0x38] sm:$0xff] %v2135_v58 }

// kernel: down_transition_pallas.5
= control target key start
LH: loop header
LB: loop body
LE: loop exit
PB: predicated region body
PF: predicated region fallthrough
CT: control target
= control target key end

     0   :  { %vm736_vm0 = vcmask 588800   ;;  %vm740_vm1 = vcmask 1043456   ;;  %s2451_s12 = smov 2   ;;  %s2452_s15 = smov 1   ;;  %vm953_vm2 = vcmask 15360   ;;  %vm1217_vm10 = vcmask 7168   ;;  %s3988_s0 = inlined_call_operand.vmem [shape: bf16[200,1024], index: 0, kind: input, shape index: {}]   ;;  %s3989_s1 = inlined_call_operand.vmem [shape: bf16[5,8,200], index: 1, kind: input, shape index: {}]   ;;  %s3990_s2 = inlined_call_operand.vmem [shape: f32[8,2], index: 2, kind: input, shape index: {}]   ;;  %s3991_s3 = inlined_call_operand.vmem [shape: f32[8,1024], index: 3, kind: input, shape index: {}]   ;;  %s3992_s4 = inlined_call_operand.vmem [shape: f32[8,1024], index: 4, kind: output, shape index: {}]  }
   0x1   :  { %v24_v0 = vld [vmem:[%s3988_s0] sm:$0xff]  ;;  %v25_v2 = vld [vmem:[%s3988_s0 + $0x8] sm:$0xff]  ;;  %s2454_s18 = smov 126  }
   0x2   :  { %v28_v1 = vld [vmem:[%s3988_s0 + $0x20] sm:$0xff]  ;;  %v29_v4 = vld [vmem:[%s3988_s0 + $0x28] sm:$0xff] }
   0x3   :  { %v2491_v3 = vcombine.high %v24_v0, %v28_v1  ;;  %v2496_v5 = vcombine.low %v24_v0, %v28_v1  ;;  %v32_v6 = vld [vmem:[%s3988_s0 + $0x40] sm:$0xff]  ;;  %v2504_v8 = vcombine.high %v25_v2, %v29_v4  ;;  %v2506_v9 = vcombine.low %v25_v2, %v29_v4  ;;  %v33_v11 = vld [vmem:[%s3988_s0 + $0x48] sm:$0xff] }
   0x4   :  { %v36_v7 = vld [vmem:[%s3988_s0 + $0x60] sm:$0xff]  ;;  %v37_v12 = vld [vmem:[%s3988_s0 + $0x68] sm:$0xff] }
   0x5   :  { %4149 = vst [vmem:[#allocation3_spill] sm:$0xff] %v2491_v3  ;;  %4150 = vst [vmem:[#allocation4_spill] sm:$0xff] %v2496_v5  ;;  %v2508_v10 = vcombine.high %v32_v6, %v36_v7  ;;  %v40_v13 = vld [vmem:[%s3988_s0 + $0x80] sm:$0xff]  ;;  %765 = vmatprep.subr.bf16.mxu0 %v2491_v3  ;;  %v2520_v14 = vcombine.high %v33_v11, %v37_v12  ;;  %v41_v16 = vld [vmem:[%s3988_s0 + $0x88] sm:$0xff]  ;;  %806 = vmatprep.subr.bf16.mxu1 %v2504_v8 }
   0x6   :  { %4151 = vst [vmem:[#allocation5_spill] sm:$0xff] %v2504_v8  ;;  %4152 = vst [vmem:[#allocation6_spill] sm:$0xff] %v2506_v9  ;;  %v44_v15 = vld [vmem:[%s3988_s0 + $0xa0] sm:$0xff]  ;;  %v45_v17 = vld [vmem:[%s3988_s0 + $0xa8] sm:$0xff]  ;;  %766 = vmatpush1.bf16.msra.mxu0 %v2496_v5  ;;  %v2533_v18 = vcombine.low %v32_v6, %v36_v7  ;;  %807 = vmatpush1.bf16.msra.mxu1 %v2506_v9  ;;  %v2537_v19 = vcombine.low %v33_v11, %v37_v12 }
   0x7   :  { %4153 = vst [vmem:[#allocation7_spill] sm:$0xff] %v2508_v10  ;;  %4154 = vst [vmem:[#allocation8_spill] sm:$0xff] %v2520_v14  ;;  %767 = vmatprep.subr.bf16.mxu0 %v2508_v10  ;;  %v2539_v20 = vcombine.high %v40_v13, %v44_v15  ;;  %808 = vmatprep.subr.bf16.mxu1 %v2520_v14  ;;  %v2542_v21 = vcombine.high %v41_v16, %v45_v17  ;;  %v48_v22 = vld [vmem:[%s3988_s0 + $0xc0] sm:$0xff]  ;;  %v49_v24 = vld [vmem:[%s3988_s0 + $0xc8] sm:$0xff] }
   0x8   :  { %v52_v23 = vld [vmem:[%s3988_s0 + $0xe0] sm:$0xff]  ;;  %v53_v25 = vld [vmem:[%s3988_s0 + $0xe8] sm:$0xff]  ;;  %v2557_v26 = vcombine.low %v40_v13, %v44_v15  ;;  %v2561_v27 = vcombine.low %v41_v16, %v45_v17 }
   0x9   :  { %v2563_v28 = vcombine.high %v48_v22, %v52_v23  ;;  %v2566_v29 = vcombine.high %v49_v24, %v53_v25  ;;  %v56_v30 = vld [vmem:[%s3988_s0 + $0x100] sm:$0xff]  ;;  %v57_v32 = vld [vmem:[%s3988_s0 + $0x108] sm:$0xff]  ;;  %v2581_v34 = vcombine.low %v48_v22, %v52_v23  ;;  %v2585_v35 = vcombine.low %v49_v24, %v53_v25 }
   0xa   :  { %768 = vmatpush1.bf16.msra.mxu0 %v2533_v18  ;;  %809 = vmatpush1.bf16.msra.mxu1 %v2537_v19  ;;  %v60_v31 = vld [vmem:[%s3988_s0 + $0x120] sm:$0xff]  ;;  %v61_v33 = vld [vmem:[%s3988_s0 + $0x128] sm:$0xff] }
   0xb   :  { %769 = vmatprep.subr.bf16.mxu0 %v2539_v20  ;;  %810 = vmatprep.subr.bf16.mxu1 %v2542_v21  ;;  %v2587_v36 = vcombine.high %v56_v30, %v60_v31  ;;  %v2590_v37 = vcombine.high %v57_v32, %v61_v33  ;;  %v64_v38 = vld [vmem:[%s3988_s0 + $0x140] sm:$0xff]  ;;  %v65_v40 = vld [vmem:[%s3988_s0 + $0x148] sm:$0xff]  ;;  %v2605_v42 = vcombine.low %v56_v30, %v60_v31 }
   0xc   :  { %v68_v39 = vld [vmem:[%s3988_s0 + $0x160] sm:$0xff]  ;;  %v69_v41 = vld [vmem:[%s3988_s0 + $0x168] sm:$0xff]  ;;  %v2614_v44 = vcombine.low %v57_v32, %v61_v33 }
   0xd   :  { %v2610_v43 = vld [vmem:[%s3989_s1] sm:$0xff]  ;;  %v2616_v45 = vcombine.high %v64_v38, %v68_v39  ;;  %v2619_v46 = vcombine.high %v65_v40, %v69_v41  ;;  %v73_v50 = vld [vmem:[%s3988_s0 + $0x188] sm:$0xff]  ;;  %v2638_v52 = vcombine.low %v64_v38, %v68_v39  ;;  %v2644_v53 = vcombine.low %v65_v40, %v69_v41 }
   0xe   :  { %770 = vmatpush1.bf16.msra.mxu0 %v2557_v26  ;;  %811 = vmatpush1.bf16.msra.mxu1 %v2561_v27  ;;  %v72_v47 = vld [vmem:[%s3988_s0 + $0x180] sm:$0xff]  ;;  %v2629_v49 = vcombine.high %v2610_v43, %v2610_v43  ;;  %v77_v51 = vld [vmem:[%s3988_s0 + $0x1a8] sm:$0xff] }
   0xf   :  { %771 = vmatprep.subr.bf16.mxu0 %v2563_v28  ;;  %812 = vmatprep.subr.bf16.mxu1 %v2566_v29  ;;  %v76_v48 = vld [vmem:[%s3988_s0 + $0x1a0] sm:$0xff]  ;;  %v2649_v55 = vcombine.high %v73_v50, %v77_v51  ;;  %v81_v58 = vld [vmem:[%s3988_s0 + $0x1c8] sm:$0xff]  ;;  %v2670_v61 = vcombine.low %v73_v50, %v77_v51 }
  0x10   :  { %2324 = vmatprep.mubr.msk.bf16.mxu0 %vm736_vm0, %v2629_v49  ;;  %v2646_v54 = vcombine.high %v72_v47, %v76_v48  ;;  %v80_v56 = vld [vmem:[%s3988_s0 + $0x1c0] sm:$0xff]  ;;  %2326 = vmatprep.mubr.msk.bf16.mxu1 %vm736_vm0, %v2629_v49  ;;  %v85_v59 = vld [vmem:[%s3988_s0 + $0x1e8] sm:$0xff]  ;;  %v2666_v60 = vcombine.low %v72_v47, %v76_v48 }
  0x11   :  { %v84_v57 = vld [vmem:[%s3988_s0 + $0x1e0] sm:$0xff]  ;;  %4156 = vst [vmem:[#allocation10_spill] sm:$0xff] %v2670_v61  ;;  %v2675_v63 = vcombine.high %v81_v58, %v85_v59  ;;  %v89_v2 = vld [vmem:[%s3988_s0 + $0x208] sm:$0xff]  ;;  %v2694_v7 = vcombine.low %v81_v58, %v85_v59 }
  0x12   :  { %772 = vmatpush1.bf16.msra.mxu0 %v2581_v34  ;;  %813 = vmatpush1.bf16.msra.mxu1 %v2585_v35  ;;  %4155 = vst [vmem:[#allocation9_spill] sm:$0xff] %v2666_v60  ;;  %v2672_v62 = vcombine.high %v80_v56, %v84_v57  ;;  %v88_v0 = vld [vmem:[%s3988_s0 + $0x200] sm:$0xff]  ;;  %v93_v4 = vld [vmem:[%s3988_s0 + $0x228] sm:$0xff]  ;;  %v2690_v6 = vcombine.low %v80_v56, %v84_v57 }
  0x13   :  { %773 = vmatprep.subr.bf16.mxu0 %v2587_v36  ;;  %814 = vmatprep.subr.bf16.mxu1 %v2590_v37  ;;  %4158 = vst [vmem:[#allocation12_spill] sm:$0xff] %v2675_v63  ;;  %v92_v1 = vld [vmem:[%s3988_s0 + $0x220] sm:$0xff]  ;;  %4160 = vst [vmem:[#allocation14_spill] sm:$0xff] %v2694_v7  ;;  %v2699_v12 = vcombine.high %v89_v2, %v93_v4  ;;  %v97_v16 = vld [vmem:[%s3988_s0 + $0x248] sm:$0xff]  ;;  %v2718_v23 = vcombine.low %v89_v2, %v93_v4 }
  0x14   :  { %4157 = vst [vmem:[#allocation11_spill] sm:$0xff] %v2672_v62  ;;  %4159 = vst [vmem:[#allocation13_spill] sm:$0xff] %v2690_v6  ;;  %v2696_v11 = vcombine.high %v88_v0, %v92_v1  ;;  %v96_v13 = vld [vmem:[%s3988_s0 + $0x240] sm:$0xff]  ;;  %v101_v17 = vld [vmem:[%s3988_s0 + $0x268] sm:$0xff]  ;;  %v2714_v22 = vcombine.low %v88_v0, %v92_v1 }
  0x15   :  { %4162 = vst [vmem:[#allocation16_spill] sm:$0xff] %v2699_v12  ;;  %v100_v15 = vld [vmem:[%s3988_s0 + $0x260] sm:$0xff]  ;;  %4164 = vst [vmem:[#allocation18_spill] sm:$0xff] %v2718_v23  ;;  %v2723_v25 = vcombine.high %v97_v16, %v101_v17  ;;  %v105_v32 = vld [vmem:[%s3988_s0 + $0x288] sm:$0xff]  ;;  %v2742_v39 = vcombine.low %v97_v16, %v101_v17 }
  0x16   :  { %774 = vmatpush1.bf16.msra.mxu0 %v2605_v42  ;;  %815 = vmatpush1.bf16.msra.mxu1 %v2614_v44  ;;  %4161 = vst [vmem:[#allocation15_spill] sm:$0xff] %v2696_v11  ;;  %4163 = vst [vmem:[#allocation17_spill] sm:$0xff] %v2714_v22  ;;  %v2720_v24 = vcombine.high %v96_v13, %v100_v15  ;;  %v104_v30 = vld [vmem:[%s3988_s0 + $0x280] sm:$0xff]  ;;  %v109_v33 = vld [vmem:[%s3988_s0 + $0x2a8] sm:$0xff]  ;;  %v2738_v38 = vcombine.low %v96_v13, %v100_v15 }
  0x17   :  { %775 = vmatprep.subr.bf16.mxu0 %v2616_v45  ;;  %816 = vmatprep.subr.bf16.mxu1 %v2619_v46  ;;  %4166 = vst [vmem:[#allocation20_spill] sm:$0xff] %v2723_v25  ;;  %v108_v31 = vld [vmem:[%s3988_s0 + $0x2a0] sm:$0xff]  ;;  %4168 = vst [vmem:[#allocation22_spill] sm:$0xff] %v2742_v39  ;;  %v2747_v41 = vcombine.high %v105_v32, %v109_v33  ;;  %v113_v50 = vld [vmem:[%s3988_s0 + $0x2c8] sm:$0xff]  ;;  %v2766_v57 = vcombine.low %v105_v32, %v109_v33 }
  0x18   :  { %4165 = vst [vmem:[#allocation19_spill] sm:$0xff] %v2720_v24  ;;  %4167 = vst [vmem:[#allocation21_spill] sm:$0xff] %v2738_v38  ;;  %v2744_v40 = vcombine.high %v104_v30, %v108_v31  ;;  %v112_v47 = vld [vmem:[%s3988_s0 + $0x2c0] sm:$0xff]  ;;  %v117_v51 = vld [vmem:[%s3988_s0 + $0x2e8] sm:$0xff]  ;;  %v2762_v56 = vcombine.low %v104_v30, %v108_v31 }
  0x19   :  { %4170 = vst [vmem:[#allocation24_spill] sm:$0xff] %v2747_v41  ;;  %v116_v48 = vld [vmem:[%s3988_s0 + $0x2e0] sm:$0xff]  ;;  %4172 = vst [vmem:[#allocation26_spill] sm:$0xff] %v2766_v57  ;;  %v2771_v59 = vcombine.high %v113_v50, %v117_v51  ;;  %v121_v1 = vld [vmem:[%s3988_s0 + $0x308] sm:$0xff]  ;;  %v2784_v4 = vcombine.low %v113_v50, %v117_v51 }
  0x1a   :  { %776 = vmatpush1.bf16.msra.mxu0 %v2638_v52  ;;  %817 = vmatpush1.bf16.msra.mxu1 %v2644_v53  ;;  %4169 = vst [vmem:[#allocation23_spill] sm:$0xff] %v2744_v40  ;;  %4171 = vst [vmem:[#allocation25_spill] sm:$0xff] %v2762_v56  ;;  %v2768_v58 = vcombine.high %v112_v47, %v116_v48  ;;  %v120_v0 = vld [vmem:[%s3988_s0 + $0x300] sm:$0xff]  ;;  %v2780_v2 = vcombine.low %v112_v47, %v116_v48  ;;  %v26_v30 = vld [vmem:[%s3988_s0 + $0x10] sm:$0xff] }
  0x1b   :  { %777 = vmatprep.subr.bf16.mxu0 %v2646_v54  ;;  %818 = vmatprep.subr.bf16.mxu1 %v2649_v55  ;;  %4174 = vst [vmem:[#allocation28_spill] sm:$0xff] %v2771_v59  ;;  %4176 = vst [vmem:[#allocation30_spill] sm:$0xff] %v2784_v4  ;;  %v2786_v13 = vcombine.high %v120_v0, %v120_v0  ;;  %v2315_v15 = vcombine.low %v120_v0, %v120_v0  ;;  %v30_v31 = vld [vmem:[%s3988_s0 + $0x30] sm:$0xff]  ;;  %v27_v32 = vld [vmem:[%s3988_s0 + $0x18] sm:$0xff] }
  0x1c   :  { %4173 = vst [vmem:[#allocation27_spill] sm:$0xff] %v2768_v58  ;;  %4175 = vst [vmem:[#allocation29_spill] sm:$0xff] %v2780_v2  ;;  %v2789_v16 = vcombine.high %v121_v1, %v121_v1  ;;  %v2317_v17 = vcombine.low %v121_v1, %v121_v1  ;;  %v31_v33 = vld [vmem:[%s3988_s0 + $0x38] sm:$0xff]  ;;  %v2810_v48 = vcombine.high %v26_v30, %v30_v31  ;;  %v34_v0 = vld [vmem:[%s3988_s0 + $0x50] sm:$0xff] }
  0x1d   :  { %4177 = vst [vmem:[#allocation31_spill] sm:$0xff] %v2786_v13  ;;  %v2808_v47 = vsel %vm740_vm1, %v2315_v15, 0  ;;  %v2817_v51 = vcombine.high %v27_v32, %v31_v33  ;;  %v38_v1 = vld [vmem:[%s3988_s0 + $0x70] sm:$0xff]  ;;  %v2827_v15 = vcombine.low %v2610_v43, %v2610_v43 }
  0x1e   :  { %778 = vmatpush1.bf16.msra.mxu0 %v2666_v60  ;;  %819 = vmatpush1.bf16.msra.mxu1 %v2670_v61  ;;  %4178 = vst [vmem:[#allocation32_spill] sm:$0xff] %v2789_v16  ;;  %4179 = vst [vmem:[#allocation33_spill] sm:$0xff] %v2808_v47  ;;  %v2815_v50 = vsel %vm740_vm1, %v2317_v17, 0  ;;  %v39_v17 = vld [vmem:[%s3988_s0 + $0x78] sm:$0xff]  ;;  %v2842_v43 = vcombine.high %v34_v0, %v38_v1 }
  0x1f   :  { %779 = vmatprep.subr.bf16.mxu0 %v2672_v62  ;;  %820 = vmatprep.subr.bf16.mxu1 %v2675_v63  ;;  %4180 = vst [vmem:[#allocation34_spill] sm:$0xff] %v2810_v48  ;;  %4181 = vst [vmem:[#allocation35_spill] sm:$0xff] %v2815_v50 }
  0x20   :  { %4182 = vst [vmem:[#allocation36_spill] sm:$0xff] %v2817_v51  ;;  %4185 = vst [vmem:[#allocation39_spill] sm:$0xff] %v2842_v43 }
  0x22   :  { %780 = vmatpush1.bf16.msra.mxu0 %v2690_v6  ;;  %821 = vmatpush1.bf16.msra.mxu1 %v2694_v7 }
  0x23   :  { %781 = vmatprep.subr.bf16.mxu0 %v2696_v11  ;;  %822 = vmatprep.subr.bf16.mxu1 %v2699_v12 }
  0x26   :  { %782 = vmatpush1.bf16.msra.mxu0 %v2714_v22  ;;  %823 = vmatpush1.bf16.msra.mxu1 %v2718_v23 }
  0x27   :  { %783 = vmatprep.subr.bf16.mxu0 %v2720_v24  ;;  %824 = vmatprep.subr.bf16.mxu1 %v2723_v25 }
  0x2a   :  { %784 = vmatpush1.bf16.msra.mxu0 %v2738_v38  ;;  %825 = vmatpush1.bf16.msra.mxu1 %v2742_v39 }
  0x2b   :  { %785 = vmatprep.subr.bf16.mxu0 %v2744_v40  ;;  %826 = vmatprep.subr.bf16.mxu1 %v2747_v41 }
  0x2e   :  { %786 = vmatpush1.bf16.msra.mxu0 %v2762_v56  ;;  %827 = vmatpush1.bf16.msra.mxu1 %v2766_v57 }
  0x2f   :  { %787 = vmatprep.subr.bf16.mxu0 %v2768_v58  ;;  %828 = vmatprep.subr.bf16.mxu1 %v2771_v59  ;;  %v42_v59 = vld [vmem:[%s3988_s0 + $0x90] sm:$0xff] }
  0x32   :  { %788 = vmatpush1.bf16.msra.mxu0 %v2780_v2  ;;  %829 = vmatpush1.bf16.msra.mxu1 %v2784_v4  ;;  %v2840_v4 = vcombine.low %v27_v32, %v31_v33  ;;  %v47_v32 = vld [vmem:[%s3988_s0 + $0xb8] sm:$0xff]  ;;  %v2862_v33 = vcombine.low %v34_v0, %v38_v1  ;;  %v54_v0 = vld [vmem:[%s3988_s0 + $0xf0] sm:$0xff] }
  0x33   :  { %2323 = vmatprep.subr.msk.bf16.mxu0 %vm740_vm1, %v2786_v13  ;;  %2325 = vmatprep.subr.msk.bf16.mxu1 %vm740_vm1, %v2789_v16  ;;  %v35_v16 = vld [vmem:[%s3988_s0 + $0x58] sm:$0xff]  ;;  %v2836_v13 = vcombine.low %v26_v30, %v30_v31  ;;  %v46_v30 = vld [vmem:[%s3988_s0 + $0xb0] sm:$0xff] }
  0x34   :  { %4184 = vst [vmem:[#allocation38_spill] sm:$0xff] %v2840_v4  ;;  %v2845_v2 = vcombine.high %v35_v16, %v39_v17  ;;  %v43_v31 = vld [vmem:[%s3988_s0 + $0x98] sm:$0xff]  ;;  %4187 = vst [vmem:[#allocation41_spill] sm:$0xff] %v2862_v33 }
  0x35   :  { %4183 = vst [vmem:[#allocation37_spill] sm:$0xff] %v2836_v13  ;;  %v55_v1 = vld [vmem:[%s3988_s0 + $0xf8] sm:$0xff] }
  0x36   :  { %790 = vmatpush1.bf16.msra.mxu0 %v2808_v47  ;;  %831 = vmatpush1.bf16.msra.mxu1 %v2815_v50  ;;  %4186 = vst [vmem:[#allocation40_spill] sm:$0xff] %v2845_v2  ;;  %v2871_v50 = vcombine.high %v43_v31, %v47_v32  ;;  %v50_v47 = vld [vmem:[%s3988_s0 + $0xd0] sm:$0xff] }
  0x37   :  { %847 = vmatprep.subr.bf16.mxu0 %v2810_v48  ;;  %888 = vmatprep.subr.bf16.mxu1 %v2817_v51  ;;  %v2866_v51 = vcombine.low %v35_v16, %v39_v17  ;;  %v2868_v48 = vcombine.high %v42_v59, %v46_v30  ;;  %v51_v16 = vld [vmem:[%s3988_s0 + $0xd8] sm:$0xff]  ;;  %v2890_v17 = vcombine.low %v42_v59, %v46_v30  ;;  %v62_v59 = vld [vmem:[%s3988_s0 + $0x130] sm:$0xff] }
  0x38   :  { %4190 = vst [vmem:[#allocation44_spill] sm:$0xff] %v2871_v50  ;;  %v59_v30 = vld [vmem:[%s3988_s0 + $0x118] sm:$0xff] }
  0x39   :  { %798 = vmatmul.mubr.bf16.vlgmr.msra.gmra.mrb[0].mxu0 %v2827_v15  ;;  %839 = vmatmul.mubr.bf16.vlgmr.msra.gmra.mrb[0].mxu1 %v2827_v15  ;;  %4188 = vst [vmem:[#allocation42_spill] sm:$0xff] %v2866_v51  ;;  %4189 = vst [vmem:[#allocation43_spill] sm:$0xff] %v2868_v48 }
  0x3a   :  { %848 = vmatpush1.bf16.msra.mxu0 %v2836_v13  ;;  %889 = vmatpush1.bf16.msra.mxu1 %v2840_v4  ;;  %4191 = vst [vmem:[#allocation45_spill] sm:$0xff] %v2890_v17  ;;  %v2899_v4 = vcombine.high %v51_v16, %v55_v1 }
  0x3b   :  { %849 = vmatprep.subr.bf16.mxu0 %v2842_v43  ;;  %890 = vmatprep.subr.bf16.mxu1 %v2845_v2  ;;  %v2894_v2 = vcombine.low %v43_v31, %v47_v32  ;;  %v2896_v43 = vcombine.high %v50_v47, %v54_v0  ;;  %v63_v31 = vld [vmem:[%s3988_s0 + $0x138] sm:$0xff]  ;;  %v2914_v32 = vcombine.low %v50_v47, %v54_v0  ;;  %v70_v47 = vld [vmem:[%s3988_s0 + $0x170] sm:$0xff] }
  0x3c   :  { %2328 = vmatprep.mubr.msk.bf16.mxu0 %vm736_vm0, %v2629_v49  ;;  %2330 = vmatprep.mubr.msk.bf16.mxu1 %vm736_vm0, %v2629_v49  ;;  %4194 = vst [vmem:[#allocation48_spill] sm:$0xff] %v2899_v4  ;;  %v58_v49 = vld [vmem:[%s3988_s0 + $0x110] sm:$0xff]  ;;  %v67_v0 = vld [vmem:[%s3988_s0 + $0x158] sm:$0xff] }
  0x3d   :  { %4192 = vst [vmem:[#allocation46_spill] sm:$0xff] %v2894_v2  ;;  %4193 = vst [vmem:[#allocation47_spill] sm:$0xff] %v2896_v43 }
  0x3e   :  { %850 = vmatpush1.bf16.msra.mxu0 %v2862_v33  ;;  %891 = vmatpush1.bf16.msra.mxu1 %v2866_v51  ;;  %4195 = vst [vmem:[#allocation49_spill] sm:$0xff] %v2914_v32  ;;  %v2923_v51 = vcombine.high %v59_v30, %v63_v31  ;;  %v66_v33 = vld [vmem:[%s3988_s0 + $0x150] sm:$0xff] }
  0x3f   :  { %851 = vmatprep.subr.bf16.mxu0 %v2868_v48  ;;  %892 = vmatprep.subr.bf16.mxu1 %v2871_v50  ;;  %v2918_v50 = vcombine.low %v51_v16, %v55_v1  ;;  %v2920_v48 = vcombine.high %v58_v49, %v62_v59  ;;  %v71_v16 = vld [vmem:[%s3988_s0 + $0x178] sm:$0xff]  ;;  %v2938_v1 = vcombine.low %v58_v49, %v62_v59  ;;  %v78_v49 = vld [vmem:[%s3988_s0 + $0x1b0] sm:$0xff] }
  0x40   :  { %4198 = vst [vmem:[#allocation52_spill] sm:$0xff] %v2923_v51  ;;  %v75_v59 = vld [vmem:[%s3988_s0 + $0x198] sm:$0xff] }
  0x41   :  { %4196 = vst [vmem:[#allocation50_spill] sm:$0xff] %v2918_v50  ;;  %4197 = vst [vmem:[#allocation51_spill] sm:$0xff] %v2920_v48 }
  0x42   :  { %852 = vmatpush1.bf16.msra.mxu0 %v2890_v17  ;;  %893 = vmatpush1.bf16.msra.mxu1 %v2894_v2  ;;  %4199 = vst [vmem:[#allocation53_spill] sm:$0xff] %v2938_v1  ;;  %v2947_v2 = vcombine.high %v67_v0, %v71_v16  ;;  %v74_v17 = vld [vmem:[%s3988_s0 + $0x190] sm:$0xff] }
  0x43   :  { %853 = vmatprep.subr.bf16.mxu0 %v2896_v43  ;;  %894 = vmatprep.subr.bf16.mxu1 %v2899_v4  ;;  %v2942_v4 = vcombine.low %v59_v30, %v63_v31  ;;  %v2944_v43 = vcombine.high %v66_v33, %v70_v47  ;;  %v79_v30 = vld [vmem:[%s3988_s0 + $0x1b8] sm:$0xff]  ;;  %v2962_v31 = vcombine.low %v66_v33, %v70_v47  ;;  %v86_v33 = vld [vmem:[%s3988_s0 + $0x1f0] sm:$0xff] }
  0x44   :  { %4202 = vst [vmem:[#allocation56_spill] sm:$0xff] %v2947_v2  ;;  %v83_v47 = vld [vmem:[%s3988_s0 + $0x1d8] sm:$0xff] }
  0x45   :  { %4200 = vst [vmem:[#allocation54_spill] sm:$0xff] %v2942_v4  ;;  %4201 = vst [vmem:[#allocation55_spill] sm:$0xff] %v2944_v43 }
  0x46   :  { %854 = vmatpush1.bf16.msra.mxu0 %v2914_v32  ;;  %895 = vmatpush1.bf16.msra.mxu1 %v2918_v50  ;;  %4203 = vst [vmem:[#allocation57_spill] sm:$0xff] %v2962_v31  ;;  %v2971_v50 = vcombine.high %v75_v59, %v79_v30  ;;  %v82_v32 = vld [vmem:[%s3988_s0 + $0x1d0] sm:$0xff] }
  0x47   :  { %855 = vmatprep.subr.bf16.mxu0 %v2920_v48  ;;  %896 = vmatprep.subr.bf16.mxu1 %v2923_v51  ;;  %v2966_v51 = vcombine.low %v67_v0, %v71_v16  ;;  %v2968_v48 = vcombine.high %v74_v17, %v78_v49  ;;  %v87_v0 = vld [vmem:[%s3988_s0 + $0x1f8] sm:$0xff]  ;;  %v2986_v16 = vcombine.low %v74_v17, %v78_v49  ;;  %v94_v17 = vld [vmem:[%s3988_s0 + $0x230] sm:$0xff] }
  0x48   :  { %4206 = vst [vmem:[#allocation60_spill] sm:$0xff] %v2971_v50  ;;  %v91_v49 = vld [vmem:[%s3988_s0 + $0x218] sm:$0xff] }
  0x49   :  { %4204 = vst [vmem:[#allocation58_spill] sm:$0xff] %v2966_v51  ;;  %4205 = vst [vmem:[#allocation59_spill] sm:$0xff] %v2968_v48 }
  0x4a   :  { %856 = vmatpush1.bf16.msra.mxu0 %v2938_v1  ;;  %897 = vmatpush1.bf16.msra.mxu1 %v2942_v4  ;;  %4207 = vst [vmem:[#allocation61_spill] sm:$0xff] %v2986_v16  ;;  %v2995_v4 = vcombine.high %v83_v47, %v87_v0  ;;  %v90_v1 = vld [vmem:[%s3988_s0 + $0x210] sm:$0xff] }
  0x4b   :  { %857 = vmatprep.subr.bf16.mxu0 %v2944_v43  ;;  %898 = vmatprep.subr.bf16.mxu1 %v2947_v2  ;;  %v2990_v2 = vcombine.low %v75_v59, %v79_v30  ;;  %v2992_v43 = vcombine.high %v82_v32, %v86_v33  ;;  %v95_v59 = vld [vmem:[%s3988_s0 + $0x238] sm:$0xff]  ;;  %v3010_v30 = vcombine.low %v82_v32, %v86_v33  ;;  %v102_v32 = vld [vmem:[%s3988_s0 + $0x270] sm:$0xff] }
  0x4c   :  { %4210 = vst [vmem:[#allocation64_spill] sm:$0xff] %v2995_v4  ;;  %v99_v33 = vld [vmem:[%s3988_s0 + $0x258] sm:$0xff] }
  0x4d   :  { %4208 = vst [vmem:[#allocation62_spill] sm:$0xff] %v2990_v2  ;;  %4209 = vst [vmem:[#allocation63_spill] sm:$0xff] %v2992_v43 }
  0x4e   :  { %858 = vmatpush1.bf16.msra.mxu0 %v2962_v31  ;;  %899 = vmatpush1.bf16.msra.mxu1 %v2966_v51  ;;  %4211 = vst [vmem:[#allocation65_spill] sm:$0xff] %v3010_v30  ;;  %v3019_v51 = vcombine.high %v91_v49, %v95_v59  ;;  %v98_v31 = vld [vmem:[%s3988_s0 + $0x250] sm:$0xff] }
  0x4f   :  { %859 = vmatprep.subr.bf16.mxu0 %v2968_v48  ;;  %900 = vmatprep.subr.bf16.mxu1 %v2971_v50  ;;  %v3014_v50 = vcombine.low %v83_v47, %v87_v0  ;;  %v3016_v48 = vcombine.high %v90_v1, %v94_v17  ;;  %v103_v47 = vld [vmem:[%s3988_s0 + $0x278] sm:$0xff]  ;;  %v3034_v0 = vcombine.low %v90_v1, %v94_v17  ;;  %v110_v1 = vld [vmem:[%s3988_s0 + $0x2b0] sm:$0xff] }
  0x50   :  { %4214 = vst [vmem:[#allocation68_spill] sm:$0xff] %v3019_v51  ;;  %v107_v17 = vld [vmem:[%s3988_s0 + $0x298] sm:$0xff] }
  0x51   :  { %4212 = vst [vmem:[#allocation66_spill] sm:$0xff] %v3014_v50  ;;  %4213 = vst [vmem:[#allocation67_spill] sm:$0xff] %v3016_v48 }
  0x52   :  { %860 = vmatpush1.bf16.msra.mxu0 %v2986_v16  ;;  %901 = vmatpush1.bf16.msra.mxu1 %v2990_v2  ;;  %4215 = vst [vmem:[#allocation69_spill] sm:$0xff] %v3034_v0  ;;  %v3043_v2 = vcombine.high %v99_v33, %v103_v47  ;;  %v106_v16 = vld [vmem:[%s3988_s0 + $0x290] sm:$0xff] }
  0x53   :  { %861 = vmatprep.subr.bf16.mxu0 %v2992_v43  ;;  %902 = vmatprep.subr.bf16.mxu1 %v2995_v4  ;;  %v3038_v4 = vcombine.low %v91_v49, %v95_v59  ;;  %v3040_v43 = vcombine.high %v98_v31, %v102_v32  ;;  %v111_v49 = vld [vmem:[%s3988_s0 + $0x2b8] sm:$0xff]  ;;  %v3058_v59 = vcombine.low %v98_v31, %v102_v32  ;;  %v118_v31 = vld [vmem:[%s3988_s0 + $0x2f0] sm:$0xff] }
  0x54   :  { %4218 = vst [vmem:[#allocation72_spill] sm:$0xff] %v3043_v2  ;;  %v115_v32 = vld [vmem:[%s3988_s0 + $0x2d8] sm:$0xff] }
  0x55   :  { %4216 = vst [vmem:[#allocation70_spill] sm:$0xff] %v3038_v4  ;;  %4217 = vst [vmem:[#allocation71_spill] sm:$0xff] %v3040_v43 }
  0x56   :  { %862 = vmatpush1.bf16.msra.mxu0 %v3010_v30  ;;  %903 = vmatpush1.bf16.msra.mxu1 %v3014_v50  ;;  %v3067_v50 = vcombine.high %v107_v17, %v111_v49  ;;  %v114_v30 = vld [vmem:[%s3988_s0 + $0x2d0] sm:$0xff] }
  0x57   :  { %863 = vmatprep.subr.bf16.mxu0 %v3016_v48  ;;  %904 = vmatprep.subr.bf16.mxu1 %v3019_v51  ;;  %v3062_v51 = vcombine.low %v99_v33, %v103_v47  ;;  %v3064_v48 = vcombine.high %v106_v16, %v110_v1  ;;  %v119_v33 = vld [vmem:[%s3988_s0 + $0x2f8] sm:$0xff]  ;;  %v3082_v47 = vcombine.low %v106_v16, %v110_v1 }
  0x58   :  { %4221 = vst [vmem:[#allocation75_spill] sm:$0xff] %v3067_v50  ;;  %v123_v16 = vld [vmem:[%s3988_s0 + $0x318] sm:$0xff]  ;;  %v3100_v1 = vcombine.low %v114_v30, %v118_v31 }
  0x59   :  { %4219 = vst [vmem:[#allocation73_spill] sm:$0xff] %v3062_v51  ;;  %4220 = vst [vmem:[#allocation74_spill] sm:$0xff] %v3064_v48 }
  0x5a   :  { %864 = vmatpush1.bf16.msra.mxu0 %v3034_v0  ;;  %905 = vmatpush1.bf16.msra.mxu1 %v3038_v4  ;;  %4222 = vst [vmem:[#allocation76_spill] sm:$0xff] %v3082_v47  ;;  %v3091_v4 = vcombine.high %v115_v32, %v119_v33  ;;  %v122_v0 = vld [vmem:[%s3988_s0 + $0x310] sm:$0xff]  ;;  %4226 = vst [vmem:[#allocation80_spill] sm:$0xff] %v3100_v1 }
  0x5b   :  { %865 = vmatprep.subr.bf16.mxu0 %v3040_v43  ;;  %906 = vmatprep.subr.bf16.mxu1 %v3043_v2  ;;  %v3086_v2 = vcombine.low %v107_v17, %v111_v49  ;;  %v3088_v43 = vcombine.high %v114_v30, %v118_v31  ;;  %v3104_v17 = vcombine.low %v115_v32, %v119_v33  ;;  %v2331_v31 = vld [vmem:[%s3989_s1 + $0x8] sm:$0xff]  ;;  %v4234_v32 = vld [vmem:[#allocation30_spill] sm:$0xff]  ;;  %v4235_v33 = vld [vmem:[#allocation31_spill] sm:$0xff] }
  0x5c   :  { %4225 = vst [vmem:[#allocation79_spill] sm:$0xff] %v3091_v4  ;;  %v3106_v49 = vcombine.high %v122_v0, %v122_v0 }
  0x5d   :  { %4223 = vst [vmem:[#allocation77_spill] sm:$0xff] %v3086_v2  ;;  %4224 = vst [vmem:[#allocation78_spill] sm:$0xff] %v3088_v43 }
  0x5e   :  { %866 = vmatpush1.bf16.msra.mxu0 %v3058_v59  ;;  %907 = vmatpush1.bf16.msra.mxu1 %v3062_v51  ;;  %4227 = vst [vmem:[#allocation81_spill] sm:$0xff] %v3104_v17  ;;  %4228 = vst [vmem:[#allocation82_spill] sm:$0xff] %v3106_v49  ;;  %v2321_v51 = vcombine.low %v123_v16, %v123_v16 }
  0x5f   :  { %867 = vmatprep.subr.bf16.mxu0 %v3064_v48  ;;  %908 = vmatprep.subr.bf16.mxu1 %v3067_v50  ;;  %v2319_v50 = vcombine.low %v122_v0, %v122_v0  ;;  %v3109_v48 = vcombine.high %v123_v16, %v123_v16  ;;  %v4236_v16 = vld [vmem:[#allocation32_spill] sm:$0xff] }
  0x60   :  { %v3121_v0 = vsel %vm740_vm1, %v2321_v51, 0  ;;  %v4232_v51 = vld [vmem:[#allocation28_spill] sm:$0xff] }
  0x61   :  { %4229 = vst [vmem:[#allocation83_spill] sm:$0xff] %v3109_v48  ;;  %v3116_v30 = vsel %vm740_vm1, %v2319_v50, 0  ;;  %4231 = vst [vmem:[#allocation85_spill] sm:$0xff] %v3121_v0  ;;  %v3130_v50 = vcombine.high %v2331_v31, %v2331_v31 }
  0x62   :  { %868 = vmatpush1.bf16.msra.mxu0 %v3082_v47  ;;  %909 = vmatpush1.bf16.msra.mxu1 %v3086_v2  ;;  %4230 = vst [vmem:[#allocation84_spill] sm:$0xff] %v3116_v30 }
  0x63   :  { %869 = vmatprep.subr.bf16.mxu0 %v3088_v43  ;;  %910 = vmatprep.subr.bf16.mxu1 %v3091_v4 }
  0x66   :  { %870 = vmatpush1.bf16.msra.mxu0 %v3100_v1  ;;  %911 = vmatpush1.bf16.msra.mxu1 %v3104_v17 }
  0x67   :  { %2327 = vmatprep.subr.msk.bf16.mxu0 %vm740_vm1, %v3106_v49  ;;  %2329 = vmatprep.subr.msk.bf16.mxu1 %vm740_vm1, %v3109_v48 }
  0x6a   :  { %872 = vmatpush1.bf16.msra.mxu0 %v3116_v30  ;;  %913 = vmatpush1.bf16.msra.mxu1 %v3121_v0 }
  0x6b   :  { %1029 = vmatprep.subr.bf16.mxu0 %v2491_v3  ;;  %1070 = vmatprep.subr.bf16.mxu1 %v2504_v8 }
  0x6d   :  { %880 = vmatmul.mubr.bf16.vlgmr.msra.gmra.mrb[4].mxu0 %v2827_v15  ;;  %921 = vmatmul.mubr.bf16.vlgmr.msra.gmra.mrb[4].mxu1 %v2827_v15  ;;  %v4233_v15 = vld [vmem:[#allocation29_spill] sm:$0xff] }
  0x6e   :  { %1030 = vmatpush1.bf16.msra.mxu0 %v2496_v5  ;;  %1071 = vmatpush1.bf16.msra.mxu1 %v2506_v9 }
  0x6f   :  { %1031 = vmatprep.subr.bf16.mxu0 %v2508_v10  ;;  %1072 = vmatprep.subr.bf16.mxu1 %v2520_v14 }
  0x70   :  { %2335 = vmatprep.mubr.msk.bf16.mxu0 %vm736_vm0, %v3130_v50  ;;  %2337 = vmatprep.mubr.msk.bf16.mxu1 %vm736_vm0, %v3130_v50 }
  0x72   :  { %1032 = vmatpush1.bf16.msra.mxu0 %v2533_v18  ;;  %1073 = vmatpush1.bf16.msra.mxu1 %v2537_v19 }
  0x73   :  { %1033 = vmatprep.subr.bf16.mxu0 %v2539_v20  ;;  %1074 = vmatprep.subr.bf16.mxu1 %v2542_v21 }
  0x76   :  { %1034 = vmatpush1.bf16.msra.mxu0 %v2557_v26  ;;  %1075 = vmatpush1.bf16.msra.mxu1 %v2561_v27 }
  0x77   :  { %1035 = vmatprep.subr.bf16.mxu0 %v2563_v28  ;;  %1076 = vmatprep.subr.bf16.mxu1 %v2566_v29 }
  0x7a   :  { %1036 = vmatpush1.bf16.msra.mxu0 %v2581_v34  ;;  %1077 = vmatpush1.bf16.msra.mxu1 %v2585_v35 }
  0x7b   :  { %1037 = vmatprep.subr.bf16.mxu0 %v2587_v36  ;;  %1078 = vmatprep.subr.bf16.mxu1 %v2590_v37 }
  0x7e   :  { %1038 = vmatpush1.bf16.msra.mxu0 %v2605_v42  ;;  %1079 = vmatpush1.bf16.msra.mxu1 %v2614_v44 }
  0x7f   :  { %1039 = vmatprep.subr.bf16.mxu0 %v2616_v45  ;;  %1080 = vmatprep.subr.bf16.mxu1 %v2619_v46 }
  0x82   :  { %1040 = vmatpush1.bf16.msra.mxu0 %v2638_v52  ;;  %1081 = vmatpush1.bf16.msra.mxu1 %v2644_v53 }
  0x83   :  { %1041 = vmatprep.subr.bf16.mxu0 %v2646_v54  ;;  %1082 = vmatprep.subr.bf16.mxu1 %v2649_v55 }
  0x86   :  { %1042 = vmatpush1.bf16.msra.mxu0 %v2666_v60  ;;  %1083 = vmatpush1.bf16.msra.mxu1 %v2670_v61 }
  0x87   :  { %1043 = vmatprep.subr.bf16.mxu0 %v2672_v62  ;;  %1084 = vmatprep.subr.bf16.mxu1 %v2675_v63 }
  0x8a   :  { %1044 = vmatpush1.bf16.msra.mxu0 %v2690_v6  ;;  %1085 = vmatpush1.bf16.msra.mxu1 %v2694_v7 }
  0x8b   :  { %1045 = vmatprep.subr.bf16.mxu0 %v2696_v11  ;;  %1086 = vmatprep.subr.bf16.mxu1 %v2699_v12 }
  0x8e   :  { %1046 = vmatpush1.bf16.msra.mxu0 %v2714_v22  ;;  %1087 = vmatpush1.bf16.msra.mxu1 %v2718_v23 }
  0x8f   :  { %1047 = vmatprep.subr.bf16.mxu0 %v2720_v24  ;;  %1088 = vmatprep.subr.bf16.mxu1 %v2723_v25 }
  0x92   :  { %1048 = vmatpush1.bf16.msra.mxu0 %v2738_v38  ;;  %1089 = vmatpush1.bf16.msra.mxu1 %v2742_v39 }
  0x93   :  { %1049 = vmatprep.subr.bf16.mxu0 %v2744_v40  ;;  %1090 = vmatprep.subr.bf16.mxu1 %v2747_v41  ;;  %v3188_v40 = vcombine.low %v2331_v31, %v2331_v31  ;;  %v4237_v41 = vld [vmem:[#allocation33_spill] sm:$0xff]  ;;  %v4243_v31 = vld [vmem:[#allocation40_spill] sm:$0xff] }
  0x96   :  { %1050 = vmatpush1.bf16.msra.mxu0 %v2762_v56  ;;  %1091 = vmatpush1.bf16.msra.mxu1 %v2766_v57  ;;  %v4238_v56 = vld [vmem:[#allocation35_spill] sm:$0xff]  ;;  %v4239_v57 = vld [vmem:[#allocation34_spill] sm:$0xff] }
  0x97   :  { %1051 = vmatprep.subr.bf16.mxu0 %v2768_v58  ;;  %1092 = vmatprep.subr.bf16.mxu1 %v4232_v51  ;;  %v4240_v58 = vld [vmem:[#allocation36_spill] sm:$0xff] }
  0x9a   :  { %1052 = vmatpush1.bf16.msra.mxu0 %v4233_v15  ;;  %1093 = vmatpush1.bf16.msra.mxu1 %v4234_v32  ;;  %v4242_v32 = vld [vmem:[#allocation39_spill] sm:$0xff]  ;;  %v4253_v15 = vld [vmem:[#allocation50_spill] sm:$0xff] }
  0x9b   :  { %2334 = vmatprep.subr.msk.bf16.mxu0 %vm740_vm1, %v4235_v33  ;;  %2336 = vmatprep.subr.msk.bf16.mxu1 %vm740_vm1, %v4236_v16  ;;  %v4241_v33 = vld [vmem:[#allocation38_spill] sm:$0xff]  ;;  %v4252_v16 = vld [vmem:[#allocation49_spill] sm:$0xff] }
  0x9e   :  { %1054 = vmatpush1.bf16.msra.mxu0 %v4237_v41  ;;  %1095 = vmatpush1.bf16.msra.mxu1 %v4238_v56  ;;  %v4246_v56 = vld [vmem:[#allocation43_spill] sm:$0xff]  ;;  %v4247_v41 = vld [vmem:[#allocation44_spill] sm:$0xff] }
  0x9f   :  { %1111 = vmatprep.subr.bf16.mxu0 %v4239_v57  ;;  %1152 = vmatprep.subr.bf16.mxu1 %v4240_v58  ;;  %v4244_v57 = vld [vmem:[#allocation41_spill] sm:$0xff]  ;;  %v4245_v58 = vld [vmem:[#allocation42_spill] sm:$0xff] }
  0xa1   :  { %1062 = vmatmul.mubr.bf16.vlgmr.msra.gmra.mrb[8].mxu0 %v3188_v40  ;;  %1103 = vmatmul.mubr.bf16.vlgmr.msra.gmra.mrb[8].mxu1 %v3188_v40 }
  0xa2   :  { %1112 = vmatpush1.bf16.msra.mxu0 %v2836_v13  ;;  %1153 = vmatpush1.bf16.msra.mxu1 %v4241_v33  ;;  %v4248_v13 = vld [vmem:[#allocation45_spill] sm:$0xff]  ;;  %v4249_v33 = vld [vmem:[#allocation46_spill] sm:$0xff] }
  0xa3   :  { %1113 = vmatprep.subr.bf16.mxu0 %v4242_v32  ;;  %1154 = vmatprep.subr.bf16.mxu1 %v4243_v31  ;;  %v4250_v32 = vld [vmem:[#allocation47_spill] sm:$0xff]  ;;  %v4251_v31 = vld [vmem:[#allocation48_spill] sm:$0xff] }
  0xa4   :  { %2339 = vmatprep.mubr.msk.bf16.mxu0 %vm736_vm0, %v3130_v50  ;;  %2341 = vmatprep.mubr.msk.bf16.mxu1 %vm736_vm0, %v3130_v50  ;;  %v4254_v50 = vld [vmem:[#allocation51_spill] sm:$0xff] }
  0xa6   :  { %1114 = vmatpush1.bf16.msra.mxu0 %v4244_v57  ;;  %1155 = vmatpush1.bf16.msra.mxu1 %v4245_v58  ;;  %v4255_v57 = vld [vmem:[#allocation52_spill] sm:$0xff]  ;;  %v4256_v58 = vld [vmem:[#allocation53_spill] sm:$0xff] }
  0xa7   :  { %1115 = vmatprep.subr.bf16.mxu0 %v4246_v56  ;;  %1156 = vmatprep.subr.bf16.mxu1 %v4247_v41  ;;  %v4257_v56 = vld [vmem:[#allocation54_spill] sm:$0xff]  ;;  %v4258_v41 = vld [vmem:[#allocation55_spill] sm:$0xff] }
  0xaa   :  { %1116 = vmatpush1.bf16.msra.mxu0 %v4248_v13  ;;  %1157 = vmatpush1.bf16.msra.mxu1 %v4249_v33  ;;  %v4259_v13 = vld [vmem:[#allocation56_spill] sm:$0xff]  ;;  %v4260_v33 = vld [vmem:[#allocation57_spill] sm:$0xff] }
  0xab   :  { %1117 = vmatprep.subr.bf16.mxu0 %v4250_v32  ;;  %1158 = vmatprep.subr.bf16.mxu1 %v4251_v31  ;;  %v4261_v32 = vld [vmem:[#allocation58_spill] sm:$0xff]  ;;  %v4262_v31 = vld [vmem:[#allocation59_spill] sm:$0xff] }
  0xae   :  { %1118 = vmatpush1.bf16.msra.mxu0 %v4252_v16  ;;  %1159 = vmatpush1.bf16.msra.mxu1 %v4253_v15  ;;  %v4263_v16 = vld [vmem:[#allocation60_spill] sm:$0xff]  ;;  %v4264_v15 = vld [vmem:[#allocation61_spill] sm:$0xff] }
  0xaf   :  { %1119 = vmatprep.subr.bf16.mxu0 %v4254_v50  ;;  %1160 = vmatprep.subr.bf16.mxu1 %v4255_v57  ;;  %v4265_v50 = vld [vmem:[#allocation62_spill] sm:$0xff]  ;;  %v4266_v57 = vld [vmem:[#allocation63_spill] sm:$0xff] }
  0xb2   :  { %1120 = vmatpush1.bf16.msra.mxu0 %v4256_v58  ;;  %1161 = vmatpush1.bf16.msra.mxu1 %v4257_v56  ;;  %v4267_v58 = vld [vmem:[#allocation64_spill] sm:$0xff]  ;;  %v4268_v56 = vld [vmem:[#allocation65_spill] sm:$0xff] }
  0xb3   :  { %1121 = vmatprep.subr.bf16.mxu0 %v4258_v41  ;;  %1162 = vmatprep.subr.bf16.mxu1 %v4259_v13  ;;  %v4269_v41 = vld [vmem:[#allocation66_spill] sm:$0xff]  ;;  %v4270_v13 = vld [vmem:[#allocation67_spill] sm:$0xff] }
  0xb6   :  { %1122 = vmatpush1.bf16.msra.mxu0 %v4260_v33  ;;  %1163 = vmatpush1.bf16.msra.mxu1 %v4261_v32  ;;  %v4271_v33 = vld [vmem:[#allocation68_spill] sm:$0xff]  ;;  %v4272_v32 = vld [vmem:[#allocation69_spill] sm:$0xff] }
  0xb7   :  { %1123 = vmatprep.subr.bf16.mxu0 %v4262_v31  ;;  %1164 = vmatprep.subr.bf16.mxu1 %v4263_v16  ;;  %v4273_v31 = vld [vmem:[#allocation70_spill] sm:$0xff]  ;;  %v4274_v16 = vld [vmem:[#allocation71_spill] sm:$0xff] }
  0xba   :  { %1124 = vmatpush1.bf16.msra.mxu0 %v4264_v15  ;;  %1165 = vmatpush1.bf16.msra.mxu1 %v4265_v50  ;;  %v4275_v15 = vld [vmem:[#allocation72_spill] sm:$0xff] }
  0xbb   :  { %1125 = vmatprep.subr.bf16.mxu0 %v4266_v57  ;;  %1166 = vmatprep.subr.bf16.mxu1 %v4267_v58  ;;  %v4276_v57 = vld [vmem:[#allocation73_spill] sm:$0xff]  ;;  %v4277_v58 = vld [vmem:[#allocation74_spill] sm:$0xff] }
  0xbe   :  { %1126 = vmatpush1.bf16.msra.mxu0 %v4268_v56  ;;  %1167 = vmatpush1.bf16.msra.mxu1 %v4269_v41  ;;  %v4278_v56 = vld [vmem:[#allocation75_spill] sm:$0xff] }
  0xbf   :  { %1127 = vmatprep.subr.bf16.mxu0 %v4270_v13  ;;  %1168 = vmatprep.subr.bf16.mxu1 %v4271_v33 }
  0xc2   :  { %1128 = vmatpush1.bf16.msra.mxu0 %v4272_v32  ;;  %1169 = vmatpush1.bf16.msra.mxu1 %v4273_v31 }
  0xc3   :  { %1129 = vmatprep.subr.bf16.mxu0 %v4274_v16  ;;  %1170 = vmatprep.subr.bf16.mxu1 %v4275_v15 }
  0xc6   :  { %1130 = vmatpush1.bf16.msra.mxu0 %v3058_v59  ;;  %1171 = vmatpush1.bf16.msra.mxu1 %v4276_v57 }
  0xc7   :  { %1131 = vmatprep.subr.bf16.mxu0 %v4277_v58  ;;  %1172 = vmatprep.subr.bf16.mxu1 %v4278_v56 }
  0xca   :  { %1132 = vmatpush1.bf16.msra.mxu0 %v3082_v47  ;;  %1173 = vmatpush1.bf16.msra.mxu1 %v3086_v2  ;;  %v2342_v47 = vld [vmem:[%s3989_s1 + $0x10] sm:$0xff] }
  0xcb   :  { %1133 = vmatprep.subr.bf16.mxu0 %v3088_v43  ;;  %1174 = vmatprep.subr.bf16.mxu1 %v3091_v4 }
  0xce   :  { %1134 = vmatpush1.bf16.msra.mxu0 %v3100_v1  ;;  %1175 = vmatpush1.bf16.msra.mxu1 %v3104_v17  ;;  %v3257_v1 = vcombine.high %v2342_v47, %v2342_v47 }
  0xcf   :  { %2338 = vmatprep.subr.msk.bf16.mxu0 %vm740_vm1, %v3106_v49  ;;  %2340 = vmatprep.subr.msk.bf16.mxu1 %vm740_vm1, %v3109_v48 }
  0xd2   :  { %1136 = vmatpush1.bf16.msra.mxu0 %v3116_v30  ;;  %1177 = vmatpush1.bf16.msra.mxu1 %v3121_v0 }
  0xd3   :  { %1293 = vmatprep.subr.bf16.mxu0 %v2491_v3  ;;  %1334 = vmatprep.subr.bf16.mxu1 %v2504_v8 }
  0xd5   :  { %1144 = vmatmul.mubr.bf16.vlgmr.msra.gmra.mrb[12].mxu0 %v3188_v40  ;;  %1185 = vmatmul.mubr.bf16.vlgmr.msra.gmra.mrb[12].mxu1 %v3188_v40  ;;  %v4279_v40 = vld [vmem:[#allocation23_spill] sm:$0xff] }
  0xd6   :  { %1294 = vmatpush1.bf16.msra.mxu0 %v2496_v5  ;;  %1335 = vmatpush1.bf16.msra.mxu1 %v2506_v9 }
  0xd7   :  { %1295 = vmatprep.subr.bf16.mxu0 %v2508_v10  ;;  %1336 = vmatprep.subr.bf16.mxu1 %v2520_v14 }
  0xd8   :  { %2346 = vmatprep.mubr.msk.bf16.mxu0 %vm736_vm0, %v3257_v1  ;;  %2348 = vmatprep.mubr.msk.bf16.mxu1 %vm736_vm0, %v3257_v1 }
  0xda   :  { %1296 = vmatpush1.bf16.msra.mxu0 %v2533_v18  ;;  %1337 = vmatpush1.bf16.msra.mxu1 %v2537_v19 }
  0xdb   :  { %1297 = vmatprep.subr.bf16.mxu0 %v2539_v20  ;;  %1338 = vmatprep.subr.bf16.mxu1 %v2542_v21 }
  0xde   :  { %1298 = vmatpush1.bf16.msra.mxu0 %v2557_v26  ;;  %1339 = vmatpush1.bf16.msra.mxu1 %v2561_v27 }
  0xdf   :  { %1299 = vmatprep.subr.bf16.mxu0 %v2563_v28  ;;  %1340 = vmatprep.subr.bf16.mxu1 %v2566_v29 }
  0xe2   :  { %1300 = vmatpush1.bf16.msra.mxu0 %v2581_v34  ;;  %1341 = vmatpush1.bf16.msra.mxu1 %v2585_v35 }
  0xe3   :  { %1301 = vmatprep.subr.bf16.mxu0 %v2587_v36  ;;  %1342 = vmatprep.subr.bf16.mxu1 %v2590_v37 }
  0xe6   :  { %1302 = vmatpush1.bf16.msra.mxu0 %v2605_v42  ;;  %1343 = vmatpush1.bf16.msra.mxu1 %v2614_v44 }
  0xe7   :  { %1303 = vmatprep.subr.bf16.mxu0 %v2616_v45  ;;  %1344 = vmatprep.subr.bf16.mxu1 %v2619_v46 }
  0xea   :  { %1304 = vmatpush1.bf16.msra.mxu0 %v2638_v52  ;;  %1345 = vmatpush1.bf16.msra.mxu1 %v2644_v53 }
  0xeb   :  { %1305 = vmatprep.subr.bf16.mxu0 %v2646_v54  ;;  %1346 = vmatprep.subr.bf16.mxu1 %v2649_v55 }
  0xee   :  { %1306 = vmatpush1.bf16.msra.mxu0 %v2666_v60  ;;  %1347 = vmatpush1.bf16.msra.mxu1 %v2670_v61 }
  0xef   :  { %1307 = vmatprep.subr.bf16.mxu0 %v2672_v62  ;;  %1348 = vmatprep.subr.bf16.mxu1 %v2675_v63  ;;  %v4301_v63 = vld [vmem:[#allocation46_spill] sm:$0xff] }
  0xf2   :  { %1308 = vmatpush1.bf16.msra.mxu0 %v2690_v6  ;;  %1349 = vmatpush1.bf16.msra.mxu1 %v2694_v7  ;;  %v4280_v6 = vld [vmem:[#allocation24_spill] sm:$0xff]  ;;  %v4281_v7 = vld [vmem:[#allocation25_spill] sm:$0xff] }
  0xf3   :  { %1309 = vmatprep.subr.bf16.mxu0 %v2696_v11  ;;  %1350 = vmatprep.subr.bf16.mxu1 %v2699_v12  ;;  %v4282_v11 = vld [vmem:[#allocation26_spill] sm:$0xff]  ;;  %v4283_v12 = vld [vmem:[#allocation27_spill] sm:$0xff] }
  0xf6   :  { %1310 = vmatpush1.bf16.msra.mxu0 %v2714_v22  ;;  %1351 = vmatpush1.bf16.msra.mxu1 %v2718_v23  ;;  %v4284_v23 = vld [vmem:[#allocation29_spill] sm:$0xff] }
  0xf7   :  { %1311 = vmatprep.subr.bf16.mxu0 %v2720_v24  ;;  %1352 = vmatprep.subr.bf16.mxu1 %v2723_v25  ;;  %v4285_v24 = vld [vmem:[#allocation30_spill] sm:$0xff]  ;;  %v4286_v25 = vld [vmem:[#allocation31_spill] sm:$0xff] }
  0xfa   :  { %1312 = vmatpush1.bf16.msra.mxu0 %v2738_v38  ;;  %1353 = vmatpush1.bf16.msra.mxu1 %v2742_v39  ;;  %v4287_v39 = vld [vmem:[#allocation32_spill] sm:$0xff] }
  0xfb   :  { %1313 = vmatprep.subr.bf16.mxu0 %v4279_v40  ;;  %1354 = vmatprep.subr.bf16.mxu1 %v4280_v6  ;;  %v3315_v40 = vcombine.low %v2342_v47, %v2342_v47  ;;  %v4288_v6 = vld [vmem:[#allocation33_spill] sm:$0xff]  ;;  %v4299_v38 = vld [vmem:[#allocation44_spill] sm:$0xff] }
  0xfe   :  { %1314 = vmatpush1.bf16.msra.mxu0 %v4281_v7  ;;  %1355 = vmatpush1.bf16.msra.mxu1 %v4282_v11  ;;  %v4289_v7 = vld [vmem:[#allocation35_spill] sm:$0xff]  ;;  %v4290_v11 = vld [vmem:[#allocation34_spill] sm:$0xff] }
  0xff   :  { %1315 = vmatprep.subr.bf16.mxu0 %v4283_v12  ;;  %1356 = vmatprep.subr.bf16.mxu1 %v4232_v51  ;;  %v4291_v12 = vld [vmem:[#allocation36_spill] sm:$0xff]  ;;  %v4298_v51 = vld [vmem:[#allocation43_spill] sm:$0xff] }
 0x102   :  { %1316 = vmatpush1.bf16.msra.mxu0 %v4284_v23  ;;  %1357 = vmatpush1.bf16.msra.mxu1 %v4285_v24  ;;  %v4292_v24 = vld [vmem:[#allocation37_spill] sm:$0xff]  ;;  %v4294_v23 = vld [vmem:[#allocation39_spill] sm:$0xff] }
 0x103   :  { %2345 = vmatprep.subr.msk.bf16.mxu0 %vm740_vm1, %v4286_v25  ;;  %2347 = vmatprep.subr.msk.bf16.mxu1 %vm740_vm1, %v4287_v39  ;;  %v4293_v25 = vld [vmem:[#allocation38_spill] sm:$0xff]  ;;  %v4295_v39 = vld [vmem:[#allocation40_spill] sm:$0xff] }
 0x106   :  { %1318 = vmatpush1.bf16.msra.mxu0 %v4288_v6  ;;  %1359 = vmatpush1.bf16.msra.mxu1 %v4289_v7  ;;  %v4297_v6 = vld [vmem:[#allocation42_spill] sm:$0xff] }
 0x107   :  { %1375 = vmatprep.subr.bf16.mxu0 %v4290_v11  ;;  %1416 = vmatprep.subr.bf16.mxu1 %v4291_v12 }
 0x109   :  { %1326 = vmatmul.mubr.bf16.vlgmr.msra.gmra.mrb[16].mxu0 %v3315_v40  ;;  %1367 = vmatmul.mubr.bf16.vlgmr.msra.gmra.mrb[16].mxu1 %v3315_v40 }
 0x10a   :  { %1376 = vmatpush1.bf16.msra.mxu0 %v4292_v24  ;;  %1417 = vmatpush1.bf16.msra.mxu1 %v4293_v25  ;;  %v4296_v24 = vld [vmem:[#allocation41_spill] sm:$0xff] }
 0x10b   :  { %1377 = vmatprep.subr.bf16.mxu0 %v4294_v23  ;;  %1418 = vmatprep.subr.bf16.mxu1 %v4295_v39 }
 0x10c   :  { %v799_v47 = vpop.f32.mrb[0].mxu0  ;;  %2350 = vmatprep.mubr.msk.bf16.mxu0 %vm736_vm0, %v3257_v1  ;;  %v840_v11 = vpop.f32.mrb[0].mxu1  ;;  %2352 = vmatprep.mubr.msk.bf16.mxu1 %vm736_vm0, %v3257_v1  ;;  %v4302_v1 = vld [vmem:[#allocation47_spill] sm:$0xff] }
 0x10d   :  { %937 = vrot.lane.b32.xlu0 %v799_v47, %s2451_s12  ;;  %v801_v12 = vpop.f32.mrb[1].mxu0  ;;  %v842_v25 = vpop.f32.mrb[1].mxu1  ;;  %v4300_v47 = vld [vmem:[#allocation45_spill] sm:$0xff] }
 0x10e   :  { %v803_v7 = vpop.f32.mrb[2].mxu0  ;;  %1378 = vmatpush1.bf16.msra.mxu0 %v4296_v24  ;;  %1419 = vmatpush1.bf16.msra.mxu1 %v4297_v6  ;;  %v844_v39 = vpop.f32.mrb[2].mxu1  ;;  %v4304_v6 = vld [vmem:[#allocation49_spill] sm:$0xff] }
 0x10f   :  { %v804_v23 = vpop.f32.mrb[3].mxu0  ;;  %1379 = vmatprep.subr.bf16.mxu0 %v4298_v51  ;;  %1420 = vmatprep.subr.bf16.mxu1 %v4299_v38  ;;  %v845_v22 = vpop.f32.mrb[3].mxu1  ;;  %v4303_v7 = vld [vmem:[#allocation48_spill] sm:$0xff]  ;;  %v4306_v39 = vld [vmem:[#allocation51_spill] sm:$0xff] }
 0x110   :  { %v4305_v23 = vld [vmem:[#allocation50_spill] sm:$0xff]  ;;  %v4307_v38 = vld [vmem:[#allocation52_spill] sm:$0xff] }
 0x111   :  { %941 = vrot.lane.b32.xlu0 %v840_v11, %s2451_s12  ;;  %v4308_v11 = vld [vmem:[#allocation53_spill] sm:$0xff]  ;;  %v4309_v22 = vld [vmem:[#allocation54_spill] sm:$0xff] }
 0x112   :  { %1380 = vmatpush1.bf16.msra.mxu0 %v4300_v47  ;;  %1421 = vmatpush1.bf16.msra.mxu1 %v4301_v63  ;;  %v4310_v63 = vld [vmem:[#allocation55_spill] sm:$0xff] }
 0x113   :  { %1381 = vmatprep.subr.bf16.mxu0 %v4302_v1  ;;  %1422 = vmatprep.subr.bf16.mxu1 %v4303_v7  ;;  %v4311_v1 = vld [vmem:[#allocation56_spill] sm:$0xff]  ;;  %v4312_v7 = vld [vmem:[#allocation57_spill] sm:$0xff] }
 0x115   :  { %939 = vrot.lane.b32.xlu0 %v801_v12, %s2451_s12  ;;  %v4313_v12 = vld [vmem:[#allocation58_spill] sm:$0xff] }
 0x116   :  { %1382 = vmatpush1.bf16.msra.mxu0 %v4304_v6  ;;  %1423 = vmatpush1.bf16.msra.mxu1 %v4305_v23  ;;  %v4314_v6 = vld [vmem:[#allocation59_spill] sm:$0xff]  ;;  %v4315_v23 = vld [vmem:[#allocation60_spill] sm:$0xff] }
 0x117   :  { %1383 = vmatprep.subr.bf16.mxu0 %v4306_v39  ;;  %1424 = vmatprep.subr.bf16.mxu1 %v4307_v38  ;;  %v4316_v39 = vld [vmem:[#allocation61_spill] sm:$0xff] }
 0x119   :  { %943 = vrot.lane.b32.xlu0 %v842_v25, %s2451_s12  ;;  %v4317_v25 = vld [vmem:[#allocation63_spill] sm:$0xff] }
 0x11a   :  { %1384 = vmatpush1.bf16.msra.mxu0 %v4308_v11  ;;  %1425 = vmatpush1.bf16.msra.mxu1 %v4309_v22  ;;  %v4318_v11 = vld [vmem:[#allocation64_spill] sm:$0xff]  ;;  %v4319_v22 = vld [vmem:[#allocation65_spill] sm:$0xff] }
 0x11b   :  { %1385 = vmatprep.subr.bf16.mxu0 %v4310_v63  ;;  %1426 = vmatprep.subr.bf16.mxu1 %v4311_v1 }
 0x11e   :  { %1386 = vmatpush1.bf16.msra.mxu0 %v4312_v7  ;;  %1427 = vmatpush1.bf16.msra.mxu1 %v4313_v12 }
 0x11f   :  { %1387 = vmatprep.subr.bf16.mxu0 %v4314_v6  ;;  %1428 = vmatprep.subr.bf16.mxu1 %v4315_v23 }
 0x122   :  { %1388 = vmatpush1.bf16.msra.mxu0 %v4316_v39  ;;  %1429 = vmatpush1.bf16.msra.mxu1 %v4265_v50 }
 0x123   :  { %1389 = vmatprep.subr.bf16.mxu0 %v4317_v25  ;;  %1430 = vmatprep.subr.bf16.mxu1 %v4318_v11 }
 0x126   :  { %1390 = vmatpush1.bf16.msra.mxu0 %v4319_v22  ;;  %1431 = vmatpush1.bf16.msra.mxu1 %v4269_v41  ;;  %v4320_v41 = vld [vmem:[#allocation76_spill] sm:$0xff] }
 0x127   :  { %1391 = vmatprep.subr.bf16.mxu0 %v4270_v13  ;;  %1432 = vmatprep.subr.bf16.mxu1 %v4271_v33 }
 0x12a   :  { %1392 = vmatpush1.bf16.msra.mxu0 %v4272_v32  ;;  %1433 = vmatpush1.bf16.msra.mxu1 %v4273_v31  ;;  %v4321_v31 = vld [vmem:[#allocation80_spill] sm:$0xff] }
 0x12b   :  { %1393 = vmatprep.subr.bf16.mxu0 %v4274_v16  ;;  %1434 = vmatprep.subr.bf16.mxu1 %v4275_v15 }
 0x12e   :  { %1394 = vmatpush1.bf16.msra.mxu0 %v3058_v59  ;;  %1435 = vmatpush1.bf16.msra.mxu1 %v4276_v57 }
 0x12f   :  { %1395 = vmatprep.subr.bf16.mxu0 %v4277_v58  ;;  %1436 = vmatprep.subr.bf16.mxu1 %v4278_v56 }
 0x132   :  { %1396 = vmatpush1.bf16.msra.mxu0 %v4320_v41  ;;  %1437 = vmatpush1.bf16.msra.mxu1 %v3086_v2  ;;  %v3384_v41 = vld [vmem:[%s3989_s1 + $0x18] sm:$0xff] }
 0x133   :  { %1397 = vmatprep.subr.bf16.mxu0 %v3088_v43  ;;  %1438 = vmatprep.subr.bf16.mxu1 %v3091_v4 }
 0x136   :  { %1398 = vmatpush1.bf16.msra.mxu0 %v4321_v31  ;;  %1439 = vmatpush1.bf16.msra.mxu1 %v3104_v17  ;;  %v3392_v17 = vcombine.high %v3384_v41, %v3384_v41 }
 0x137   :  { %2349 = vmatprep.subr.msk.bf16.mxu0 %vm740_vm1, %v3106_v49  ;;  %2351 = vmatprep.subr.msk.bf16.mxu1 %vm740_vm1, %v3109_v48 }
 0x13a   :  { %1400 = vmatpush1.bf16.msra.mxu0 %v3116_v30  ;;  %1441 = vmatpush1.bf16.msra.mxu1 %v3121_v0 }
 0x13b   :  { %1476 = vmatprep.subr.bf16.mxu0 %v2491_v3  ;;  %1517 = vmatprep.subr.bf16.mxu1 %v2504_v8 }
 0x13d   :  { %1408 = vmatmul.mubr.bf16.vlgmr.msra.gmra.mrb[20].mxu0 %v3315_v40  ;;  %1449 = vmatmul.mubr.bf16.vlgmr.msra.gmra.mrb[20].mxu1 %v3315_v40 }
 0x13e   :  { %1477 = vmatpush1.bf16.msra.mxu0 %v2496_v5  ;;  %1518 = vmatpush1.bf16.msra.mxu1 %v2506_v9 }
 0x13f   :  { %1478 = vmatprep.subr.bf16.mxu0 %v2508_v10  ;;  %1519 = vmatprep.subr.bf16.mxu1 %v2520_v14 }
 0x140   :  { %v881_v30 = vpop.f32.mrb[4].mxu0  ;;  %2357 = vmatprep.mubr.msk.bf16.mxu0 %vm736_vm0, %v3392_v17  ;;  %v922_v3 = vpop.f32.mrb[4].mxu1  ;;  %2359 = vmatprep.mubr.msk.bf16.mxu1 %vm736_vm0, %v3392_v17 }
 0x141   :  { %945 = vrot.lane.b32.xlu1 %v881_v30, %s2451_s12  ;;  %v883_v8 = vpop.f32.mrb[5].mxu0  ;;  %v924_v5 = vpop.f32.mrb[5].mxu1  ;;  %v4328_v30 = vld [vmem:[#allocation18_spill] sm:$0xff] }
 0x142   :  { %v885_v40 = vpop.f32.mrb[6].mxu0  ;;  %1479 = vmatpush1.bf16.msra.mxu0 %v2533_v18  ;;  %1520 = vmatpush1.bf16.msra.mxu1 %v2537_v19  ;;  %v926_v14 = vpop.f32.mrb[6].mxu1 }
 0x143   :  { %v886_v10 = vpop.f32.mrb[7].mxu0  ;;  %1480 = vmatprep.subr.bf16.mxu0 %v2539_v20  ;;  %1521 = vmatprep.subr.bf16.mxu1 %v2542_v21  ;;  %v927_v9 = vpop.f32.mrb[7].mxu1  ;;  %v4327_v14 = vld [vmem:[#allocation17_spill] sm:$0xff]  ;;  %v4329_v40 = vld [vmem:[#allocation19_spill] sm:$0xff] }
 0x144   :  { %v4325_v9 = vld [vmem:[#allocation15_spill] sm:$0xff]  ;;  %v4326_v10 = vld [vmem:[#allocation16_spill] sm:$0xff] }
 0x145   :  { %949 = vrot.lane.b32.xlu1 %v922_v3, %s2451_s12  ;;  %v4322_v3 = vld [vmem:[#allocation12_spill] sm:$0xff] }
 0x146   :  { %1481 = vmatpush1.bf16.msra.mxu0 %v2557_v26  ;;  %1522 = vmatpush1.bf16.msra.mxu1 %v2561_v27 }
 0x147   :  { %1482 = vmatprep.subr.bf16.mxu0 %v2563_v28  ;;  %1523 = vmatprep.subr.bf16.mxu1 %v2566_v29 }
 0x149   :  { %947 = vrot.lane.b32.xlu1 %v883_v8, %s2451_s12  ;;  %v4324_v8 = vld [vmem:[#allocation14_spill] sm:$0xff] }
 0x14a   :  { %1483 = vmatpush1.bf16.msra.mxu0 %v2581_v34  ;;  %1524 = vmatpush1.bf16.msra.mxu1 %v2585_v35 }
 0x14b   :  { %1484 = vmatprep.subr.bf16.mxu0 %v2587_v36  ;;  %1525 = vmatprep.subr.bf16.mxu1 %v2590_v37 }
 0x14d   :  { %951 = vrot.lane.b32.xlu1 %v924_v5, %s2451_s12  ;;  %v4323_v5 = vld [vmem:[#allocation13_spill] sm:$0xff] }
 0x14e   :  { %1485 = vmatpush1.bf16.msra.mxu0 %v2605_v42  ;;  %1526 = vmatpush1.bf16.msra.mxu1 %v2614_v44 }
 0x14f   :  { %1486 = vmatprep.subr.bf16.mxu0 %v2616_v45  ;;  %1527 = vmatprep.subr.bf16.mxu1 %v2619_v46 }
 0x152   :  { %1487 = vmatpush1.bf16.msra.mxu0 %v2638_v52  ;;  %1528 = vmatpush1.bf16.msra.mxu1 %v2644_v53 }
 0x153   :  { %1488 = vmatprep.subr.bf16.mxu0 %v2646_v54  ;;  %1529 = vmatprep.subr.bf16.mxu1 %v2649_v55 }
 0x156   :  { %1489 = vmatpush1.bf16.msra.mxu0 %v2666_v60  ;;  %1530 = vmatpush1.bf16.msra.mxu1 %v2670_v61  ;;  %v4330_v60 = vld [vmem:[#allocation20_spill] sm:$0xff]  ;;  %v4331_v61 = vld [vmem:[#allocation21_spill] sm:$0xff] }
 0x157   :  { %1490 = vmatprep.subr.bf16.mxu0 %v2672_v62  ;;  %1531 = vmatprep.subr.bf16.mxu1 %v4322_v3  ;;  %v4332_v62 = vld [vmem:[#allocation22_spill] sm:$0xff]  ;;  %v4333_v3 = vld [vmem:[#allocation23_spill] sm:$0xff] }
 0x15a   :  { %1491 = vmatpush1.bf16.msra.mxu0 %v4323_v5  ;;  %1532 = vmatpush1.bf16.msra.mxu1 %v4324_v8  ;;  %v4334_v5 = vld [vmem:[#allocation24_spill] sm:$0xff]  ;;  %v4335_v8 = vld [vmem:[#allocation25_spill] sm:$0xff] }
 0x15b   :  { %1492 = vmatprep.subr.bf16.mxu0 %v4325_v9  ;;  %1533 = vmatprep.subr.bf16.mxu1 %v4326_v10  ;;  %v4336_v9 = vld [vmem:[#allocation26_spill] sm:$0xff]  ;;  %v4337_v10 = vld [vmem:[#allocation27_spill] sm:$0xff] }
 0x15e   :  { %1493 = vmatpush1.bf16.msra.mxu0 %v4327_v14  ;;  %1534 = vmatpush1.bf16.msra.mxu1 %v4328_v30  ;;  %v4338_v14 = vld [vmem:[#allocation28_spill] sm:$0xff]  ;;  %v4339_v30 = vld [vmem:[#allocation29_spill] sm:$0xff] }
 0x15f   :  { %1494 = vmatprep.subr.bf16.mxu0 %v4329_v40  ;;  %1535 = vmatprep.subr.bf16.mxu1 %v4330_v60  ;;  %v4340_v40 = vld [vmem:[#allocation30_spill] sm:$0xff]  ;;  %v4341_v60 = vld [vmem:[#allocation31_spill] sm:$0xff] }
 0x162   :  { %1495 = vmatpush1.bf16.msra.mxu0 %v4331_v61  ;;  %1536 = vmatpush1.bf16.msra.mxu1 %v4332_v62  ;;  %v4342_v62 = vld [vmem:[#allocation32_spill] sm:$0xff] }
 0x163   :  { %1496 = vmatprep.subr.bf16.mxu0 %v4333_v3  ;;  %1537 = vmatprep.subr.bf16.mxu1 %v4334_v5  ;;  %v3456_v5 = vcombine.low %v3384_v41, %v3384_v41 }
 0x166   :  { %1497 = vmatpush1.bf16.msra.mxu0 %v4335_v8  ;;  %1538 = vmatpush1.bf16.msra.mxu1 %v4336_v9  ;;  %v4343_v8 = vld [vmem:[#allocation33_spill] sm:$0xff]  ;;  %v4344_v9 = vld [vmem:[#allocation35_spill] sm:$0xff] }
 0x167   :  { %1498 = vmatprep.subr.bf16.mxu0 %v4337_v10  ;;  %1539 = vmatprep.subr.bf16.mxu1 %v4338_v14  ;;  %v4345_v10 = vld [vmem:[#allocation34_spill] sm:$0xff]  ;;  %v4346_v14 = vld [vmem:[#allocation36_spill] sm:$0xff] }
 0x16a   :  { %1499 = vmatpush1.bf16.msra.mxu0 %v4339_v30  ;;  %1540 = vmatpush1.bf16.msra.mxu1 %v4340_v40  ;;  %v4348_v40 = vld [vmem:[#allocation38_spill] sm:$0xff]  ;;  %v4350_v30 = vld [vmem:[#allocation40_spill] sm:$0xff] }
 0x16b   :  { %2356 = vmatprep.subr.msk.bf16.mxu0 %vm740_vm1, %v4341_v60  ;;  %2358 = vmatprep.subr.msk.bf16.mxu1 %vm740_vm1, %v4342_v62  ;;  %v4347_v60 = vld [vmem:[#allocation37_spill] sm:$0xff]  ;;  %v4349_v62 = vld [vmem:[#allocation39_spill] sm:$0xff] }
 0x16e   :  { %1501 = vmatpush1.bf16.msra.mxu0 %v4343_v8  ;;  %1542 = vmatpush1.bf16.msra.mxu1 %v4344_v9  ;;  %v4352_v8 = vld [vmem:[#allocation44_spill] sm:$0xff] }
 0x16f   :  { %1558 = vmatprep.subr.bf16.mxu0 %v4345_v10  ;;  %1599 = vmatprep.subr.bf16.mxu1 %v4346_v14 }
 0x171   :  { %1509 = vmatmul.mubr.bf16.vlgmr.msra.gmra.mrb[24].mxu0 %v3456_v5  ;;  %1550 = vmatmul.mubr.bf16.vlgmr.msra.gmra.mrb[24].mxu1 %v3456_v5 }
 0x172   :  { %1559 = vmatpush1.bf16.msra.mxu0 %v4347_v60  ;;  %1600 = vmatpush1.bf16.msra.mxu1 %v4348_v40  ;;  %v4351_v60 = vld [vmem:[#allocation42_spill] sm:$0xff] }
 0x173   :  { %1560 = vmatprep.subr.bf16.mxu0 %v4349_v62  ;;  %1601 = vmatprep.subr.bf16.mxu1 %v4350_v30 }
 0x174   :  { %v1063_v41 = vpop.f32.mrb[8].mxu0  ;;  %2361 = vmatprep.mubr.msk.bf16.mxu0 %vm736_vm0, %v3392_v17  ;;  %v1104_v10 = vpop.f32.mrb[8].mxu1  ;;  %2363 = vmatprep.mubr.msk.bf16.mxu1 %vm736_vm0, %v3392_v17  ;;  %v4354_v17 = vld [vmem:[#allocation47_spill] sm:$0xff] }
 0x175   :  { %1201 = vrot.lane.b32.xlu1 %v1063_v41, %s2452_s15  ;;  %v1065_v14 = vpop.f32.mrb[9].mxu0  ;;  %v1106_v40 = vpop.f32.mrb[9].mxu1  ;;  %v4353_v41 = vld [vmem:[#allocation46_spill] sm:$0xff] }
 0x176   :  { %v1067_v9 = vpop.f32.mrb[10].mxu0  ;;  %1561 = vmatpush1.bf16.msra.mxu0 %v4296_v24  ;;  %1602 = vmatpush1.bf16.msra.mxu1 %v4351_v60  ;;  %v1108_v30 = vpop.f32.mrb[10].mxu1  ;;  %v4356_v60 = vld [vmem:[#allocation49_spill] sm:$0xff] }
 0x177   :  { %v1068_v62 = vpop.f32.mrb[11].mxu0  ;;  %1562 = vmatprep.subr.bf16.mxu0 %v4298_v51  ;;  %1603 = vmatprep.subr.bf16.mxu1 %v4352_v8  ;;  %v1109_v3 = vpop.f32.mrb[11].mxu1  ;;  %v4355_v9 = vld [vmem:[#allocation48_spill] sm:$0xff]  ;;  %v4358_v30 = vld [vmem:[#allocation51_spill] sm:$0xff] }
 0x178   :  { %v4357_v62 = vld [vmem:[#allocation50_spill] sm:$0xff]  ;;  %v4359_v3 = vld [vmem:[#allocation53_spill] sm:$0xff] }
 0x179   :  { %1205 = vrot.lane.b32.xlu1 %v1104_v10, %s2452_s15  ;;  %v4360_v10 = vld [vmem:[#allocation54_spill] sm:$0xff] }
 0x17a   :  { %1563 = vmatpush1.bf16.msra.mxu0 %v4300_v47  ;;  %1604 = vmatpush1.bf16.msra.mxu1 %v4353_v41 }
 0x17b   :  { %1564 = vmatprep.subr.bf16.mxu0 %v4354_v17  ;;  %1605 = vmatprep.subr.bf16.mxu1 %v4355_v9 }
 0x17d   :  { %1203 = vrot.lane.b32.xlu1 %v1065_v14, %s2452_s15  ;;  %v4361_v14 = vld [vmem:[#allocation66_spill] sm:$0xff] }
 0x17e   :  { %1565 = vmatpush1.bf16.msra.mxu0 %v4356_v60  ;;  %1606 = vmatpush1.bf16.msra.mxu1 %v4357_v62 }
 0x17f   :  { %1566 = vmatprep.subr.bf16.mxu0 %v4358_v30  ;;  %1607 = vmatprep.subr.bf16.mxu1 %v4307_v38 }
 0x181   :  { %1207 = vrot.lane.b32.xlu1 %v1106_v40, %s2452_s15  ;;  %v4362_v40 = vld [vmem:[#allocation70_spill] sm:$0xff] }
 0x182   :  { %1567 = vmatpush1.bf16.msra.mxu0 %v4359_v3  ;;  %1608 = vmatpush1.bf16.msra.mxu1 %v4360_v10 }
 0x183   :  { %1568 = vmatprep.subr.bf16.mxu0 %v4310_v63  ;;  %1609 = vmatprep.subr.bf16.mxu1 %v4311_v1 }
 0x186   :  { %1569 = vmatpush1.bf16.msra.mxu0 %v4312_v7  ;;  %1610 = vmatpush1.bf16.msra.mxu1 %v4313_v12 }
 0x187   :  { %1570 = vmatprep.subr.bf16.mxu0 %v4314_v6  ;;  %1611 = vmatprep.subr.bf16.mxu1 %v4315_v23 }
 0x18a   :  { %1571 = vmatpush1.bf16.msra.mxu0 %v4316_v39  ;;  %1612 = vmatpush1.bf16.msra.mxu1 %v4265_v50 }
 0x18b   :  { %1572 = vmatprep.subr.bf16.mxu0 %v4317_v25  ;;  %1613 = vmatprep.subr.bf16.mxu1 %v4318_v11 }
 0x18e   :  { %1573 = vmatpush1.bf16.msra.mxu0 %v4319_v22  ;;  %1614 = vmatpush1.bf16.msra.mxu1 %v4361_v14  ;;  %v4363_v14 = vld [vmem:[#allocation76_spill] sm:$0xff] }
 0x18f   :  { %1574 = vmatprep.subr.bf16.mxu0 %v4270_v13  ;;  %1615 = vmatprep.subr.bf16.mxu1 %v4271_v33 }
 0x192   :  { %1575 = vmatpush1.bf16.msra.mxu0 %v4272_v32  ;;  %1616 = vmatpush1.bf16.msra.mxu1 %v4362_v40 }
 0x193   :  { %1576 = vmatprep.subr.bf16.mxu0 %v4274_v16  ;;  %1617 = vmatprep.subr.bf16.mxu1 %v4275_v15  ;;  %v4364_v16 = vld [vmem:[#allocation81_spill] sm:$0xff] }
 0x196   :  { %1577 = vmatpush1.bf16.msra.mxu0 %v3058_v59  ;;  %1618 = vmatpush1.bf16.msra.mxu1 %v4276_v57 }
 0x197   :  { %1578 = vmatprep.subr.bf16.mxu0 %v4277_v58  ;;  %1619 = vmatprep.subr.bf16.mxu1 %v4278_v56 }
 0x19a   :  { %1579 = vmatpush1.bf16.msra.mxu0 %v4363_v14  ;;  %1620 = vmatpush1.bf16.msra.mxu1 %v3086_v2  ;;  %v3525_v14 = vld [vmem:[%s3989_s1 + $0x20] sm:$0xff]  ;;  %v4365_v2 = vld [vmem:[#allocation84_spill] sm:$0xff]  ;;  %s2453_s1 = smov 127  }
 0x19b   :  { %1580 = vmatprep.subr.bf16.mxu0 %v3088_v43  ;;  %1621 = vmatprep.subr.bf16.mxu1 %v3091_v4  ;;  %v4366_v4 = vld [vmem:[#allocation3_spill] sm:$0xff] }
 0x19c   :  { %v4370_v43 = vld [vmem:[#allocation7_spill] sm:$0xff] }
 0x19e   :  { %1581 = vmatpush1.bf16.msra.mxu0 %v4321_v31  ;;  %1622 = vmatpush1.bf16.msra.mxu1 %v4364_v16  ;;  %v4367_v31 = vld [vmem:[#allocation5_spill] sm:$0xff]  ;;  %v3533_v16 = vcombine.high %v3525_v14, %v3525_v14 }
 0x19f   :  { %2360 = vmatprep.subr.msk.bf16.mxu0 %vm740_vm1, %v3106_v49  ;;  %2362 = vmatprep.subr.msk.bf16.mxu1 %vm740_vm1, %v3109_v48  ;;  %v4368_v48 = vld [vmem:[#allocation4_spill] sm:$0xff]  ;;  %v4369_v49 = vld [vmem:[#allocation6_spill] sm:$0xff] }
 0x1a2   :  { %1583 = vmatpush1.bf16.msra.mxu0 %v4365_v2  ;;  %1624 = vmatpush1.bf16.msra.mxu1 %v3121_v0  ;;  %v4371_v0 = vld [vmem:[#allocation8_spill] sm:$0xff] }
 0x1a3   :  { %1740 = vmatprep.subr.bf16.mxu0 %v4366_v4  ;;  %1781 = vmatprep.subr.bf16.mxu1 %v4367_v31 }
 0x1a5   :  { %1591 = vmatmul.mubr.bf16.vlgmr.msra.gmra.mrb[28].mxu0 %v3456_v5  ;;  %1632 = vmatmul.mubr.bf16.vlgmr.msra.gmra.mrb[28].mxu1 %v3456_v5 }
 0x1a6   :  { %1741 = vmatpush1.bf16.msra.mxu0 %v4368_v48  ;;  %1782 = vmatpush1.bf16.msra.mxu1 %v4369_v49 }
 0x1a7   :  { %1742 = vmatprep.subr.bf16.mxu0 %v4370_v43  ;;  %1783 = vmatprep.subr.bf16.mxu1 %v4371_v0 }
 0x1a8   :  { %v1145_v2 = vpop.f32.mrb[12].mxu0  ;;  %2368 = vmatprep.mubr.msk.bf16.mxu0 %vm736_vm0, %v3533_v16  ;;  %v1186_v31 = vpop.f32.mrb[12].mxu1  ;;  %2370 = vmatprep.mubr.msk.bf16.mxu1 %vm736_vm0, %v3533_v16 }
 0x1a9   :  { %1209 = vrot.lane.b32.xlu0 %v1145_v2, %s2452_s15  ;;  %v1147_v4 = vpop.f32.mrb[13].mxu0  ;;  %v1188_v48 = vpop.f32.mrb[13].mxu1  ;;  %v4392_v2 = vld [vmem:[#allocation30_spill] sm:$0xff] }
 0x1aa   :  { %v1149_v5 = vpop.f32.mrb[14].mxu0  ;;  %1743 = vmatpush1.bf16.msra.mxu0 %v2533_v18  ;;  %1784 = vmatpush1.bf16.msra.mxu1 %v2537_v19  ;;  %v1190_v49 = vpop.f32.mrb[14].mxu1  ;;  %v4372_v18 = vld [vmem:[#allocation9_spill] sm:$0xff]  ;;  %v4373_v19 = vld [vmem:[#allocation10_spill] sm:$0xff] }
 0x1ab   :  { %v1150_v43 = vpop.f32.mrb[15].mxu0  ;;  %1744 = vmatprep.subr.bf16.mxu0 %v2539_v20  ;;  %1785 = vmatprep.subr.bf16.mxu1 %v2542_v21  ;;  %v1191_v0 = vpop.f32.mrb[15].mxu1  ;;  %v4374_v20 = vld [vmem:[#allocation11_spill] sm:$0xff]  ;;  %v4375_v21 = vld [vmem:[#allocation12_spill] sm:$0xff]  ;;  %v4395_v5 = vld [vmem:[#allocation33_spill] sm:$0xff] }
 0x1ac   :  { %v4397_v43 = vld [vmem:[#allocation34_spill] sm:$0xff]  ;;  %v4398_v49 = vld [vmem:[#allocation36_spill] sm:$0xff]  ;;  %v4399_v0 = vld [vmem:[#allocation37_spill] sm:$0xff] }
 0x1ad   :  { %1213 = vrot.lane.b32.xlu0 %v1186_v31, %s2452_s15  ;;  %v3597_v31 = vcombine.low %v3525_v14, %v3525_v14 }
 0x1ae   :  { %1745 = vmatpush1.bf16.msra.mxu0 %v2557_v26  ;;  %1786 = vmatpush1.bf16.msra.mxu1 %v2561_v27  ;;  %v4376_v26 = vld [vmem:[#allocation13_spill] sm:$0xff]  ;;  %v4377_v27 = vld [vmem:[#allocation14_spill] sm:$0xff] }
 0x1af   :  { %1746 = vmatprep.subr.bf16.mxu0 %v2563_v28  ;;  %1787 = vmatprep.subr.bf16.mxu1 %v2566_v29  ;;  %v4378_v28 = vld [vmem:[#allocation15_spill] sm:$0xff]  ;;  %v4379_v29 = vld [vmem:[#allocation16_spill] sm:$0xff] }
 0x1b1   :  { %1211 = vrot.lane.b32.xlu0 %v1147_v4, %s2452_s15  ;;  %v4393_v4 = vld [vmem:[#allocation31_spill] sm:$0xff] }
 0x1b2   :  { %1747 = vmatpush1.bf16.msra.mxu0 %v2581_v34  ;;  %1788 = vmatpush1.bf16.msra.mxu1 %v2585_v35  ;;  %v4380_v34 = vld [vmem:[#allocation17_spill] sm:$0xff]  ;;  %v4381_v35 = vld [vmem:[#allocation18_spill] sm:$0xff] }
 0x1b3   :  { %1748 = vmatprep.subr.bf16.mxu0 %v2587_v36  ;;  %1789 = vmatprep.subr.bf16.mxu1 %v2590_v37  ;;  %v4382_v36 = vld [vmem:[#allocation19_spill] sm:$0xff]  ;;  %v4383_v37 = vld [vmem:[#allocation20_spill] sm:$0xff] }
 0x1b5   :  { %1215 = vrot.lane.b32.xlu0 %v1188_v48, %s2452_s15  ;;  %v4396_v48 = vld [vmem:[#allocation35_spill] sm:$0xff] }
 0x1b6   :  { %1749 = vmatpush1.bf16.msra.mxu0 %v2605_v42  ;;  %1790 = vmatpush1.bf16.msra.mxu1 %v2614_v44  ;;  %v4384_v42 = vld [vmem:[#allocation22_spill] sm:$0xff]  ;;  %v4385_v44 = vld [vmem:[#allocation23_spill] sm:$0xff] }
 0x1b7   :  { %1750 = vmatprep.subr.bf16.mxu0 %v2616_v45  ;;  %1791 = vmatprep.subr.bf16.mxu1 %v2619_v46  ;;  %v4386_v45 = vld [vmem:[#allocation24_spill] sm:$0xff]  ;;  %v4387_v46 = vld [vmem:[#allocation25_spill] sm:$0xff] }
 0x1ba   :  { %1751 = vmatpush1.bf16.msra.mxu0 %v2638_v52  ;;  %1792 = vmatpush1.bf16.msra.mxu1 %v2644_v53  ;;  %v4388_v52 = vld [vmem:[#allocation26_spill] sm:$0xff]  ;;  %v4389_v53 = vld [vmem:[#allocation27_spill] sm:$0xff] }
 0x1bb   :  { %1752 = vmatprep.subr.bf16.mxu0 %v2646_v54  ;;  %1793 = vmatprep.subr.bf16.mxu1 %v2649_v55  ;;  %v4390_v54 = vld [vmem:[#allocation28_spill] sm:$0xff]  ;;  %v4391_v55 = vld [vmem:[#allocation29_spill] sm:$0xff] }
 0x1be   :  { %1753 = vmatpush1.bf16.msra.mxu0 %v4372_v18  ;;  %1794 = vmatpush1.bf16.msra.mxu1 %v4373_v19  ;;  %v4400_v18 = vld [vmem:[#allocation38_spill] sm:$0xff]  ;;  %v4401_v19 = vld [vmem:[#allocation39_spill] sm:$0xff] }
 0x1bf   :  { %1754 = vmatprep.subr.bf16.mxu0 %v4374_v20  ;;  %1795 = vmatprep.subr.bf16.mxu1 %v4375_v21  ;;  %v4402_v20 = vld [vmem:[#allocation40_spill] sm:$0xff] }
 0x1c2   :  { %1755 = vmatpush1.bf16.msra.mxu0 %v4376_v26  ;;  %1796 = vmatpush1.bf16.msra.mxu1 %v4377_v27 }
 0x1c3   :  { %1756 = vmatprep.subr.bf16.mxu0 %v4378_v28  ;;  %1797 = vmatprep.subr.bf16.mxu1 %v4379_v29  ;;  %v4403_v29 = vld [vmem:[#allocation42_spill] sm:$0xff] }
 0x1c6   :  { %1757 = vmatpush1.bf16.msra.mxu0 %v4380_v34  ;;  %1798 = vmatpush1.bf16.msra.mxu1 %v4381_v35 }
 0x1c7   :  { %1758 = vmatprep.subr.bf16.mxu0 %v4382_v36  ;;  %1799 = vmatprep.subr.bf16.mxu1 %v4383_v37 }
 0x1ca   :  { %1759 = vmatpush1.bf16.msra.mxu0 %v4331_v61  ;;  %1800 = vmatpush1.bf16.msra.mxu1 %v4384_v42  ;;  %v4394_v61 = vld [vmem:[#allocation32_spill] sm:$0xff] }
 0x1cb   :  { %1760 = vmatprep.subr.bf16.mxu0 %v4385_v44  ;;  %1801 = vmatprep.subr.bf16.mxu1 %v4386_v45 }
 0x1ce   :  { %1761 = vmatpush1.bf16.msra.mxu0 %v4387_v46  ;;  %1802 = vmatpush1.bf16.msra.mxu1 %v4388_v52 }
 0x1cf   :  { %1762 = vmatprep.subr.bf16.mxu0 %v4389_v53  ;;  %1803 = vmatprep.subr.bf16.mxu1 %v4390_v54 }
 0x1d2   :  { %1763 = vmatpush1.bf16.msra.mxu0 %v4391_v55  ;;  %1804 = vmatpush1.bf16.msra.mxu1 %v4392_v2 }
 0x1d3   :  { %2367 = vmatprep.subr.msk.bf16.mxu0 %vm740_vm1, %v4393_v4  ;;  %2369 = vmatprep.subr.msk.bf16.mxu1 %vm740_vm1, %v4394_v61 }
 0x1d6   :  { %1765 = vmatpush1.bf16.msra.mxu0 %v4395_v5  ;;  %1806 = vmatpush1.bf16.msra.mxu1 %v4396_v48 }
 0x1d7   :  { %1822 = vmatprep.subr.bf16.mxu0 %v4397_v43  ;;  %1863 = vmatprep.subr.bf16.mxu1 %v4398_v49 }
 0x1d9   :  { %1773 = vmatmul.mubr.bf16.vlgmr.msra.gmra.mrb[32].mxu0 %v3597_v31  ;;  %1814 = vmatmul.mubr.bf16.vlgmr.msra.gmra.mrb[32].mxu1 %v3597_v31 }
 0x1da   :  { %1823 = vmatpush1.bf16.msra.mxu0 %v4399_v0  ;;  %1864 = vmatpush1.bf16.msra.mxu1 %v4400_v18  ;;  %v3687_v18 = vpop.permute.xlu1 %945 }
 0x1db   :  { %1824 = vmatprep.subr.bf16.mxu0 %v4401_v19  ;;  %1865 = vmatprep.subr.bf16.mxu1 %v4402_v20  ;;  %v938_v19 = vpop.permute.xlu0 %937 }
 0x1dc   :  { %v3608_v14 = vpop.f32.mrb[16].mxu0  ;;  %2372 = vmatprep.mubr.msk.bf16.mxu0 %vm736_vm0, %v3533_v16  ;;  %v3615_v26 = vpop.f32.mrb[16].mxu1  ;;  %2374 = vmatprep.mubr.msk.bf16.mxu1 %vm736_vm0, %v3533_v16 }
 0x1dd   :  { %v3613_v21 = vpop.f32.mrb[17].mxu0  ;;  %v3620_v28 = vpop.f32.mrb[17].mxu1 }
 0x1de   :  { %v1331_v27 = vpop.f32.mrb[18].mxu0  ;;  %1825 = vmatpush1.bf16.msra.mxu0 %v4296_v24  ;;  %1866 = vmatpush1.bf16.msra.mxu1 %v4403_v29  ;;  %v1372_v35 = vpop.f32.mrb[18].mxu1  ;;  %v4407_v24 = vld [vmem:[#allocation77_spill] sm:$0xff] }
 0x1df   :  { %v1332_v34 = vpop.f32.mrb[19].mxu0  ;;  %1826 = vmatprep.subr.bf16.mxu0 %v4298_v51  ;;  %1867 = vmatprep.subr.bf16.mxu1 %v4352_v8  ;;  %v1373_v36 = vpop.f32.mrb[19].mxu1  ;;  %v4410_v51 = vld [vmem:[#allocation80_spill] sm:$0xff] }
 0x1e0   :  { %v3689_v20 = vpop.permute.xlu1 %949  ;;  %v3691_v27 = vpop.permute.xlu0 %941 }
 0x1e2   :  { %1827 = vmatpush1.bf16.msra.mxu0 %v4300_v47  ;;  %1868 = vmatpush1.bf16.msra.mxu1 %v4353_v41 }
 0x1e3   :  { %1828 = vmatprep.subr.bf16.mxu0 %v4354_v17  ;;  %1869 = vmatprep.subr.bf16.mxu1 %v4355_v9 }
 0x1e4   :  { %v3693_v29 = vpop.permute.xlu1 %947  ;;  %v940_v34 = vpop.permute.xlu0 %939 }
 0x1e6   :  { %1829 = vmatpush1.bf16.msra.mxu0 %v4356_v60  ;;  %1870 = vmatpush1.bf16.msra.mxu1 %v4357_v62  ;;  %v4404_v60 = vld [vmem:[#allocation66_spill] sm:$0xff] }
 0x1e7   :  { %1830 = vmatprep.subr.bf16.mxu0 %v4358_v30  ;;  %1871 = vmatprep.subr.bf16.mxu1 %v4307_v38  ;;  %v4408_v38 = vld [vmem:[#allocation78_spill] sm:$0xff] }
 0x1e8   :  { %v3695_v35 = vpop.permute.xlu1 %951  ;;  %v3697_v36 = vpop.permute.xlu0 %943 }
 0x1ea   :  { %1831 = vmatpush1.bf16.msra.mxu0 %v4359_v3  ;;  %1872 = vmatpush1.bf16.msra.mxu1 %v4360_v10 }
 0x1eb   :  { %1832 = vmatprep.subr.bf16.mxu0 %v4310_v63  ;;  %1873 = vmatprep.subr.bf16.mxu1 %v4311_v1  ;;  %v4405_v63 = vld [vmem:[#allocation71_spill] sm:$0xff] }
 0x1ee   :  { %1833 = vmatpush1.bf16.msra.mxu0 %v4312_v7  ;;  %1874 = vmatpush1.bf16.msra.mxu1 %v4313_v12 }
 0x1ef   :  { %1834 = vmatprep.subr.bf16.mxu0 %v4314_v6  ;;  %1875 = vmatprep.subr.bf16.mxu1 %v4315_v23  ;;  %v4406_v6 = vld [vmem:[#allocation76_spill] sm:$0xff] }
 0x1f2   :  { %1835 = vmatpush1.bf16.msra.mxu0 %v4316_v39  ;;  %1876 = vmatpush1.bf16.msra.mxu1 %v4265_v50 }
 0x1f3   :  { %1836 = vmatprep.subr.bf16.mxu0 %v4317_v25  ;;  %1877 = vmatprep.subr.bf16.mxu1 %v4318_v11 }
 0x1f6   :  { %1837 = vmatpush1.bf16.msra.mxu0 %v4319_v22  ;;  %1878 = vmatpush1.bf16.msra.mxu1 %v4404_v60  ;;  %v3699_v60 = vpop.permute.xlu1 %1201 }
 0x1f7   :  { %1838 = vmatprep.subr.bf16.mxu0 %v4270_v13  ;;  %1879 = vmatprep.subr.bf16.mxu1 %v4271_v33  ;;  %v4409_v13 = vld [vmem:[#allocation79_spill] sm:$0xff] }
 0x1fa   :  { %1839 = vmatpush1.bf16.msra.mxu0 %v4272_v32  ;;  %1880 = vmatpush1.bf16.msra.mxu1 %v4362_v40  ;;  %v4411_v32 = vld [vmem:[#allocation81_spill] sm:$0xff] }
 0x1fb   :  { %1840 = vmatprep.subr.bf16.mxu0 %v4405_v63  ;;  %1881 = vmatprep.subr.bf16.mxu1 %v4275_v15  ;;  %v4412_v15 = vld [vmem:[#allocation82_spill] sm:$0xff] }
 0x1fe   :  { %1841 = vmatpush1.bf16.msra.mxu0 %v3058_v59  ;;  %1882 = vmatpush1.bf16.msra.mxu1 %v4276_v57  ;;  %v4413_v57 = vld [vmem:[#allocation83_spill] sm:$0xff] }
 0x1ff   :  { %1842 = vmatprep.subr.bf16.mxu0 %v4277_v58  ;;  %1883 = vmatprep.subr.bf16.mxu1 %v4278_v56  ;;  %v4414_v58 = vld [vmem:[#allocation84_spill] sm:$0xff]  ;;  %v4415_v56 = vld [vmem:[#allocation85_spill] sm:$0xff] }
 0x202   :  { %1843 = vmatpush1.bf16.msra.mxu0 %v4406_v6  ;;  %1884 = vmatpush1.bf16.msra.mxu1 %v4407_v24  ;;  %v3703_v6 = vpop.permute.xlu1 %1205  ;;  %v124_v24 = vlaneseq }
 0x203   :  { %1844 = vmatprep.subr.bf16.mxu0 %v4408_v38  ;;  %1885 = vmatprep.subr.bf16.mxu1 %v4409_v13 }
 0x204   :  { %v125_v13 = vand.u32 127, %v124_v24 }
 0x206   :  { %1845 = vmatpush1.bf16.msra.mxu0 %v4410_v51  ;;  %1886 = vmatpush1.bf16.msra.mxu1 %v4411_v32  ;;  %v1204_v51 = vpop.permute.xlu1 %1203  ;;  %v126_v32 = vadd.s32 128, %v125_v13 }
 0x207   :  { %2371 = vmatprep.subr.msk.bf16.mxu0 %vm740_vm1, %v4412_v15  ;;  %2373 = vmatprep.subr.msk.bf16.mxu1 %vm740_vm1, %v4413_v57  ;;  %v127_v57 = vadd.s32 256, %v125_v13 }
 0x20a   :  { %1847 = vmatpush1.bf16.msra.mxu0 %v4414_v58  ;;  %1888 = vmatpush1.bf16.msra.mxu1 %v4415_v56  ;;  %v128_v58 = vadd.s32 384, %v125_v13  ;;  %v129_v56 = vadd.s32 512, %v125_v13 }
 0x20d   :  { %1855 = vmatmul.mubr.bf16.vlgmr.msra.gmra.mrb[36].mxu0 %v3597_v31  ;;  %1896 = vmatmul.mubr.bf16.vlgmr.msra.gmra.mrb[36].mxu1 %v3597_v31 }
 0x210   :  { %v3671_v59 = vpop.f32.mrb[20].mxu0  ;;  %v3675_v16 = vpop.f32.mrb[20].mxu1 }
 0x211   :  { %v3673_v33 = vpop.f32.mrb[21].mxu0  ;;  %v3677_v47 = vpop.f32.mrb[21].mxu1 }
 0x212   :  { %v1413_v50 = vpop.f32.mrb[22].mxu0  ;;  %v1454_v7 = vpop.f32.mrb[22].mxu1 }
 0x213   :  { %v1414_v1 = vpop.f32.mrb[23].mxu0  ;;  %v1455_v23 = vpop.f32.mrb[23].mxu1  ;;  %v130_v50 = vadd.s32 640, %v125_v13  ;;  %v3709_v7 = vand.u32 7, %v125_v13 }
 0x214   :  { %v131_v1 = vadd.s32 768, %v125_v13  ;;  %v132_v23 = vadd.s32 896, %v125_v13  ;;  %v956_v13 = vsel %vm953_vm2, %v3691_v27, %v3697_v36 }
 0x21b   :  { %v3701_v63 = vpop.permute.xlu0 %1209 }
 0x21f   :  { %v3705_v38 = vpop.permute.xlu0 %1213 }
 0x223   :  { %v3707_v15 = vpop.permute.xlu0 %1211 }
 0x244   :  { %v1510_v39 = vpop.f32.mrb[24].mxu0  ;;  %v1551_v22 = vpop.f32.mrb[24].mxu1 }
 0x245   :  { %1648 = vrot.lane.b32.xlu0 %v1510_v39, %s2453_s1  ;;  %v1512_v11 = vpop.f32.mrb[25].mxu0  ;;  %v1553_v25 = vpop.f32.mrb[25].mxu1  ;;  %v3711_v39 = vand.u32 7, %v126_v32  ;;  %v1218_v32 = vsel %vm1217_vm10, %v3699_v60, %v1204_v51 }
 0x246   :  { %1650 = vrot.lane.b32.xlu1 %v1512_v11, %s2453_s1  ;;  %v1514_v12 = vpop.f32.mrb[26].mxu0  ;;  %v1555_v41 = vpop.f32.mrb[26].mxu1 }
 0x247   :  { %v1515_v8 = vpop.f32.mrb[27].mxu0  ;;  %v1556_v17 = vpop.f32.mrb[27].mxu1  ;;  %v3715_v12 = vand.u32 7, %v128_v58  ;;  %v3721_v41 = vand.u32 7, %v131_v1 }
 0x248   :  { %v1208_v11 = vpop.permute.xlu1 %1207  ;;  %v3719_v8 = vand.u32 7, %v130_v50  ;;  %v3723_v17 = vpop.permute.xlu0 %1215 }
 0x249   :  { %1652 = vrot.lane.b32.xlu0 %v1551_v22, %s2453_s1  ;;  %v3713_v22 = vand.u32 7, %v127_v57  ;;  %v1219_v57 = vsel %vm1217_vm10, %v1204_v51, %v3703_v6  ;;  %v1221_v50 = vsel %vm1217_vm10, %v1208_v11, %v3701_v63 }
 0x24a   :  { %1654 = vrot.lane.b32.xlu1 %v1553_v25, %s2453_s1  ;;  %v3717_v25 = vand.u32 7, %v129_v56  ;;  %v1220_v56 = vsel %vm1217_vm10, %v3703_v6, %v1208_v11  ;;  %v957_v6 = vsel %vm953_vm2, %v3697_v36, %v3687_v18  ;;  %v960_v36 = vsel %vm953_vm2, %v3689_v20, %v3695_v35 }
 0x278   :  { %v1592_v9 = vpop.f32.mrb[28].mxu0  ;;  %v1633_v30 = vpop.f32.mrb[28].mxu1 }
 0x279   :  { %1656 = vrot.lane.b32.xlu1 %v1592_v9, %s2453_s1  ;;  %v1594_v62 = vpop.f32.mrb[29].mxu0  ;;  %v1635_v10 = vpop.f32.mrb[29].mxu1  ;;  %v970_v9 = vadd.s32 4294967294, %v3709_v7 }
 0x27a   :  { %v1596_v3 = vpop.f32.mrb[30].mxu0  ;;  %v1637_v37 = vpop.f32.mrb[30].mxu1 }
 0x27b   :  { %v1597_v40 = vpop.f32.mrb[31].mxu0  ;;  %v1638_v42 = vpop.f32.mrb[31].mxu1  ;;  %v974_v37 = vadd.s32 4294967294, %v3717_v25  ;;  %vm978_vm3 = vcmp.ge.s32.totalorder %v970_v9, 0 }
 0x27c   :  { %v973_v40 = vadd.s32 4294967294, %v3715_v12  ;;  %v3735_v42 = vadd.s32 4294967294, %v3719_v8 }
 0x27d   :  { %1658 = vrot.lane.b32.xlu1 %v1594_v62, %s2453_s1  ;;  %v3726_v62 = vand.u32 7, %v132_v23  ;;  %vm982_vm7 = vcmp.ge.s32.totalorder %v974_v37, 0 }
 0x27e   :  { %vm981_vm6 = vcmp.ge.s32.totalorder %v973_v40, 0  ;;  %vm983_vm8 = vcmp.ge.s32.totalorder %v3735_v42, 0  ;;  %v1681_v42 = vadd.s32 1, %v3709_v7 }
 0x27f   :  { %v1241_v9 = vadd.s32 4294967295, %v3726_v62 }
 0x2ac   :  { %v1774_v44 = vpop.f32.mrb[32].mxu0  ;;  %v1815_v46 = vpop.f32.mrb[32].mxu1 }
 0x2ad   :  { %1912 = vrot.lane.b32.xlu0 %v1774_v44, %s2454_s18  ;;  %v1776_v45 = vpop.f32.mrb[33].mxu0  ;;  %v1817_v53 = vpop.f32.mrb[33].mxu1  ;;  %v3738_v44 = vadd.s32 4294967294, %v3721_v41 }
 0x2ae   :  { %1914 = vrot.lane.b32.xlu1 %v1776_v45, %s2454_s18  ;;  %v1778_v52 = vpop.f32.mrb[34].mxu0  ;;  %v1819_v55 = vpop.f32.mrb[34].mxu1 }
 0x2af   :  { %v1779_v54 = vpop.f32.mrb[35].mxu0  ;;  %v1820_v2 = vpop.f32.mrb[35].mxu1  ;;  %v1234_v52 = vadd.s32 4294967295, %v3709_v7  ;;  %v1237_v55 = vadd.s32 4294967295, %v3715_v12  ;;  %vm984_vm9 = vcmp.ge.s32.totalorder %v3738_v44, 0  ;;  %v1682_v44 = vadd.s32 1, %v3711_v39 }
 0x2b0   :  { %v1236_v54 = vadd.s32 4294967295, %v3713_v22  ;;  %v969_v2 = vsel %vm953_vm2, 0.0, %v938_v19 }
 0x2b1   :  { %1916 = vrot.lane.b32.xlu0 %v1815_v46, %s2454_s18  ;;  %v3743_v46 = vadd.s32 4294967294, %v3726_v62  ;;  %vm1242_vm12 = vcmp.ge.s32.totalorder %v1234_v52, 0  ;;  %vm1245_vm15 = vcmp.ge.s32.totalorder %v1237_v55, 0 }
 0x2b2   :  { %1660 = vrot.lane.b32.xlu1 %v1633_v30, %s2453_s1  ;;  %v971_v30 = vadd.s32 4294967294, %v3711_v39  ;;  %vm1244_vm14 = vcmp.ge.s32.totalorder %v1236_v54, 0 }
 0x2b3   :  { %vm985_vm11 = vcmp.ge.s32.totalorder %v3743_v46, 0  ;;  %v1268_v11 = vsel %vm1244_vm14, %v1219_v57, 0.0  ;;  %v1683_v46 = vadd.s32 1, %v3713_v22 }
 0x2b4   :  { %vm979_vm4 = vcmp.ge.s32.totalorder %v971_v30, 0  ;;  %v1269_v30 = vsel %vm1245_vm15, %v1220_v56, 0.0  ;;  %v1009_v35 = vsel %vm985_vm11, %v960_v36, 0.0  ;;  %v1945_v56 = vadd.s32 2, %v3709_v7 }
 0x2b5   :  { %1918 = vrot.lane.b32.xlu0 %v1817_v53, %s2454_s18  ;;  %v1235_v53 = vadd.s32 4294967295, %v3711_v39  ;;  %v1685_v7 = vadd.s32 1, %v3717_v25 }
 0x2b6   :  { %1662 = vrot.lane.b32.xlu1 %v1635_v10, %s2453_s1  ;;  %v972_v10 = vadd.s32 4294967294, %v3713_v22  ;;  %vm1961_vm11 = vcmp.lt.s32.totalorder %v1945_v56, 8 }
 0x2b7   :  { %v3740_v45 = vpop.permute.xlu0 %1648  ;;  %vm1243_vm13 = vcmp.ge.s32.totalorder %v1235_v53, 0 }
 0x2b8   :  { %v3729_v3 = vpop.permute.xlu1 %1650  ;;  %vm980_vm5 = vcmp.ge.s32.totalorder %v972_v10, 0  ;;  %v1267_v23 = vsel %vm1243_vm13, %v1218_v32, 0.0  ;;  %vm1701_vm13 = vcmp.lt.s32.totalorder %v1685_v7, 8 }
 0x2e0   :  { %v1856_v4 = vpop.f32.mrb[36].mxu0  ;;  %v1897_v61 = vpop.f32.mrb[36].mxu1 }
 0x2e1   :  { %1920 = vrot.lane.b32.xlu0 %v1856_v4, %s2454_s18  ;;  %v1858_v31 = vpop.f32.mrb[37].mxu0  ;;  %v1899_v5 = vpop.f32.mrb[37].mxu1  ;;  %v954_v4 = vsel %vm953_vm2, %v938_v19, %v940_v34 }
 0x2e2   :  { %v1860_v48 = vpop.f32.mrb[38].mxu0  ;;  %1926 = vrot.lane.b32.xlu1 %v1899_v5, %s2454_s18  ;;  %v1901_v49 = vpop.f32.mrb[38].mxu1  ;;  %v1238_v5 = vadd.s32 4294967295, %v3717_v25  ;;  %v1003_v19 = vsel %vm979_vm4, %v954_v4, 0.0  ;;  %v1006_v4 = vsel %vm982_vm7, %v957_v6, 0.0  ;;  %vm1664_vm4 = vcmask 1039360  }
 0x2e3   :  { %v1861_v43 = vpop.f32.mrb[39].mxu0  ;;  %v1902_v0 = vpop.f32.mrb[39].mxu1  ;;  %v1239_v48 = vadd.s32 4294967295, %v3719_v8  ;;  %vm1699_vm7 = vcmp.lt.s32.totalorder %v1683_v46, 8 }
 0x2e4   :  { %v1240_v43 = vadd.s32 4294967295, %v3721_v41  ;;  %v3761_v49 = vpop.permute.xlu0 %1652  ;;  %v1002_v0 = vsel %vm978_vm3, %v969_v2, 0.0  ;;  %vm1246_vm0 = vcmp.ge.s32.totalorder %v1238_v5, 0  ;;  %v1005_v2 = vsel %vm981_vm6, %v956_v13, 0.0 }
 0x2e5   :  { %1922 = vrot.lane.b32.xlu0 %v1858_v31, %s2454_s18  ;;  %v955_v31 = vsel %vm953_vm2, %v940_v34, %v3691_v27  ;;  %v1233_v34 = vsel %vm1217_vm10, 0.0, %v3699_v60  ;;  %vm1247_vm1 = vcmp.ge.s32.totalorder %v1239_v48, 0  ;;  %v1222_v27 = vsel %vm1217_vm10, %v3701_v63, %v3707_v15 }
 0x2e6   :  { %v1004_v24 = vsel %vm980_vm5, %v955_v31, 0.0  ;;  %v1266_v1 = vsel %vm1242_vm12, %v1233_v34, 0.0  ;;  %vm1248_vm3 = vcmp.ge.s32.totalorder %v1240_v43, 0  ;;  %v1223_v60 = vsel %vm1217_vm10, %v3707_v15, %v3705_v38 }
 0x2e7   :  { %v958_v63 = vsel %vm953_vm2, %v3687_v18, %v3693_v29  ;;  %v959_v15 = vsel %vm953_vm2, %v3693_v29, %v3689_v20  ;;  %v1270_v10 = vsel %vm1246_vm0, %v1221_v50, 0.0  ;;  %v1274_v52 = vadd.f32 %v1266_v1, %v1002_v0 }
 0x2e8   :  { %v1271_v53 = vsel %vm1247_vm1, %v1222_v27, 0.0  ;;  %v1272_v54 = vsel %vm1248_vm3, %v1223_v60, 0.0  ;;  %v1275_v18 = vadd.f32 %v1267_v23, %v1003_v19  ;;  %v1276_v31 = vadd.f32 %v1268_v11, %v1004_v24 }
 0x2e9   :  { %1924 = vrot.lane.b32.xlu0 %v1897_v61, %s2454_s18  ;;  %v3753_v61 = vpop.permute.xlu1 %1654  ;;  %v1007_v29 = vsel %vm983_vm8, %v958_v63, 0.0  ;;  %v1008_v55 = vsel %vm984_vm9, %v959_v15, 0.0  ;;  %v1277_v43 = vadd.f32 %v1269_v30, %v1005_v2  ;;  %v1278_v20 = vadd.f32 %v1270_v10, %v1006_v4 }
 0x2ea   :  { %v1279_v48 = vadd.f32 %v1271_v53, %v1007_v29  ;;  %v1280_v40 = vadd.f32 %v1272_v54, %v1008_v55  ;;  %vm1249_vm2 = vcmp.ge.s32.totalorder %v1241_v9, 0  ;;  %v1224_v0 = vsel %vm1217_vm10, %v3705_v38, %v3723_v17 }
 0x2eb   :  { %v1457_v19 = vadd.f32 %v3608_v14, %v1274_v52  ;;  %v1458_v34 = vadd.f32 %v3613_v21, %v1275_v18  ;;  %v1459_v24 = vadd.f32 %v3615_v26, %v1276_v31  ;;  %v1684_v13 = vadd.s32 1, %v3715_v12 }
 0x2ec   :  { %v1460_v57 = vadd.f32 %v3620_v28, %v1277_v43  ;;  %v3829_v38 = vadd.f32 %v3671_v59, %v1278_v20  ;;  %v1946_v14 = vadd.s32 2, %v3711_v39  ;;  %v1273_v17 = vsel %vm1249_vm2, %v1224_v0, 0.0 }
 0x2ed   :  { %v3775_v58 = vpop.permute.xlu1 %1656  ;;  %v3834_v21 = vadd.f32 %v3673_v33, %v1279_v48  ;;  %v3837_v26 = vadd.f32 %v3675_v16, %v1280_v40  ;;  %vm1697_vm5 = vcmp.lt.s32.totalorder %v1681_v42, 8  ;;  %vm1698_vm6 = vcmp.lt.s32.totalorder %v1682_v44, 8 }
 0x2ee   :  { %v1666_v28 = vsel %vm1664_vm4, %v3729_v3, %v3761_v49  ;;  %v1947_v59 = vadd.s32 2, %v3713_v22  ;;  %v1665_v39 = vsel %vm1664_vm4, %v3740_v45, %v3729_v3  ;;  %vm1700_vm8 = vcmp.lt.s32.totalorder %v1684_v13, 8 }
 0x2ef   :  { %vm1928_vm9 = vcmask 1031168   ;;  %v1667_v16 = vsel %vm1664_vm4, %v3761_v49, %v3753_v61  ;;  %vm1962_vm10 = vcmp.lt.s32.totalorder %v1946_v14, 8  ;;  %v1714_v1 = vsel %vm1698_vm6, %v1666_v28, 0.0 }
 0x2f0   :  { %v1686_v22 = vadd.s32 1, %v3719_v8  ;;  %v1687_v3 = vadd.s32 1, %v3721_v41  ;;  %v1713_v45 = vsel %vm1697_vm5, %v1665_v39, 0.0  ;;  %vm1963_vm12 = vcmp.lt.s32.totalorder %v1947_v59, 8 }
 0x2f1   :  { %v3809_v5 = vpop.permute.xlu1 %1658  ;;  %v1715_v6 = vsel %vm1699_vm7, %v1667_v16, 0.0  ;;  %v1668_v23 = vsel %vm1664_vm4, %v3753_v61, %v3775_v58  ;;  %v1948_v9 = vadd.s32 2, %v3715_v12  ;;  %v1281_v63 = vadd.f32 %v1273_v17, %v1009_v35 }
 0x2f2   :  { %v1722_v15 = vadd.f32 %v1714_v1, %v1458_v34  ;;  %v1688_v30 = vadd.s32 1, %v3726_v62  ;;  %v1721_v10 = vadd.f32 %v1713_v45, %v1457_v19  ;;  %vm1702_vm14 = vcmp.lt.s32.totalorder %v1686_v22, 8 }
 0x2f3   :  { %v1723_v52 = vadd.f32 %v1715_v6, %v1459_v24  ;;  %v1716_v53 = vsel %vm1700_vm8, %v1668_v23, 0.0  ;;  %v1669_v61 = vsel %vm1664_vm4, %v3775_v58, %v3809_v5  ;;  %vm1703_vm15 = vcmp.lt.s32.totalorder %v1687_v3, 8 }
 0x2f4   :  { %vm1964_vm0 = vcmp.lt.s32.totalorder %v1948_v9, 8  ;;  %v1952_v2 = vadd.s32 2, %v3726_v62  ;;  %v1949_v4 = vadd.s32 2, %v3717_v25  ;;  %vm1704_vm1 = vcmp.lt.s32.totalorder %v1688_v30, 8 }
 0x2f5   :  { %v1950_v55 = vadd.s32 2, %v3719_v8  ;;  %v1724_v43 = vadd.f32 %v1716_v53, %v1460_v57  ;;  %v1717_v58 = vsel %vm1701_vm13, %v1669_v61, 0.0  ;;  %v1951_v35 = vadd.s32 2, %v3721_v41 }
 0x2f6   :  { %vm1968_vm3 = vcmp.lt.s32.totalorder %v1952_v2, 8  ;;  %vm1965_vm2 = vcmp.lt.s32.totalorder %v1949_v4, 8  ;;  %v1725_v8 = vadd.f32 %v1717_v58, %v3829_v38  ;;  %v1464_v39 = vadd.f32 %v3677_v47, %v1281_v63 }
 0x2f7   :  { %vm1966_vm5 = vcmp.lt.s32.totalorder %v1950_v55, 8  ;;  %v2455_v53 = vmov 0   ;;  %v2456_v58 = vmov 1  }
 0x2f8   :  { %2397 = vset.pattern.permute.xlu1 %v2455_v53  ;;  %2398 = vset.pattern.permute.xlu0 %v2456_v58 }
 0x31f   :  { %v3788_v51 = vpop.permute.xlu0 %1912 }
 0x320   :  { %v1915_v32 = vpop.permute.xlu1 %1914 }
 0x321   :  { %v1929_v60 = vsel %vm1928_vm9, %v3788_v51, %v1915_v32 }
 0x322   :  { %v1977_v51 = vsel %vm1961_vm11, %v1929_v60, 0.0 }
 0x323   :  { %v1917_v37 = vpop.permute.xlu0 %1916  ;;  %v3872_v18 = vadd.f32 %v1977_v51, %v1721_v10 }
 0x324   :  { %v1930_v50 = vsel %vm1928_vm9, %v1915_v32, %v1917_v37  ;;  %v1661_v27 = vpop.permute.xlu1 %1660 }
 0x325   :  { %v1978_v11 = vsel %vm1962_vm10, %v1930_v50, 0.0  ;;  %v1670_v25 = vsel %vm1664_vm4, %v3809_v5, %v1661_v27  ;;  %v2006_v41 = vmul.f32 %v3872_v18, %v3872_v18 }
 0x326   :  { %v3868_v54 = vadd.f32 %v1978_v11, %v1722_v15  ;;  %v1718_v34 = vsel %vm1702_vm14, %v1670_v25, 0.0 }
 0x327   :  { %v1919_v33 = vpop.permute.xlu0 %1918  ;;  %v1726_v28 = vadd.f32 %v1718_v34, %v3834_v21 }
 0x328   :  { %v1931_v49 = vsel %vm1928_vm9, %v1917_v37, %v1919_v33  ;;  %v1663_v12 = vpop.permute.xlu1 %1662  ;;  %v2007_v62 = vmul.f32 %v3868_v54, %v3868_v54  ;;  %v2014_v5 = vadd.f32 %v3868_v54, %v3872_v18 }
 0x329   :  { %v1979_v36 = vsel %vm1963_vm12, %v1931_v49, 0.0  ;;  %v1671_v48 = vsel %vm1664_vm4, %v1661_v27, %v1663_v12  ;;  %v1680_v37 = vsel %vm1664_vm4, %v1663_v12, 0.0  ;;  %vm1967_vm4 = vcmp.lt.s32.totalorder %v1951_v35, 8 }
 0x32a   :  { %v3874_v31 = vadd.f32 %v1979_v36, %v1723_v52  ;;  %v1719_v24 = vsel %vm1703_vm15, %v1671_v48, 0.0  ;;  %v2015_v13 = vadd.f32 %v2007_v62, %v2006_v41  ;;  %v1720_v32 = vsel %vm1704_vm1, %v1680_v37, 0.0 }
 0x32b   :  { %v1728_v27 = vadd.f32 %v1720_v32, %v1464_v39 }
 0x32c   :  { %v2008_v19 = vmul.f32 %v3874_v31, %v3874_v31  ;;  %v2016_v38 = vadd.f32 %v2014_v5, %v3874_v31 }
 0x32e   :  { %v2017_v59 = vadd.f32 %v2015_v13, %v2008_v19 }
 0x353   :  { %v1921_v29 = vpop.permute.xlu0 %1920 }
 0x354   :  { %v1932_v20 = vsel %vm1928_vm9, %v1919_v33, %v1921_v29  ;;  %v1927_v42 = vpop.permute.xlu1 %1926  ;;  %v1727_v33 = vadd.f32 %v1719_v24, %v3837_v26 }
 0x355   :  { %v1980_v40 = vsel %vm1964_vm0, %v1932_v20, 0.0  ;;  %v1944_v17 = vsel %vm1928_vm9, %v1927_v42, 0.0  ;;  %v2047_v20 = vld [vmem:[%s3990_s2] sm:$0xff] }
 0x356   :  { %v3886_v0 = vadd.f32 %v1980_v40, %v1724_v43  ;;  %v1984_v3 = vsel %vm1968_vm3, %v1944_v17, 0.0 }
 0x357   :  { %v1923_v44 = vpop.permute.xlu0 %1922  ;;  %v1992_v26 = vadd.f32 %v1984_v3, %v1728_v27 }
 0x358   :  { %v1933_v46 = vsel %vm1928_vm9, %v1921_v29, %v1923_v44  ;;  %v2009_v14 = vmul.f32 %v3886_v0, %v3886_v0  ;;  %v2018_v7 = vadd.f32 %v2016_v38, %v3886_v0 }
 0x359   :  { %v1981_v57 = vsel %vm1965_vm2, %v1933_v46, 0.0  ;;  %v2013_v51 = vmul.f32 %v1992_v26, %v1992_v26 }
 0x35a   :  { %v1989_v56 = vadd.f32 %v1981_v57, %v1725_v8  ;;  %v2019_v6 = vadd.f32 %v2017_v59, %v2009_v14 }
 0x35b   :  { %v1925_v16 = vpop.permute.xlu0 %1924 }
 0x35c   :  { %v2010_v50 = vmul.f32 %v1989_v56, %v1989_v56  ;;  %v1934_v1 = vsel %vm1928_vm9, %v1923_v44, %v1925_v16  ;;  %v1935_v22 = vsel %vm1928_vm9, %v1925_v16, %v1927_v42  ;;  %v2020_v47 = vadd.f32 %v2018_v7, %v1989_v56 }
 0x35d   :  { %v1982_v45 = vsel %vm1966_vm5, %v1934_v1, 0.0  ;;  %v1983_v21 = vsel %vm1967_vm4, %v1935_v22, 0.0 }
 0x35e   :  { %v1990_v60 = vadd.f32 %v1982_v45, %v1726_v28  ;;  %v1991_v49 = vadd.f32 %v1983_v21, %v1727_v33  ;;  %v2021_v9 = vadd.f32 %v2019_v6, %v2010_v50 }
 0x360   :  { %v2022_v23 = vadd.f32 %v2020_v47, %v1990_v60  ;;  %v2011_v11 = vmul.f32 %v1990_v60, %v1990_v60  ;;  %v2012_v15 = vmul.f32 %v1991_v49, %v1991_v49 }
 0x362   :  { %v2024_v63 = vadd.f32 %v2022_v23, %v1991_v49  ;;  %v2023_v30 = vadd.f32 %v2021_v9, %v2011_v11  ;;  %v2140_v9 = vld [vmem:[%s3991_s3 + $0x8] sm:$0xff] }
 0x364   :  { %v2026_v10 = vadd.f32 %v2024_v63, %v1992_v26  ;;  %v2025_v36 = vadd.f32 %v2023_v30, %v2012_v15 }
 0x366   :  { %2038 = vadd.xlane.f32.xlu0 %v2026_v10  ;;  %v2027_v52 = vadd.f32 %v2025_v36, %v2013_v51  ;;  %v2141_v10 = vld [vmem:[%s3991_s3 + $0x10] sm:$0xff]  ;;  %v2142_v51 = vld [vmem:[%s3991_s3 + $0x18] sm:$0xff] }
 0x368   :  { %2041 = vadd.xlane.f32.xlu1 %v2027_v52 }
 0x3f3   :  { %v2039_v61 = vpop.xlane.xlu0 %2038 }
 0x3f4   :  { %v2043_v12 = vmul.f32 0.0009765625, %v2039_v61  ;;  %v2143_v61 = vld [vmem:[%s3991_s3 + $0x20] sm:$0xff] }
 0x3f5   :  { %v2042_v2 = vpop.xlane.xlu1 %2041 }
 0x3f6   :  { %v2045_v4 = vmul.f32 %v2043_v12, %v2043_v12  ;;  %v2044_v29 = vmul.f32 0.0009765625, %v2042_v2 }
 0x3f8   :  { %v2046_v55 = vsub.f32 %v2044_v29, %v2045_v4 }
 0x3fa   :  { %v2048_v43 = vadd.f32 1e-05, %v2046_v55  ;;  %v2144_v55 = vld [vmem:[%s3991_s3 + $0x28] sm:$0xff] }
 0x3fc   :  { %2417 = vrsqrt.f32 %v2048_v43 }
 0x406   :  { %v2418_v35 = vpop.eup %2417 }
 0x407   :  { %v2050_v62 = vmul.f32 %v2418_v35, %v2047_v20 }
 0x409   :  { %2059 = vperm.xlu1 %2397, %v2050_v62   ;;  %v2051_v25 = vmul.f32 %v2050_v62, %v2043_v12  ;;  %v2145_v62 = vld [vmem:[%s3991_s3 + $0x30] sm:$0xff] }
 0x40b   :  { %2053 = vrot.lane.b32.xlu0 %v2051_v25, %s2452_s15 }
 0x47d   :  { %v2054_v48 = vpop.permute.xlu0 %2053 }
 0x47e   :  { %v2056_v40 = vsub.f32 %v2047_v20, %v2054_v48 }
 0x480   :  { %2064 = vperm.xlu0 %2398, %v2056_v40  }
 0x488   :  { %v2060_v37 = vpop.permute.xlu1 %2059 }
 0x489   :  { %v2075_v8 = vmul.f32 %v2060_v37, %v3872_v18  ;;  %v2076_v41 = vmul.f32 %v2060_v37, %v3868_v54  ;;  %v2077_v19 = vmul.f32 %v2060_v37, %v3874_v31  ;;  %v2078_v42 = vmul.f32 %v2060_v37, %v3886_v0 }
 0x48a   :  { %v2079_v44 = vmul.f32 %v2060_v37, %v1989_v56  ;;  %v2080_v5 = vmul.f32 %v2060_v37, %v1990_v60  ;;  %v2081_v34 = vmul.f32 %v2060_v37, %v1991_v49  ;;  %v2082_v38 = vmul.f32 %v2060_v37, %v1992_v26  ;;  %v2139_v26 = vld [vmem:[%s3991_s3] sm:$0xff] }
 0x4ff   :  { %v2065_v24 = vpop.permute.xlu0 %2064 }
 0x500   :  { %v2083_v46 = vadd.f32 %v2075_v8, %v2065_v24  ;;  %v2084_v13 = vadd.f32 %v2076_v41, %v2065_v24  ;;  %v2085_v32 = vadd.f32 %v2077_v19, %v2065_v24  ;;  %v2086_v57 = vadd.f32 %v2078_v42, %v2065_v24  ;;  %v2146_v8 = vld [vmem:[%s3991_s3 + $0x38] sm:$0xff] }
 0x501   :  { %v3920_v14 = vadd.f32 %v2079_v44, %v2065_v24  ;;  %v3922_v17 = vadd.f32 %v2080_v5, %v2065_v24  ;;  %v3924_v18 = vadd.f32 %v2081_v34, %v2065_v24  ;;  %v3926_v54 = vadd.f32 %v2082_v38, %v2065_v24 }
 0x502   :  { %v2099_v31 = vmin.f32 %v2083_v46, 0.0  ;;  %v2100_v28 = vmin.f32 %v2084_v13, 0.0  ;;  %v2101_v0 = vmin.f32 %v2085_v32, 0.0  ;;  %v2102_v56 = vmin.f32 %v2086_v57, 0.0 }
 0x503   :  { %v2103_v59 = vmin.f32 %v3920_v14, 0.0  ;;  %v2104_v39 = vmin.f32 %v3922_v17, 0.0  ;;  %v2105_v33 = vmin.f32 %v3924_v18, 0.0  ;;  %v2106_v1 = vmin.f32 %v3926_v54, 0.0 }
 0x504   :  { %v2107_v16 = vmul.f32 1.442695, %v2099_v31  ;;  %v2109_v7 = vmul.f32 1.442695, %v2100_v28  ;;  %v2111_v50 = vmul.f32 1.442695, %v2101_v0 }
 0x505   :  { %v2113_v22 = vmul.f32 1.442695, %v2102_v56  ;;  %v2115_v27 = vmul.f32 1.442695, %v2103_v59  ;;  %v2117_v3 = vmul.f32 1.442695, %v2104_v39 }
 0x506   :  { %2419 = vpow2.f32 %v2107_v16  ;;  %v2119_v45 = vmul.f32 1.442695, %v2105_v33  ;;  %v2121_v21 = vmul.f32 1.442695, %v2106_v1  ;;  %vm2091_vm6 = vcmp.gt.f32.partialorder %v2083_v46, 0.0 }
 0x507   :  { %2421 = vpow2.f32 %v2109_v7  ;;  %vm2092_vm7 = vcmp.gt.f32.partialorder %v2084_v13, 0.0  ;;  %vm2093_vm8 = vcmp.gt.f32.partialorder %v2085_v32, 0.0  ;;  %vm2094_vm9 = vcmp.gt.f32.partialorder %v2086_v57, 0.0 }
 0x508   :  { %2423 = vpow2.f32 %v2111_v50  ;;  %vm2095_vm10 = vcmp.gt.f32.partialorder %v3920_v14, 0.0  ;;  %vm2096_vm11 = vcmp.gt.f32.partialorder %v3922_v17, 0.0  ;;  %vm2097_vm12 = vcmp.gt.f32.partialorder %v3924_v18, 0.0 }
 0x509   :  { %2425 = vpow2.f32 %v2113_v22  ;;  %vm2098_vm13 = vcmp.gt.f32.partialorder %v3926_v54, 0.0 }
 0x50a   :  { %2427 = vpow2.f32 %v2115_v27 }
 0x50b   :  { %2429 = vpow2.f32 %v2117_v3 }
 0x50c   :  { %2431 = vpow2.f32 %v2119_v45 }
 0x50d   :  { %2433 = vpow2.f32 %v2121_v21 }
 0x510   :  { %v2420_v60 = vpop.eup %2419 }
 0x511   :  { %v2422_v49 = vpop.eup %2421  ;;  %v2375_v47 = vadd.f32 -1.0, %v2420_v60 }
 0x512   :  { %v2424_v6 = vpop.eup %2423  ;;  %v2376_v23 = vadd.f32 -1.0, %v2422_v49 }
 0x513   :  { %v2426_v11 = vpop.eup %2425  ;;  %v2377_v63 = vadd.f32 -1.0, %v2424_v6  ;;  %v2131_v15 = vsel %vm2091_vm6, %v2083_v46, %v2375_v47 }
 0x514   :  { %v2428_v30 = vpop.eup %2427  ;;  %v2378_v36 = vadd.f32 -1.0, %v2426_v11  ;;  %v2132_v52 = vsel %vm2092_vm7, %v2084_v13, %v2376_v23  ;;  %v2147_v4 = vadd.f32 %v2139_v26, %v2131_v15 }
 0x515   :  { %v2430_v53 = vpop.eup %2429  ;;  %v2379_v12 = vadd.f32 -1.0, %v2428_v30  ;;  %v2133_v2 = vsel %vm2093_vm8, %v2085_v32, %v2377_v63  ;;  %v2148_v20 = vadd.f32 %v2140_v9, %v2132_v52 }
 0x516   :  { %v2432_v29 = vpop.eup %2431  ;;  %v2380_v43 = vadd.f32 -1.0, %v2430_v53  ;;  %v2134_v58 = vsel %vm2094_vm9, %v2086_v57, %v2378_v36  ;;  %v2149_v40 = vadd.f32 %v2141_v10, %v2133_v2  ;;  %v2163_v34 = vmin.f32 %v2147_v4, 0.0 }
 0x517   :  { %v2434_v35 = vpop.eup %2433  ;;  %v2381_v25 = vadd.f32 -1.0, %v2432_v29  ;;  %v2135_v48 = vsel %vm2095_vm10, %v3920_v14, %v2379_v12  ;;  %v2150_v37 = vadd.f32 %v2142_v51, %v2134_v58  ;;  %v2164_v13 = vmin.f32 %v2148_v20, 0.0 }
 0x518   :  { %v2382_v41 = vadd.f32 -1.0, %v2434_v35  ;;  %v2136_v19 = vsel %vm2096_vm11, %v3922_v17, %v2380_v43  ;;  %v2151_v42 = vadd.f32 %v2143_v61, %v2135_v48  ;;  %v2165_v57 = vmin.f32 %v2149_v40, 0.0 }
 0x519   :  { %v2137_v44 = vsel %vm2097_vm12, %v3924_v18, %v2381_v25  ;;  %v2152_v5 = vadd.f32 %v2144_v55, %v2136_v19  ;;  %v2166_v38 = vmin.f32 %v2150_v37, 0.0  ;;  %v2171_v0 = vmul.f32 1.442695, %v2163_v34 }
 0x51a   :  { %v2138_v24 = vsel %vm2098_vm13, %v3926_v54, %v2382_v41  ;;  %v2153_v46 = vadd.f32 %v2145_v62, %v2137_v44  ;;  %v2167_v14 = vmin.f32 %v2151_v42, 0.0  ;;  %v2173_v56 = vmul.f32 1.442695, %v2164_v13 }
 0x51b   :  { %v2154_v32 = vadd.f32 %v2146_v8, %v2138_v24  ;;  %v2168_v31 = vmin.f32 %v2152_v5, 0.0  ;;  %v2175_v59 = vmul.f32 1.442695, %v2165_v57  ;;  %v2177_v39 = vmul.f32 1.442695, %v2166_v38 }
 0x51c   :  { %v2169_v28 = vmin.f32 %v2153_v46, 0.0  ;;  %2435 = vpow2.f32 %v2171_v0  ;;  %v2179_v33 = vmul.f32 1.442695, %v2167_v14  ;;  %vm2155_vm14 = vcmp.gt.f32.partialorder %v2147_v4, 0.0 }
 0x51d   :  { %v2170_v17 = vmin.f32 %v2154_v32, 0.0  ;;  %2437 = vpow2.f32 %v2173_v56  ;;  %v2181_v18 = vmul.f32 1.442695, %v2168_v31  ;;  %vm2156_vm15 = vcmp.gt.f32.partialorder %v2148_v20, 0.0 }
 0x51e   :  { %2439 = vpow2.f32 %v2175_v59  ;;  %v2183_v16 = vmul.f32 1.442695, %v2169_v28  ;;  %vm2157_vm0 = vcmp.gt.f32.partialorder %v2149_v40, 0.0  ;;  %vm2158_vm1 = vcmp.gt.f32.partialorder %v2150_v37, 0.0 }
 0x51f   :  { %2441 = vpow2.f32 %v2177_v39  ;;  %v2185_v54 = vmul.f32 1.442695, %v2170_v17  ;;  %vm2159_vm3 = vcmp.gt.f32.partialorder %v2151_v42, 0.0  ;;  %vm2160_vm2 = vcmp.gt.f32.partialorder %v2152_v5, 0.0 }
 0x520   :  { %2443 = vpow2.f32 %v2179_v33  ;;  %vm2161_vm5 = vcmp.gt.f32.partialorder %v2153_v46, 0.0  ;;  %vm2162_vm4 = vcmp.gt.f32.partialorder %v2154_v32, 0.0 }
 0x521   :  { %2445 = vpow2.f32 %v2181_v18 }
 0x522   :  { %2447 = vpow2.f32 %v2183_v16 }
 0x523   :  { %2449 = vpow2.f32 %v2185_v54 }
 0x526   :  { %v2436_v7 = vpop.eup %2435 }
 0x527   :  { %v2438_v50 = vpop.eup %2437  ;;  %v2383_v1 = vadd.f32 -1.0, %v2436_v7 }
 0x528   :  { %v2440_v22 = vpop.eup %2439  ;;  %v2384_v27 = vadd.f32 -1.0, %v2438_v50 }
 0x529   :  { %v2442_v3 = vpop.eup %2441  ;;  %v2385_v45 = vadd.f32 -1.0, %v2440_v22  ;;  %v2195_v21 = vsel %vm2155_vm14, %v2147_v4, %v2383_v1 }
 0x52a   :  { %v2444_v60 = vpop.eup %2443  ;;  %v2386_v49 = vadd.f32 -1.0, %v2442_v3  ;;  %v2196_v47 = vsel %vm2156_vm15, %v2148_v20, %v2384_v27  ;;  %2203 = vst [vmem:[%s3992_s4] sm:$0xff] %v2195_v21 }
 0x52b   :  { %v2446_v6 = vpop.eup %2445  ;;  %v2387_v26 = vadd.f32 -1.0, %v2444_v60  ;;  %v2197_v23 = vsel %vm2157_vm0, %v2149_v40, %v2385_v45  ;;  %2204 = vst [vmem:[%s3992_s4 + $0x8] sm:$0xff] %v2196_v47 }
 0x52c   :  { %v2448_v11 = vpop.eup %2447  ;;  %v2388_v9 = vadd.f32 -1.0, %v2446_v6  ;;  %v2198_v63 = vsel %vm2158_vm1, %v2150_v37, %v2386_v49  ;;  %2205 = vst [vmem:[%s3992_s4 + $0x10] sm:$0xff] %v2197_v23 }
 0x52d   :  { %v2450_v15 = vpop.eup %2449  ;;  %v2389_v30 = vadd.f32 -1.0, %v2448_v11  ;;  %v2199_v10 = vsel %vm2159_vm3, %v2151_v42, %v2387_v26  ;;  %2206 = vst [vmem:[%s3992_s4 + $0x18] sm:$0xff] %v2198_v63 }
 0x52e   :  { %v2390_v51 = vadd.f32 -1.0, %v2450_v15  ;;  %v2200_v36 = vsel %vm2160_vm2, %v2152_v5, %v2388_v9  ;;  %2207 = vst [vmem:[%s3992_s4 + $0x20] sm:$0xff] %v2199_v10 }
 0x52f   :  { %v2201_v52 = vsel %vm2161_vm5, %v2153_v46, %v2389_v30  ;;  %2208 = vst [vmem:[%s3992_s4 + $0x28] sm:$0xff] %v2200_v36 }
 0x530   :  { %v2202_v53 = vsel %vm2162_vm4, %v2154_v32, %v2390_v51  ;;  %2209 = vst [vmem:[%s3992_s4 + $0x30] sm:$0xff] %v2201_v52 }
 0x531   :  { %2210 = vst [vmem:[%s3992_s4 + $0x38] sm:$0xff] %v2202_v53 }

</bundles_post_ra>
